<compile_context>
chip_gen: v7x
topology: tpu7x:2x2x1
jax: 0.10.0
libtpu: 0.0.40
codegen_flags: <defaults>
</compile_context>

<pallas_src>
import jax
import jax.numpy as jnp
from jax.experimental import pallas as pl
from jax.experimental.pallas import tpu as pltpu

NUM_TILES = 8          # utils.get_num_tiles() is external; fixed deterministically
OBJ_CLASSES = 3
INPUT_SIZE = NUM_TILES * OBJ_CLASSES   # 24
HIDDEN = 128
BN_EPS = 1e-5
LEAKY_SLOPE = 0.01
OUT_DIM = 8
OUT_PAD = 128                          # lane-dense padded width of head tensors


# ----------------------------------------------------------------------------
# Fused kernel: merged-branch LSTM recurrence + MLP heads, single invocation.
# ----------------------------------------------------------------------------
def _make_fused_kernel(T, Bpad, H):
    def kernel(x_ref, wih_ref, whh_ref, bg_ref, whead_hbm, hvec_hbm,
               out_ref, whead_vmem, hvec_vmem, dma_sems):
        f32 = jnp.float32
        bf16 = jnp.bfloat16

        # --- start MLP-head weight DMAs now; they are only needed after the T
        # serial LSTM steps, so their latency is hidden behind the recurrence.
        cp_w = pltpu.make_async_copy(whead_hbm, whead_vmem, dma_sems.at[0])
        cp_v = pltpu.make_async_copy(hvec_hbm, hvec_vmem, dma_sems.at[1])
        cp_w.start()
        cp_v.start()

        # --- hoisted input projection: one matmul for all T steps, both
        # branches at once (block-diagonal W_ih_cat, bias folded in).
        # x_ref: (T*Bpad, DP) bf16, wih_ref: (DP, 8H) bf16 -> (T*Bpad, 8H) f32
        gates_all = jnp.dot(x_ref[...], wih_ref[...],
                            preferred_element_type=f32) + bg_ref[...]

        w_hh = whh_ref[...]                       # (2H, 8H) bf16, block-diag
        h = jnp.zeros((Bpad, 2 * H), f32)         # [h_x | h_y] lane-concat
        c = jnp.zeros((Bpad, 2 * H), f32)

        # --- recurrence: fully unrolled (T is tiny).
        # TODO(synk): switch to lax.fori_loop(..., unroll=k) if T ever grows
        # beyond toy sizes (static Python loop does not bound vreg live ranges).
        for t in range(T):
            # sublane-aligned slice (Bpad is a multiple of 8).
            g_t = gates_all[t * Bpad:(t + 1) * Bpad, :]
            # single K=256 MXU op per step for BOTH branches.
            gates = g_t + jnp.dot(h.astype(bf16), w_hh,
                                  preferred_element_type=f32)
            # gate columns: [i_x, i_y, f_x, f_y, g_x, g_y, o_x, o_y] (H each).
            act_if = jax.nn.sigmoid(gates[:, 0:4 * H])   # i and f in one EUP op
            i_g = act_if[:, 0:2 * H]
            f_g = act_if[:, 2 * H:4 * H]
            g_g = jnp.tanh(gates[:, 4 * H:6 * H])
            o_g = jax.nn.sigmoid(gates[:, 6 * H:8 * H])
            c = f_g * c + i_g * g_g
            h = o_g * jnp.tanh(c)

        # --- head weights have had T steps of compute to arrive.
        cp_w.wait()
        cp_v.wait()

        def leaky(v):
            return jnp.where(v >= 0, v, LEAKY_SLOPE * v)

        hv = hvec_vmem[...]                       # (8, 128) f32 packed vectors
        w1 = whead_vmem[0:2 * H, :]               # (256, 128) block-diag fc1
        w2 = whead_vmem[2 * H:2 * H + OUT_PAD, :]             # (128, 128) fc2
        w3 = whead_vmem[2 * H + OUT_PAD:2 * H + 2 * OUT_PAD, :]  # (128, 128) fc3

        h1 = leaky(jnp.dot(h.astype(bf16), w1,
                           preferred_element_type=f32) + hv[0:1, :])
        h1 = h1 * hv[1:2, :] + hv[2:3, :]         # folded eval-mode BatchNorm1d
        h2 = leaky(jnp.dot(h1.astype(bf16), w2,
                           preferred_element_type=f32) + hv[3:4, :])
        # TODO(synk): Dropout(0.4) is identity in eval mode; training-mode
        # masking is not emitted.
        out = jnp.dot(h2.astype(bf16), w3,
                      preferred_element_type=f32) + hv[4:5, :]
        out_ref[...] = out.astype(out_ref.dtype)  # lane-dense (Bpad, 128) store

    return kernel


def _fused_rnn_heads(x_cat, p, T, Bpad):
    """x_cat: (T*Bpad, DP) bf16, p: prepared params -> (Bpad, OUT_PAD) f32."""
    H = HIDDEN
    # VMEM guard (review item): the hoisted input projection keeps a
    # (T*Bpad, 8H) f32 intermediate fully resident.  On v7x the default scoped
    # VMEM budget (32 MiB of 64 MiB physical) is ~2x smaller than v5e/v6e, so
    # tile the input projection over T if this ever grows large.
    gates_bytes = T * Bpad * 8 * H * 4
    assert gates_bytes <= 16 * 1024 * 1024, (
        "T*B too large for the all-VMEM-resident design; tile the hoisted "
        "input projection over T.")

    kernel = _make_fused_kernel(T, Bpad, H)
    vmem = pl.BlockSpec(memory_space=pltpu.MemorySpace.VMEM)
    hbm = pl.BlockSpec(memory_space=pl.ANY)

    return pl.pallas_call(
        kernel,
        out_shape=jax.ShapeDtypeStruct((Bpad, OUT_PAD), jnp.float32),
        in_specs=[
            vmem,   # x_cat        (T*Bpad, DP)  bf16
            vmem,   # W_ih_cat     (DP, 8H)      bf16
            vmem,   # W_hh_cat     (2H, 8H)      bf16
            vmem,   # b_gates_cat  (1, 8H)       f32
            hbm,    # w_head       (512, 128)    bf16   (manual DMA)
            hbm,    # head_vecs    (8, 128)      f32    (manual DMA)
        ],
        out_specs=vmem,
        scratch_shapes=[
            pltpu.VMEM(p["w_head"].shape, jnp.bfloat16),
            pltpu.VMEM(p["head_vecs"].shape, jnp.float32),
            pltpu.SemaphoreType.DMA((2,)),
        ],
    )(x_cat, p["wih"], p["whh"], p["b"], p["w_head"], p["head_vecs"])


# ----------------------------------------------------------------------------
# One-time parameter preparation (hoisted out of the per-call jitted path).
# ----------------------------------------------------------------------------
def _interleave_gate_cols(w_x, w_y):
    """Block-diag merge of two (rows, 4H) gate matrices into (rows_x+rows_y, 8H)
    with column order [i_x, i_y, f_x, f_y, g_x, g_y, o_x, o_y]."""
    H = HIDDEN
    rx, ry = w_x.shape[0], w_y.shape[0]
    wx = w_x.reshape(rx, 4, H)
    wy = w_y.reshape(ry, 4, H)
    top = jnp.stack([wx, jnp.zeros_like(wx)], axis=2).reshape(rx, 8 * H)
    bot = jnp.stack([jnp.zeros_like(wy), wy], axis=2).reshape(ry, 8 * H)
    return jnp.concatenate([top, bot], axis=0)


def _interleave_gate_bias(b_x, b_y):
    H = HIDDEN
    bx = b_x.reshape(1, 4, H)
    by = b_y.reshape(1, 4, H)
    return jnp.stack([bx, by], axis=2).reshape(1, 8 * H)


def _block_diag(a, b):
    ra, ca = a.shape
    rb, cb = b.shape
    top = jnp.concatenate([a, jnp.zeros((ra, cb), a.dtype)], axis=1)
    bot = jnp.concatenate([jnp.zeros((rb, ca), b.dtype), b], axis=1)
    return jnp.concatenate([top, bot], axis=0)


def prepare_params(lstm_x_p, lstm_y_p, fc_x_p, fc_y_p):
    """Pack / fold / cast / pad all weights ONCE.  Nothing here runs per call."""
    H = HIDDEN
    wih_x, whh_x, b_x = lstm_x_p
    wih_y, whh_y, b_y = lstm_y_p
    D = wih_x.shape[0]
    DP = ((2 * D + 127) // 128) * 128          # lane-pad concat input dim

    wih_cat = _interleave_gate_cols(wih_x, wih_y)            # (2D, 8H)
    wih_cat = jnp.pad(wih_cat, ((0, DP - 2 * D), (0, 0)))    # (DP, 8H)
    whh_cat = _interleave_gate_cols(whh_x, whh_y)            # (2H, 8H)
    b_cat = _interleave_gate_bias(b_x, b_y)                  # (1, 8H)

    def fold_bn(fp):
        scale = fp["gamma"] * jax.lax.rsqrt(fp["var"] + BN_EPS)
        shift = fp["beta"] - fp["mean"] * scale
        return scale, shift

    s_x, t_x = fold_bn(fc_x_p)
    s_y, t_y = fold_bn(fc_y_p)

    # Block-diagonal head weights, all padded to 128 lanes.
    w1_cat = _block_diag(fc_x_p["w1"], fc_y_p["w1"])          # (256, 128)
    w2_cat = _block_diag(fc_x_p["w2"], fc_y_p["w2"])          # (128, 64)
    w2_cat = jnp.pad(w2_cat, ((0, 0), (0, OUT_PAD - 64)))     # (128, 128)
    w3_cat = jnp.zeros((OUT_PAD, OUT_PAD), jnp.float32)
    w3_cat = w3_cat.at[0:32, 0:OUT_DIM].set(fc_x_p["w3"])
    w3_cat = w3_cat.at[32:64, OUT_DIM:2 * OUT_DIM].set(fc_y_p["w3"])
    w_head = jnp.concatenate([w1_cat, w2_cat, w3_cat], axis=0)  # (512, 128)

    def cat_vec(vx, vy):
        v = jnp.concatenate([vx, vy], axis=1)
        return jnp.pad(v, ((0, 0), (0, OUT_PAD - v.shape[1])))

    head_vecs = jnp.concatenate([
        cat_vec(fc_x_p["b1"], fc_y_p["b1"]),   # row 0: fc1 bias
        cat_vec(s_x, s_y),                     # row 1: folded BN scale
        cat_vec(t_x, t_y),                     # row 2: folded BN shift
        cat_vec(fc_x_p["b2"], fc_y_p["b2"]),   # row 3: fc2 bias (zero-padded)
        cat_vec(fc_x_p["b3"], fc_y_p["b3"]),   # row 4: fc3 bias (zero-padded)
        jnp.zeros((3, OUT_PAD), jnp.float32),  # rows 5-7: sublane padding
    ], axis=0)                                                # (8, 128)

    return {
        "wih": wih_cat.astype(jnp.bfloat16),
        "whh": whh_cat.astype(jnp.bfloat16),
        "b": b_cat,                                   # f32
        "w_head": w_head.astype(jnp.bfloat16),
        "head_vecs": head_vecs,                       # f32
    }


# ----------------------------------------------------------------------------
# Per-call forward: one x layout op + one fused pallas_call.
# ----------------------------------------------------------------------------
@jax.jit
def rnn_forward(x, params):
    # x: (B, T, 2, INPUT_SIZE) f32
    B, T = x.shape[0], x.shape[1]
    D = x.shape[-1]
    DP = params["wih"].shape[0]
    Bpad = ((B + 7) // 8) * 8

    # (B, T, 2, D) -> (T, Bpad, 2D) with branches lane-concatenated [x | y],
    # then flattened t-major to (T*Bpad, DP) bf16.  Single fused layout op.
    xt = jnp.transpose(x, (1, 0, 2, 3)).reshape(T, B, 2 * D)
    xt = jnp.pad(xt, ((0, 0), (0, Bpad - B), (0, DP - 2 * D)))
    x_cat = xt.reshape(T * Bpad, DP).astype(jnp.bfloat16)

    out = _fused_rnn_heads(x_cat, params, T, Bpad)            # (Bpad, 128)
    return out[:B, 0:OUT_DIM], out[:B, OUT_DIM:2 * OUT_DIM]


# ----------------------------------------------------------------------------
# Parameter construction (deterministic, synthetic) + pure-JAX reference.
# ----------------------------------------------------------------------------
def _uniform(key, shape, scale):
    return jax.random.uniform(key, shape, jnp.float32, -scale, scale)


def make_lstm_params(key, input_size, hidden):
    k1, k2, k3, k4 = jax.random.split(key, 4)
    s = 1.0 / jnp.sqrt(hidden)
    w_ih = _uniform(k1, (input_size, 4 * hidden), s)   # transposed vs torch (4H, D)
    w_hh = _uniform(k2, (hidden, 4 * hidden), s)       # transposed vs torch (4H, H)
    b = (_uniform(k3, (1, 4 * hidden), s)
         + _uniform(k4, (1, 4 * hidden), s))           # b_ih + b_hh
    return (w_ih, w_hh, b)


def make_fc_params(key, in_dim=128):
    ks = jax.random.split(key, 6)

    def lin(kw, kb, din, dout):
        s = 1.0 / jnp.sqrt(din)
        return _uniform(kw, (din, dout), s), _uniform(kb, (1, dout), s)

    w1, b1 = lin(ks[0], ks[1], in_dim, 64)
    w2, b2 = lin(ks[2], ks[3], 64, 32)
    w3, b3 = lin(ks[4], ks[5], 32, OUT_DIM)
    return {
        "w1": w1, "b1": b1,
        "gamma": jnp.ones((1, 64), jnp.float32),
        "beta": jnp.zeros((1, 64), jnp.float32),
        "mean": jnp.zeros((1, 64), jnp.float32),
        "var": jnp.ones((1, 64), jnp.float32),
        "w2": w2, "b2": b2,
        "w3": w3, "b3": b3,
    }


def _ref_branch(x_b, lstm_p, fc_p):
    """Pure-JAX per-branch reference mirroring the kernel's bf16 weight casts."""
    bf16, f32 = jnp.bfloat16, jnp.float32
    H = HIDDEN
    w_ih, w_hh, b = lstm_p
    B = x_b.shape[0]
    h = jnp.zeros((B, H), f32)
    c = jnp.zeros((B, H), f32)
    for t in range(x_b.shape[1]):
        gates = (jnp.dot(x_b[:, t].astype(bf16), w_ih.astype(bf16),
                         preferred_element_type=f32)
                 + jnp.dot(h.astype(bf16), w_hh.astype(bf16),
                           preferred_element_type=f32) + b)
        i = jax.nn.sigmoid(gates[:, 0:H])
        f = jax.nn.sigmoid(gates[:, H:2 * H])
        g = jnp.tanh(gates[:, 2 * H:3 * H])
        o = jax.nn.sigmoid(gates[:, 3 * H:4 * H])
        c = f * c + i * g
        h = o * jnp.tanh(c)

    def leaky(v):
        return jnp.where(v >= 0, v, LEAKY_SLOPE * v)

    scale = fc_p["gamma"] * jax.lax.rsqrt(fc_p["var"] + BN_EPS)
    shift = fc_p["beta"] - fc_p["mean"] * scale
    h1 = leaky(jnp.dot(h.astype(bf16), fc_p["w1"].astype(bf16),
                       preferred_element_type=f32) + fc_p["b1"])
    h1 = h1 * scale + shift
    h2 = leaky(jnp.dot(h1.astype(bf16), fc_p["w2"].astype(bf16),
                       preferred_element_type=f32) + fc_p["b2"])
    out = jnp.dot(h2.astype(bf16), fc_p["w3"].astype(bf16),
                  preferred_element_type=f32) + fc_p["b3"]
    return out


if __name__ == "__main__":
    key = jax.random.PRNGKey(0)
    k_in, k_lx, k_ly, k_fx, k_fy = jax.random.split(key, 5)

    B, T = 2, 8
    x = jax.random.normal(k_in, (B, T, 2, INPUT_SIZE), jnp.float32)

    lstm_x_p = make_lstm_params(k_lx, INPUT_SIZE, HIDDEN)
    lstm_y_p = make_lstm_params(k_ly, INPUT_SIZE, HIDDEN)
    fc_x_p = make_fc_params(k_fx)
    fc_y_p = make_fc_params(k_fy)

    # One-time packing (NOT on the per-call path).
    params = prepare_params(lstm_x_p, lstm_y_p, fc_x_p, fc_y_p)

    out_x, out_y = rnn_forward(x, params)
    jax.block_until_ready((out_x, out_y))
    assert out_x.shape == (B, OUT_DIM) and out_y.shape == (B, OUT_DIM)

    # Tolerance check against a pure-JAX reference (same bf16 weight casts).
    ref_x = _ref_branch(x[:, :, 0, :], lstm_x_p, fc_x_p)
    ref_y = _ref_branch(x[:, :, 1, :], lstm_y_p, fc_y_p)
    assert bool(jnp.allclose(out_x, ref_x, atol=1e-2, rtol=1e-2))
    assert bool(jnp.allclose(out_y, ref_y, atol=1e-2, rtol=1e-2))

    print("KERNEL_OK")
</pallas_src>

<mosaic_0001>
module attributes {stable_mosaic.version = 11 : i64} {
  func.func @kernel(%arg0: memref<64x128xbf16, #tpu.memory_space<vmem>>, %arg1: memref<128x1024xbf16, #tpu.memory_space<vmem>>, %arg2: memref<256x1024xbf16, #tpu.memory_space<vmem>>, %arg3: memref<1x1024xf32, #tpu.memory_space<vmem>>, %arg4: memref<512x128xbf16, #tpu.memory_space<any>>, %arg5: memref<8x128xf32, #tpu.memory_space<any>>, %arg6: memref<8x128xf32, #tpu.memory_space<vmem>>, %arg7: memref<512x128xbf16, #tpu.memory_space<vmem>>, %arg8: memref<8x128xf32, #tpu.memory_space<vmem>>, %arg9: memref<2x!tpu.dma_semaphore, #tpu.memory_space<semaphore_mem>>) attributes {dimension_semantics = [], scalar_prefetch = 0 : i64, scratch_operands = 3 : i64, tpu.core_type = #tpu.core_type<tc>} {
    %c0_i32 = arith.constant 0 : i32
    %0 = tpu.memref_slice %arg9[%c0_i32] : memref<2x!tpu.dma_semaphore, #tpu.memory_space<semaphore_mem>> -> memref<1x!tpu.dma_semaphore, #tpu.memory_space<semaphore_mem>>
    %1 = tpu.memref_squeeze %0 : memref<1x!tpu.dma_semaphore, #tpu.memory_space<semaphore_mem>> -> memref<!tpu.dma_semaphore, #tpu.memory_space<semaphore_mem>>
    tpu.enqueue_dma source(%arg4 : memref<512x128xbf16, #tpu.memory_space<any>>) target(%arg7 : memref<512x128xbf16, #tpu.memory_space<vmem>>) target_semaphore(%1 : memref<!tpu.dma_semaphore, #tpu.memory_space<semaphore_mem>>)
    %c1_i32 = arith.constant 1 : i32
    %2 = tpu.memref_slice %arg9[%c1_i32] : memref<2x!tpu.dma_semaphore, #tpu.memory_space<semaphore_mem>> -> memref<1x!tpu.dma_semaphore, #tpu.memory_space<semaphore_mem>>
    %3 = tpu.memref_squeeze %2 : memref<1x!tpu.dma_semaphore, #tpu.memory_space<semaphore_mem>> -> memref<!tpu.dma_semaphore, #tpu.memory_space<semaphore_mem>>
    tpu.enqueue_dma source(%arg5 : memref<8x128xf32, #tpu.memory_space<any>>) target(%arg8 : memref<8x128xf32, #tpu.memory_space<vmem>>) target_semaphore(%3 : memref<!tpu.dma_semaphore, #tpu.memory_space<semaphore_mem>>)
    %c0 = arith.constant 0 : index
    %c0_0 = arith.constant 0 : index
    %4 = vector.load %arg0[%c0, %c0_0] : memref<64x128xbf16, #tpu.memory_space<vmem>>, vector<64x128xbf16>
    %c0_1 = arith.constant 0 : index
    %c0_2 = arith.constant 0 : index
    %5 = vector.load %arg1[%c0_1, %c0_2] : memref<128x1024xbf16, #tpu.memory_space<vmem>>, vector<128x1024xbf16>
    %cst = arith.constant dense<0.000000e+00> : vector<64x1024xf32>
    %6 = tpu.matmul %4, %5, %cst {dimension_numbers = #tpu.dot_dimension_numbers<[1], [0], [0], [1], [0, 0, 1, 1], [], []>} : vector<64x128xbf16>, vector<128x1024xbf16>, vector<64x1024xf32> -> vector<64x1024xf32>
    %c0_3 = arith.constant 0 : index
    %c0_4 = arith.constant 0 : index
    %7 = vector.load %arg3[%c0_3, %c0_4] : memref<1x1024xf32, #tpu.memory_space<vmem>>, vector<1x1024xf32>
    %8 = vector.broadcast %7 : vector<1x1024xf32> to vector<64x1024xf32>
    %9 = arith.addf %6, %8 : vector<64x1024xf32>
    %c0_5 = arith.constant 0 : index
    %c0_6 = arith.constant 0 : index
    %10 = vector.load %arg2[%c0_5, %c0_6] : memref<256x1024xbf16, #tpu.memory_space<vmem>>, vector<256x1024xbf16>
    %cst_7 = arith.constant 0.000000e+00 : f32
    %11 = vector.broadcast %cst_7 : f32 to vector<8x256xf32>
    %cst_8 = arith.constant 0.000000e+00 : f32
    %12 = vector.broadcast %cst_8 : f32 to vector<8x256xf32>
    %13 = vector.extract_strided_slice %9 {offsets = [0, 0], sizes = [8, 1024], strides = [1, 1]} : vector<64x1024xf32> to vector<8x1024xf32>
    %14 = arith.truncf %11 : vector<8x256xf32> to vector<8x256xbf16>
    %cst_9 = arith.constant dense<0.000000e+00> : vector<8x1024xf32>
    %15 = tpu.matmul %14, %10, %cst_9 {dimension_numbers = #tpu.dot_dimension_numbers<[1], [0], [0], [1], [0, 0, 1, 1], [], []>} : vector<8x256xbf16>, vector<256x1024xbf16>, vector<8x1024xf32> -> vector<8x1024xf32>
    %16 = arith.addf %13, %15 : vector<8x1024xf32>
    %17 = vector.extract_strided_slice %16 {offsets = [0, 0], sizes = [8, 512], strides = [1, 1]} : vector<8x1024xf32> to vector<8x512xf32>
    %18 = arith.negf %17 : vector<8x512xf32>
    %19 = math.exp %18 : vector<8x512xf32>
    %cst_10 = arith.constant 1.000000e+00 : f32
    %20 = vector.broadcast %cst_10 : f32 to vector<8x512xf32>
    %21 = arith.addf %20, %19 : vector<8x512xf32>
    %22 = arith.divf %20, %21 : vector<8x512xf32>
    %23 = vector.extract_strided_slice %22 {offsets = [0, 0], sizes = [8, 256], strides = [1, 1]} : vector<8x512xf32> to vector<8x256xf32>
    %24 = vector.extract_strided_slice %22 {offsets = [0, 256], sizes = [8, 256], strides = [1, 1]} : vector<8x512xf32> to vector<8x256xf32>
    %25 = vector.extract_strided_slice %16 {offsets = [0, 512], sizes = [8, 256], strides = [1, 1]} : vector<8x1024xf32> to vector<8x256xf32>
    %26 = math.tanh %25 : vector<8x256xf32>
    %27 = vector.extract_strided_slice %16 {offsets = [0, 768], sizes = [8, 256], strides = [1, 1]} : vector<8x1024xf32> to vector<8x256xf32>
    %28 = arith.negf %27 : vector<8x256xf32>
    %29 = math.exp %28 : vector<8x256xf32>
    %cst_11 = arith.constant 1.000000e+00 : f32
    %30 = vector.broadcast %cst_11 : f32 to vector<8x256xf32>
    %31 = arith.addf %30, %29 : vector<8x256xf32>
    %32 = arith.divf %30, %31 : vector<8x256xf32>
    %33 = arith.mulf %24, %12 : vector<8x256xf32>
    %34 = arith.mulf %23, %26 : vector<8x256xf32>
    %35 = arith.addf %33, %34 : vector<8x256xf32>
    %36 = math.tanh %35 : vector<8x256xf32>
    %37 = arith.mulf %32, %36 : vector<8x256xf32>
    %38 = vector.extract_strided_slice %9 {offsets = [8, 0], sizes = [8, 1024], strides = [1, 1]} : vector<64x1024xf32> to vector<8x1024xf32>
    %39 = arith.truncf %37 : vector<8x256xf32> to vector<8x256xbf16>
    %cst_12 = arith.constant dense<0.000000e+00> : vector<8x1024xf32>
    %40 = tpu.matmul %39, %10, %cst_12 {dimension_numbers = #tpu.dot_dimension_numbers<[1], [0], [0], [1], [0, 0, 1, 1], [], []>} : vector<8x256xbf16>, vector<256x1024xbf16>, vector<8x1024xf32> -> vector<8x1024xf32>
    %41 = arith.addf %38, %40 : vector<8x1024xf32>
    %42 = vector.extract_strided_slice %41 {offsets = [0, 0], sizes = [8, 512], strides = [1, 1]} : vector<8x1024xf32> to vector<8x512xf32>
    %43 = arith.negf %42 : vector<8x512xf32>
    %44 = math.exp %43 : vector<8x512xf32>
    %cst_13 = arith.constant 1.000000e+00 : f32
    %45 = vector.broadcast %cst_13 : f32 to vector<8x512xf32>
    %46 = arith.addf %45, %44 : vector<8x512xf32>
    %47 = arith.divf %45, %46 : vector<8x512xf32>
    %48 = vector.extract_strided_slice %47 {offsets = [0, 0], sizes = [8, 256], strides = [1, 1]} : vector<8x512xf32> to vector<8x256xf32>
    %49 = vector.extract_strided_slice %47 {offsets = [0, 256], sizes = [8, 256], strides = [1, 1]} : vector<8x512xf32> to vector<8x256xf32>
    %50 = vector.extract_strided_slice %41 {offsets = [0, 512], sizes = [8, 256], strides = [1, 1]} : vector<8x1024xf32> to vector<8x256xf32>
    %51 = math.tanh %50 : vector<8x256xf32>
    %52 = vector.extract_strided_slice %41 {offsets = [0, 768], sizes = [8, 256], strides = [1, 1]} : vector<8x1024xf32> to vector<8x256xf32>
    %53 = arith.negf %52 : vector<8x256xf32>
    %54 = math.exp %53 : vector<8x256xf32>
    %cst_14 = arith.constant 1.000000e+00 : f32
    %55 = vector.broadcast %cst_14 : f32 to vector<8x256xf32>
    %56 = arith.addf %55, %54 : vector<8x256xf32>
    %57 = arith.divf %55, %56 : vector<8x256xf32>
    %58 = arith.mulf %49, %35 : vector<8x256xf32>
    %59 = arith.mulf %48, %51 : vector<8x256xf32>
    %60 = arith.addf %58, %59 : vector<8x256xf32>
    %61 = math.tanh %60 : vector<8x256xf32>
    %62 = arith.mulf %57, %61 : vector<8x256xf32>
    %63 = vector.extract_strided_slice %9 {offsets = [16, 0], sizes = [8, 1024], strides = [1, 1]} : vector<64x1024xf32> to vector<8x1024xf32>
    %64 = arith.truncf %62 : vector<8x256xf32> to vector<8x256xbf16>
    %cst_15 = arith.constant dense<0.000000e+00> : vector<8x1024xf32>
    %65 = tpu.matmul %64, %10, %cst_15 {dimension_numbers = #tpu.dot_dimension_numbers<[1], [0], [0], [1], [0, 0, 1, 1], [], []>} : vector<8x256xbf16>, vector<256x1024xbf16>, vector<8x1024xf32> -> vector<8x1024xf32>
    %66 = arith.addf %63, %65 : vector<8x1024xf32>
    %67 = vector.extract_strided_slice %66 {offsets = [0, 0], sizes = [8, 512], strides = [1, 1]} : vector<8x1024xf32> to vector<8x512xf32>
    %68 = arith.negf %67 : vector<8x512xf32>
    %69 = math.exp %68 : vector<8x512xf32>
    %cst_16 = arith.constant 1.000000e+00 : f32
    %70 = vector.broadcast %cst_16 : f32 to vector<8x512xf32>
    %71 = arith.addf %70, %69 : vector<8x512xf32>
    %72 = arith.divf %70, %71 : vector<8x512xf32>
    %73 = vector.extract_strided_slice %72 {offsets = [0, 0], sizes = [8, 256], strides = [1, 1]} : vector<8x512xf32> to vector<8x256xf32>
    %74 = vector.extract_strided_slice %72 {offsets = [0, 256], sizes = [8, 256], strides = [1, 1]} : vector<8x512xf32> to vector<8x256xf32>
    %75 = vector.extract_strided_slice %66 {offsets = [0, 512], sizes = [8, 256], strides = [1, 1]} : vector<8x1024xf32> to vector<8x256xf32>
    %76 = math.tanh %75 : vector<8x256xf32>
    %77 = vector.extract_strided_slice %66 {offsets = [0, 768], sizes = [8, 256], strides = [1, 1]} : vector<8x1024xf32> to vector<8x256xf32>
    %78 = arith.negf %77 : vector<8x256xf32>
    %79 = math.exp %78 : vector<8x256xf32>
    %cst_17 = arith.constant 1.000000e+00 : f32
    %80 = vector.broadcast %cst_17 : f32 to vector<8x256xf32>
    %81 = arith.addf %80, %79 : vector<8x256xf32>
    %82 = arith.divf %80, %81 : vector<8x256xf32>
    %83 = arith.mulf %74, %60 : vector<8x256xf32>
    %84 = arith.mulf %73, %76 : vector<8x256xf32>
    %85 = arith.addf %83, %84 : vector<8x256xf32>
    %86 = math.tanh %85 : vector<8x256xf32>
    %87 = arith.mulf %82, %86 : vector<8x256xf32>
    %88 = vector.extract_strided_slice %9 {offsets = [24, 0], sizes = [8, 1024], strides = [1, 1]} : vector<64x1024xf32> to vector<8x1024xf32>
    %89 = arith.truncf %87 : vector<8x256xf32> to vector<8x256xbf16>
    %cst_18 = arith.constant dense<0.000000e+00> : vector<8x1024xf32>
    %90 = tpu.matmul %89, %10, %cst_18 {dimension_numbers = #tpu.dot_dimension_numbers<[1], [0], [0], [1], [0, 0, 1, 1], [], []>} : vector<8x256xbf16>, vector<256x1024xbf16>, vector<8x1024xf32> -> vector<8x1024xf32>
    %91 = arith.addf %88, %90 : vector<8x1024xf32>
    %92 = vector.extract_strided_slice %91 {offsets = [0, 0], sizes = [8, 512], strides = [1, 1]} : vector<8x1024xf32> to vector<8x512xf32>
    %93 = arith.negf %92 : vector<8x512xf32>
    %94 = math.exp %93 : vector<8x512xf32>
    %cst_19 = arith.constant 1.000000e+00 : f32
    %95 = vector.broadcast %cst_19 : f32 to vector<8x512xf32>
    %96 = arith.addf %95, %94 : vector<8x512xf32>
    %97 = arith.divf %95, %96 : vector<8x512xf32>
    %98 = vector.extract_strided_slice %97 {offsets = [0, 0], sizes = [8, 256], strides = [1, 1]} : vector<8x512xf32> to vector<8x256xf32>
    %99 = vector.extract_strided_slice %97 {offsets = [0, 256], sizes = [8, 256], strides = [1, 1]} : vector<8x512xf32> to vector<8x256xf32>
    %100 = vector.extract_strided_slice %91 {offsets = [0, 512], sizes = [8, 256], strides = [1, 1]} : vector<8x1024xf32> to vector<8x256xf32>
    %101 = math.tanh %100 : vector<8x256xf32>
    %102 = vector.extract_strided_slice %91 {offsets = [0, 768], sizes = [8, 256], strides = [1, 1]} : vector<8x1024xf32> to vector<8x256xf32>
    %103 = arith.negf %102 : vector<8x256xf32>
    %104 = math.exp %103 : vector<8x256xf32>
    %cst_20 = arith.constant 1.000000e+00 : f32
    %105 = vector.broadcast %cst_20 : f32 to vector<8x256xf32>
    %106 = arith.addf %105, %104 : vector<8x256xf32>
    %107 = arith.divf %105, %106 : vector<8x256xf32>
    %108 = arith.mulf %99, %85 : vector<8x256xf32>
    %109 = arith.mulf %98, %101 : vector<8x256xf32>
    %110 = arith.addf %108, %109 : vector<8x256xf32>
    %111 = math.tanh %110 : vector<8x256xf32>
    %112 = arith.mulf %107, %111 : vector<8x256xf32>
    %113 = vector.extract_strided_slice %9 {offsets = [32, 0], sizes = [8, 1024], strides = [1, 1]} : vector<64x1024xf32> to vector<8x1024xf32>
    %114 = arith.truncf %112 : vector<8x256xf32> to vector<8x256xbf16>
    %cst_21 = arith.constant dense<0.000000e+00> : vector<8x1024xf32>
    %115 = tpu.matmul %114, %10, %cst_21 {dimension_numbers = #tpu.dot_dimension_numbers<[1], [0], [0], [1], [0, 0, 1, 1], [], []>} : vector<8x256xbf16>, vector<256x1024xbf16>, vector<8x1024xf32> -> vector<8x1024xf32>
    %116 = arith.addf %113, %115 : vector<8x1024xf32>
    %117 = vector.extract_strided_slice %116 {offsets = [0, 0], sizes = [8, 512], strides = [1, 1]} : vector<8x1024xf32> to vector<8x512xf32>
    %118 = arith.negf %117 : vector<8x512xf32>
    %119 = math.exp %118 : vector<8x512xf32>
    %cst_22 = arith.constant 1.000000e+00 : f32
    %120 = vector.broadcast %cst_22 : f32 to vector<8x512xf32>
    %121 = arith.addf %120, %119 : vector<8x512xf32>
    %122 = arith.divf %120, %121 : vector<8x512xf32>
    %123 = vector.extract_strided_slice %122 {offsets = [0, 0], sizes = [8, 256], strides = [1, 1]} : vector<8x512xf32> to vector<8x256xf32>
    %124 = vector.extract_strided_slice %122 {offsets = [0, 256], sizes = [8, 256], strides = [1, 1]} : vector<8x512xf32> to vector<8x256xf32>
    %125 = vector.extract_strided_slice %116 {offsets = [0, 512], sizes = [8, 256], strides = [1, 1]} : vector<8x1024xf32> to vector<8x256xf32>
    %126 = math.tanh %125 : vector<8x256xf32>
    %127 = vector.extract_strided_slice %116 {offsets = [0, 768], sizes = [8, 256], strides = [1, 1]} : vector<8x1024xf32> to vector<8x256xf32>
    %128 = arith.negf %127 : vector<8x256xf32>
    %129 = math.exp %128 : vector<8x256xf32>
    %cst_23 = arith.constant 1.000000e+00 : f32
    %130 = vector.broadcast %cst_23 : f32 to vector<8x256xf32>
    %131 = arith.addf %130, %129 : vector<8x256xf32>
    %132 = arith.divf %130, %131 : vector<8x256xf32>
    %133 = arith.mulf %124, %110 : vector<8x256xf32>
    %134 = arith.mulf %123, %126 : vector<8x256xf32>
    %135 = arith.addf %133, %134 : vector<8x256xf32>
    %136 = math.tanh %135 : vector<8x256xf32>
    %137 = arith.mulf %132, %136 : vector<8x256xf32>
    %138 = vector.extract_strided_slice %9 {offsets = [40, 0], sizes = [8, 1024], strides = [1, 1]} : vector<64x1024xf32> to vector<8x1024xf32>
    %139 = arith.truncf %137 : vector<8x256xf32> to vector<8x256xbf16>
    %cst_24 = arith.constant dense<0.000000e+00> : vector<8x1024xf32>
    %140 = tpu.matmul %139, %10, %cst_24 {dimension_numbers = #tpu.dot_dimension_numbers<[1], [0], [0], [1], [0, 0, 1, 1], [], []>} : vector<8x256xbf16>, vector<256x1024xbf16>, vector<8x1024xf32> -> vector<8x1024xf32>
    %141 = arith.addf %138, %140 : vector<8x1024xf32>
    %142 = vector.extract_strided_slice %141 {offsets = [0, 0], sizes = [8, 512], strides = [1, 1]} : vector<8x1024xf32> to vector<8x512xf32>
    %143 = arith.negf %142 : vector<8x512xf32>
    %144 = math.exp %143 : vector<8x512xf32>
    %cst_25 = arith.constant 1.000000e+00 : f32
    %145 = vector.broadcast %cst_25 : f32 to vector<8x512xf32>
    %146 = arith.addf %145, %144 : vector<8x512xf32>
    %147 = arith.divf %145, %146 : vector<8x512xf32>
    %148 = vector.extract_strided_slice %147 {offsets = [0, 0], sizes = [8, 256], strides = [1, 1]} : vector<8x512xf32> to vector<8x256xf32>
    %149 = vector.extract_strided_slice %147 {offsets = [0, 256], sizes = [8, 256], strides = [1, 1]} : vector<8x512xf32> to vector<8x256xf32>
    %150 = vector.extract_strided_slice %141 {offsets = [0, 512], sizes = [8, 256], strides = [1, 1]} : vector<8x1024xf32> to vector<8x256xf32>
    %151 = math.tanh %150 : vector<8x256xf32>
    %152 = vector.extract_strided_slice %141 {offsets = [0, 768], sizes = [8, 256], strides = [1, 1]} : vector<8x1024xf32> to vector<8x256xf32>
    %153 = arith.negf %152 : vector<8x256xf32>
    %154 = math.exp %153 : vector<8x256xf32>
    %cst_26 = arith.constant 1.000000e+00 : f32
    %155 = vector.broadcast %cst_26 : f32 to vector<8x256xf32>
    %156 = arith.addf %155, %154 : vector<8x256xf32>
    %157 = arith.divf %155, %156 : vector<8x256xf32>
    %158 = arith.mulf %149, %135 : vector<8x256xf32>
    %159 = arith.mulf %148, %151 : vector<8x256xf32>
    %160 = arith.addf %158, %159 : vector<8x256xf32>
    %161 = math.tanh %160 : vector<8x256xf32>
    %162 = arith.mulf %157, %161 : vector<8x256xf32>
    %163 = vector.extract_strided_slice %9 {offsets = [48, 0], sizes = [8, 1024], strides = [1, 1]} : vector<64x1024xf32> to vector<8x1024xf32>
    %164 = arith.truncf %162 : vector<8x256xf32> to vector<8x256xbf16>
    %cst_27 = arith.constant dense<0.000000e+00> : vector<8x1024xf32>
    %165 = tpu.matmul %164, %10, %cst_27 {dimension_numbers = #tpu.dot_dimension_numbers<[1], [0], [0], [1], [0, 0, 1, 1], [], []>} : vector<8x256xbf16>, vector<256x1024xbf16>, vector<8x1024xf32> -> vector<8x1024xf32>
    %166 = arith.addf %163, %165 : vector<8x1024xf32>
    %167 = vector.extract_strided_slice %166 {offsets = [0, 0], sizes = [8, 512], strides = [1, 1]} : vector<8x1024xf32> to vector<8x512xf32>
    %168 = arith.negf %167 : vector<8x512xf32>
    %169 = math.exp %168 : vector<8x512xf32>
    %cst_28 = arith.constant 1.000000e+00 : f32
    %170 = vector.broadcast %cst_28 : f32 to vector<8x512xf32>
    %171 = arith.addf %170, %169 : vector<8x512xf32>
    %172 = arith.divf %170, %171 : vector<8x512xf32>
    %173 = vector.extract_strided_slice %172 {offsets = [0, 0], sizes = [8, 256], strides = [1, 1]} : vector<8x512xf32> to vector<8x256xf32>
    %174 = vector.extract_strided_slice %172 {offsets = [0, 256], sizes = [8, 256], strides = [1, 1]} : vector<8x512xf32> to vector<8x256xf32>
    %175 = vector.extract_strided_slice %166 {offsets = [0, 512], sizes = [8, 256], strides = [1, 1]} : vector<8x1024xf32> to vector<8x256xf32>
    %176 = math.tanh %175 : vector<8x256xf32>
    %177 = vector.extract_strided_slice %166 {offsets = [0, 768], sizes = [8, 256], strides = [1, 1]} : vector<8x1024xf32> to vector<8x256xf32>
    %178 = arith.negf %177 : vector<8x256xf32>
    %179 = math.exp %178 : vector<8x256xf32>
    %cst_29 = arith.constant 1.000000e+00 : f32
    %180 = vector.broadcast %cst_29 : f32 to vector<8x256xf32>
    %181 = arith.addf %180, %179 : vector<8x256xf32>
    %182 = arith.divf %180, %181 : vector<8x256xf32>
    %183 = arith.mulf %174, %160 : vector<8x256xf32>
    %184 = arith.mulf %173, %176 : vector<8x256xf32>
    %185 = arith.addf %183, %184 : vector<8x256xf32>
    %186 = math.tanh %185 : vector<8x256xf32>
    %187 = arith.mulf %182, %186 : vector<8x256xf32>
    %188 = vector.extract_strided_slice %9 {offsets = [56, 0], sizes = [8, 1024], strides = [1, 1]} : vector<64x1024xf32> to vector<8x1024xf32>
    %189 = arith.truncf %187 : vector<8x256xf32> to vector<8x256xbf16>
    %cst_30 = arith.constant dense<0.000000e+00> : vector<8x1024xf32>
    %190 = tpu.matmul %189, %10, %cst_30 {dimension_numbers = #tpu.dot_dimension_numbers<[1], [0], [0], [1], [0, 0, 1, 1], [], []>} : vector<8x256xbf16>, vector<256x1024xbf16>, vector<8x1024xf32> -> vector<8x1024xf32>
    %191 = arith.addf %188, %190 : vector<8x1024xf32>
    %192 = vector.extract_strided_slice %191 {offsets = [0, 0], sizes = [8, 512], strides = [1, 1]} : vector<8x1024xf32> to vector<8x512xf32>
    %193 = arith.negf %192 : vector<8x512xf32>
    %194 = math.exp %193 : vector<8x512xf32>
    %cst_31 = arith.constant 1.000000e+00 : f32
    %195 = vector.broadcast %cst_31 : f32 to vector<8x512xf32>
    %196 = arith.addf %195, %194 : vector<8x512xf32>
    %197 = arith.divf %195, %196 : vector<8x512xf32>
    %198 = vector.extract_strided_slice %197 {offsets = [0, 0], sizes = [8, 256], strides = [1, 1]} : vector<8x512xf32> to vector<8x256xf32>
    %199 = vector.extract_strided_slice %197 {offsets = [0, 256], sizes = [8, 256], strides = [1, 1]} : vector<8x512xf32> to vector<8x256xf32>
    %200 = vector.extract_strided_slice %191 {offsets = [0, 512], sizes = [8, 256], strides = [1, 1]} : vector<8x1024xf32> to vector<8x256xf32>
    %201 = math.tanh %200 : vector<8x256xf32>
    %202 = vector.extract_strided_slice %191 {offsets = [0, 768], sizes = [8, 256], strides = [1, 1]} : vector<8x1024xf32> to vector<8x256xf32>
    %203 = arith.negf %202 : vector<8x256xf32>
    %204 = math.exp %203 : vector<8x256xf32>
    %cst_32 = arith.constant 1.000000e+00 : f32
    %205 = vector.broadcast %cst_32 : f32 to vector<8x256xf32>
    %206 = arith.addf %205, %204 : vector<8x256xf32>
    %207 = arith.divf %205, %206 : vector<8x256xf32>
    %208 = arith.mulf %199, %185 : vector<8x256xf32>
    %209 = arith.mulf %198, %201 : vector<8x256xf32>
    %210 = arith.addf %208, %209 : vector<8x256xf32>
    %211 = math.tanh %210 : vector<8x256xf32>
    %212 = arith.mulf %207, %211 : vector<8x256xf32>
    %c0_i32_33 = arith.constant 0 : i32
    %213 = tpu.memref_slice %arg9[%c0_i32_33] : memref<2x!tpu.dma_semaphore, #tpu.memory_space<semaphore_mem>> -> memref<1x!tpu.dma_semaphore, #tpu.memory_space<semaphore_mem>>
    %214 = tpu.memref_squeeze %213 : memref<1x!tpu.dma_semaphore, #tpu.memory_space<semaphore_mem>> -> memref<!tpu.dma_semaphore, #tpu.memory_space<semaphore_mem>>
    tpu.wait_dma2 semaphore(%214 : memref<!tpu.dma_semaphore, #tpu.memory_space<semaphore_mem>>) src(%arg4 : memref<512x128xbf16, #tpu.memory_space<any>>) dst(%arg7 : memref<512x128xbf16, #tpu.memory_space<vmem>>)
    %c1_i32_34 = arith.constant 1 : i32
    %215 = tpu.memref_slice %arg9[%c1_i32_34] : memref<2x!tpu.dma_semaphore, #tpu.memory_space<semaphore_mem>> -> memref<1x!tpu.dma_semaphore, #tpu.memory_space<semaphore_mem>>
    %216 = tpu.memref_squeeze %215 : memref<1x!tpu.dma_semaphore, #tpu.memory_space<semaphore_mem>> -> memref<!tpu.dma_semaphore, #tpu.memory_space<semaphore_mem>>
    tpu.wait_dma2 semaphore(%216 : memref<!tpu.dma_semaphore, #tpu.memory_space<semaphore_mem>>) src(%arg5 : memref<8x128xf32, #tpu.memory_space<any>>) dst(%arg8 : memref<8x128xf32, #tpu.memory_space<vmem>>)
    %c0_35 = arith.constant 0 : index
    %c0_36 = arith.constant 0 : index
    %217 = vector.load %arg8[%c0_35, %c0_36] : memref<8x128xf32, #tpu.memory_space<vmem>>, vector<8x128xf32>
    %c0_37 = arith.constant 0 : index
    %c0_38 = arith.constant 0 : index
    %218 = vector.load %arg7[%c0_37, %c0_38] : memref<512x128xbf16, #tpu.memory_space<vmem>>, vector<256x128xbf16>
    %c256 = arith.constant 256 : index
    %c0_39 = arith.constant 0 : index
    %219 = vector.load %arg7[%c256, %c0_39] : memref<512x128xbf16, #tpu.memory_space<vmem>>, vector<128x128xbf16>
    %c384 = arith.constant 384 : index
    %c0_40 = arith.constant 0 : index
    %220 = vector.load %arg7[%c384, %c0_40] : memref<512x128xbf16, #tpu.memory_space<vmem>>, vector<128x128xbf16>
    %221 = arith.truncf %212 : vector<8x256xf32> to vector<8x256xbf16>
    %cst_41 = arith.constant dense<0.000000e+00> : vector<8x128xf32>
    %222 = tpu.matmul %221, %218, %cst_41 {dimension_numbers = #tpu.dot_dimension_numbers<[1], [0], [0], [1], [0, 0, 1, 1], [], []>} : vector<8x256xbf16>, vector<256x128xbf16>, vector<8x128xf32> -> vector<8x128xf32>
    %223 = vector.extract_strided_slice %217 {offsets = [0, 0], sizes = [1, 128], strides = [1, 1]} : vector<8x128xf32> to vector<1x128xf32>
    %224 = vector.broadcast %223 : vector<1x128xf32> to vector<8x128xf32>
    %225 = arith.addf %222, %224 : vector<8x128xf32>
    %cst_42 = arith.constant 0.000000e+00 : f32
    %226 = vector.broadcast %cst_42 : f32 to vector<8x128xf32>
    %227 = arith.cmpf oge, %225, %226 : vector<8x128xf32>
    %cst_43 = arith.constant 0.00999999977 : f32
    %228 = vector.broadcast %cst_43 : f32 to vector<8x128xf32>
    %229 = arith.mulf %228, %225 : vector<8x128xf32>
    %230 = arith.select %227, %225, %229 : vector<8x128xi1>, vector<8x128xf32>
    %231 = vector.extract_strided_slice %217 {offsets = [1, 0], sizes = [1, 128], strides = [1, 1]} : vector<8x128xf32> to vector<1x128xf32>
    %232 = vector.broadcast %231 : vector<1x128xf32> to vector<8x128xf32>
    %233 = arith.mulf %230, %232 : vector<8x128xf32>
    %234 = vector.extract_strided_slice %217 {offsets = [2, 0], sizes = [1, 128], strides = [1, 1]} : vector<8x128xf32> to vector<1x128xf32>
    %235 = vector.broadcast %234 : vector<1x128xf32> to vector<8x128xf32>
    %236 = arith.addf %233, %235 : vector<8x128xf32>
    %237 = arith.truncf %236 : vector<8x128xf32> to vector<8x128xbf16>
    %cst_44 = arith.constant dense<0.000000e+00> : vector<8x128xf32>
    %238 = tpu.matmul %237, %219, %cst_44 {dimension_numbers = #tpu.dot_dimension_numbers<[1], [0], [0], [1], [0, 0, 1, 1], [], []>} : vector<8x128xbf16>, vector<128x128xbf16>, vector<8x128xf32> -> vector<8x128xf32>
    %239 = vector.extract_strided_slice %217 {offsets = [3, 0], sizes = [1, 128], strides = [1, 1]} : vector<8x128xf32> to vector<1x128xf32>
    %240 = vector.broadcast %239 : vector<1x128xf32> to vector<8x128xf32>
    %241 = arith.addf %238, %240 : vector<8x128xf32>
    %cst_45 = arith.constant 0.000000e+00 : f32
    %242 = vector.broadcast %cst_45 : f32 to vector<8x128xf32>
    %243 = arith.cmpf oge, %241, %242 : vector<8x128xf32>
    %cst_46 = arith.constant 0.00999999977 : f32
    %244 = vector.broadcast %cst_46 : f32 to vector<8x128xf32>
    %245 = arith.mulf %244, %241 : vector<8x128xf32>
    %246 = arith.select %243, %241, %245 : vector<8x128xi1>, vector<8x128xf32>
    %247 = arith.truncf %246 : vector<8x128xf32> to vector<8x128xbf16>
    %cst_47 = arith.constant dense<0.000000e+00> : vector<8x128xf32>
    %248 = tpu.matmul %247, %220, %cst_47 {dimension_numbers = #tpu.dot_dimension_numbers<[1], [0], [0], [1], [0, 0, 1, 1], [], []>} : vector<8x128xbf16>, vector<128x128xbf16>, vector<8x128xf32> -> vector<8x128xf32>
    %249 = vector.extract_strided_slice %217 {offsets = [4, 0], sizes = [1, 128], strides = [1, 1]} : vector<8x128xf32> to vector<1x128xf32>
    %250 = vector.broadcast %249 : vector<1x128xf32> to vector<8x128xf32>
    %251 = arith.addf %248, %250 : vector<8x128xf32>
    %c0_48 = arith.constant 0 : index
    %c0_49 = arith.constant 0 : index
    %252 = vector.load %arg6[%c0_48, %c0_49] : memref<8x128xf32, #tpu.memory_space<vmem>>, vector<8x128xf32>
    tpu.vector_store %arg6[%c0_48, %c0_49], %251 {strides = array<i32>} : memref<8x128xf32, #tpu.memory_space<vmem>>, vector<8x128xf32>,
    return
  }
}

</mosaic_0001>

<bundles_post_ra>
// kernel: rnn_forward.1
= control target key start
LH: loop header
LB: loop body
LE: loop exit
PB: predicated region body
PF: predicated region fallthrough
CT: control target
= control target key end

     0   :  { %11 = vsyncpa [#allocation6], 0  ;;  %s6145_s0 = inlined_call_operand.vmem [shape: bf16[64,128], index: 0, kind: input, shape index: {}]   ;;  %s6146_s1 = inlined_call_operand.hbm [shape: bf16[128,1024], index: 1, kind: input, shape index: {}]   ;;  %s6147_s2 = inlined_call_operand.hbm [shape: bf16[256,1024], index: 2, kind: input, shape index: {}]   ;;  %s6148_s3 = inlined_call_operand.vmem [shape: f32[1,1024], index: 3, kind: input, shape index: {}]   ;;  %s6149_s4 = inlined_call_operand.hbm [shape: bf16[512,128], index: 4, kind: input, shape index: {}]   ;;  %s6150_s5 = inlined_call_operand.vmem [shape: f32[8,128], index: 5, kind: input, shape index: {}]   ;;  %s6151_s6 = inlined_call_operand.vmem [shape: f32[8,128], index: 6, kind: output, shape index: {}]  }
   0x1   :  { %12 = vsyncpa [#allocation8], 0  ;;  %s4282_s21 = smov [#allocation5]   ;;  %s4208_s25 = scalar_lea.hbm %s6146_s1, 8192 }
   0x2   :  { %s20_s22 = sshll.u32 %s4282_s21, 4  ;;  %p4209_p0 = scmp.ne.s32.totalorder %s6146_s1, %s4208_s25  ;;  %s21_s22 = int_to_ptr.vmem [resolvable:$true] %s20_s22 }
   0x3   :  { %p4212_p1 = scmp.lt.u32.totalorder %s4208_s25, %s6146_s1 }
   0x5   :  { %p4214_p2 = pnand %p4212_p1, %p4209_p0 }
   0x7   :  { %4217 = shalt.err (!%p4214_p2)
}
   0x8   :  { %s4218_s30 = scalar_lea.vmem %s21_s22, 8192  ;;  %p4223_p4 = scmp.lt.s32.totalorder %s21_s22, %s21_s22 }
   0x9   :  { %p4219_p3 = scmp.ne.s32.totalorder %s21_s22, %s4218_s30  ;;  %p4224_p5 = scmp.lt.s32.totalorder %s4218_s30, %s4218_s30 }
   0xb   :  { %p4225_p6 = por %p4224_p5, %p4223_p4 }
   0xd   :  { %p4226_p7 = pnand %p4225_p6, %p4219_p3 }
   0xf   :  { %4229 = shalt.err (!%p4226_p7)
}
  0x10   :  { %s4283_s7 = smov 512   ;;  %s4284_s8 = smov 32  }
  0x11   :  { %26 = dma.hbm_to_vmem [thread:$0]  %s6146_s1, 8192, %s21_s22, [#allocation6], %s4283_s7, %s4283_s7, %s4284_s8  }
  0x12   :  { %s4285_s11 = smov [#allocation7]   ;;  %s4230_s15 = scalar_lea.hbm %s6147_s2, 16384 }
  0x13   :  { %s32_s12 = sshll.u32 %s4285_s11, 4  ;;  %p4231_p8 = scmp.ne.s32.totalorder %s6147_s2, %s4230_s15  ;;  %s33_s12 = int_to_ptr.vmem [resolvable:$true] %s32_s12 }
  0x14   :  { %p4234_p9 = scmp.lt.u32.totalorder %s4230_s15, %s6147_s2 }
  0x16   :  { %p4236_p10 = pnand %p4234_p9, %p4231_p8 }
  0x18   :  { %4239 = shalt.err (!%p4236_p10)
}
  0x19   :  { %s4240_s20 = scalar_lea.vmem %s33_s12, 16384  ;;  %p4245_p12 = scmp.lt.s32.totalorder %s33_s12, %s33_s12 }
  0x1a   :  { %p4241_p11 = scmp.ne.s32.totalorder %s33_s12, %s4240_s20  ;;  %p4246_p13 = scmp.lt.s32.totalorder %s4240_s20, %s4240_s20 }
  0x1c   :  { %p4247_p0 = por %p4246_p13, %p4245_p12 }
  0x1e   :  { %p4248_p1 = pnand %p4247_p0, %p4241_p11 }
  0x20   :  { %4251 = shalt.err (!%p4248_p1)
}
  0x21   :  { %38 = dma.hbm_to_vmem [thread:$0]  %s6147_s2, 16384, %s33_s12, [#allocation8], %s4283_s7, %s4283_s7, %s4284_s8  }
  0x22   :  { %4274 = dma.done.wait [#allocation6], 8192  }
  0x23   :  { %4275 = vsyncadd [#allocation6], 4294959104 }
  0x24   :  { %4276 = dma.done.wait [#allocation8], 16384  }
  0x25   :  { %4277 = vsyncadd [#allocation8], 4294950912  ;;  %s4286_s22 = smov [#allocation2]   ;;  %s4252_s26 = scalar_lea.hbm %s6149_s4, 4096 }
  0x26   :  { %s55_s23 = sshll.u32 %s4286_s22, 4  ;;  %p4253_p2 = scmp.ne.s32.totalorder %s6149_s4, %s4252_s26  ;;  %s56_s23 = int_to_ptr.vmem [resolvable:$true] %s55_s23 }
  0x27   :  { %p4256_p3 = scmp.lt.u32.totalorder %s4252_s26, %s6149_s4 }
  0x29   :  { %p4258_p4 = pnand %p4256_p3, %p4253_p2 }
  0x2b   :  { %4261 = shalt.err (!%p4258_p4)  }
  0x2c   :  { %s4262_s2 = scalar_lea.vmem %s56_s23, 4096  ;;  %p4267_p6 = scmp.lt.s32.totalorder %s56_s23, %s56_s23 }
  0x2d   :  { %p4263_p5 = scmp.ne.s32.totalorder %s56_s23, %s4262_s2  ;;  %p4268_p7 = scmp.lt.s32.totalorder %s4262_s2, %s4262_s2 }
  0x2f   :  { %p4269_p8 = por %p4268_p7, %p4267_p6 }
  0x31   :  { %p4270_p9 = pnand %p4269_p8, %p4263_p5 }
  0x33   :  { %4273 = shalt.err (!%p4270_p9)  }
  0x34   :  { %58 = dma.hbm_to_vmem [thread:$0]  %s6149_s4, 4096, %s56_s23, [#allocation4]  ;;  %v4364_v0 = vld [vmem:[%s6150_s5] sm:$0xff] }
  0x35   :  { %6424 = vst [vmem:[#allocation18_spill] sm:$0xff] %v4364_v0 }
  0x36   :  { %101 = vsyncadd [#allocation4 + $0x1], 128  ;;  %v110_v1 = vld [vmem:[#allocation5] sm:$0xff]  ;;  %v111_v4 = vld [vmem:[#allocation5 + $0x8] sm:$0xff]  ;;  %v6152_v8 = vmov 0  }
  0x37   :  { %v114_v2 = vld [vmem:[#allocation5 + $0x20] sm:$0xff]  ;;  %v115_v5 = vld [vmem:[#allocation5 + $0x28] sm:$0xff]  ;;  %592 = vmatprep.mubr.bf16.mxu0 %v6152_v8  ;;  %665 = vmatprep.mubr.bf16.mxu1 %v6152_v8 }
  0x38   :  { %v3619_v3 = vcombine.high %v110_v1, %v114_v2  ;;  %v3618_v6 = vcombine.low %v110_v1, %v114_v2  ;;  %v118_v7 = vld [vmem:[#allocation5 + $0x40] sm:$0xff]  ;;  %v3621_v9 = vcombine.high %v111_v4, %v115_v5  ;;  %v3620_v10 = vcombine.low %v111_v4, %v115_v5  ;;  %v119_v12 = vld [vmem:[#allocation5 + $0x48] sm:$0xff]  ;;  %v112_v1 = vld [vmem:[#allocation5 + $0x10] sm:$0xff] }
  0x39   :  { %v122_v11 = vld [vmem:[#allocation5 + $0x60] sm:$0xff]  ;;  %v123_v13 = vld [vmem:[#allocation5 + $0x68] sm:$0xff]  ;;  %v116_v2 = vld [vmem:[#allocation5 + $0x30] sm:$0xff] }
  0x3a   :  { %560 = vmatprep.subr.bf16.mxu0 %v3619_v3  ;;  %v3627_v14 = vcombine.high %v118_v7, %v122_v11  ;;  %v3629_v15 = vcombine.high %v119_v12, %v123_v13  ;;  %v126_v16 = vld [vmem:[#allocation5 + $0x80] sm:$0xff]  ;;  %v127_v18 = vld [vmem:[#allocation5 + $0x88] sm:$0xff]  ;;  %633 = vmatprep.subr.bf16.mxu1 %v3621_v9  ;;  %v3626_v19 = vcombine.low %v118_v7, %v122_v11  ;;  %v113_v3 = vld [vmem:[#allocation5 + $0x18] sm:$0xff] }
  0x3b   :  { %v130_v17 = vld [vmem:[#allocation5 + $0xa0] sm:$0xff]  ;;  %561 = vmatpush1.bf16.msra.mxu0 %v3618_v6  ;;  %v131_v20 = vld [vmem:[#allocation5 + $0xa8] sm:$0xff]  ;;  %634 = vmatpush1.bf16.msra.mxu1 %v3620_v10  ;;  %v3628_v21 = vcombine.low %v119_v12, %v123_v13  ;;  %v117_v4 = vld [vmem:[#allocation5 + $0x38] sm:$0xff]  ;;  %v3623_v7 = vcombine.high %v112_v1, %v116_v2 }
  0x3c   :  { %562 = vmatprep.subr.bf16.mxu0 %v3627_v14  ;;  %v3635_v22 = vcombine.high %v126_v16, %v130_v17  ;;  %635 = vmatprep.subr.bf16.mxu1 %v3629_v15  ;;  %v3637_v23 = vcombine.high %v127_v18, %v131_v20  ;;  %v134_v24 = vld [vmem:[#allocation5 + $0xc0] sm:$0xff]  ;;  %v135_v26 = vld [vmem:[#allocation5 + $0xc8] sm:$0xff]  ;;  %v3634_v28 = vcombine.low %v126_v16, %v130_v17  ;;  %v120_v10 = vld [vmem:[#allocation5 + $0x50] sm:$0xff] }
  0x3d   :  { %v138_v25 = vld [vmem:[#allocation5 + $0xe0] sm:$0xff]  ;;  %v139_v27 = vld [vmem:[#allocation5 + $0xe8] sm:$0xff]  ;;  %v3636_v29 = vcombine.low %v127_v18, %v131_v20  ;;  %v3625_v9 = vcombine.high %v113_v3, %v117_v4  ;;  %v124_v11 = vld [vmem:[#allocation5 + $0x70] sm:$0xff]  ;;  %v3622_v15 = vcombine.low %v112_v1, %v116_v2  ;;  %v3624_v16 = vcombine.low %v113_v3, %v117_v4 }
  0x3e   :  { %v3643_v30 = vcombine.high %v134_v24, %v138_v25  ;;  %v3645_v31 = vcombine.high %v135_v26, %v139_v27  ;;  %v142_v32 = vld [vmem:[#allocation5 + $0x100] sm:$0xff]  ;;  %v143_v34 = vld [vmem:[#allocation5 + $0x108] sm:$0xff]  ;;  %v3642_v36 = vcombine.low %v134_v24, %v138_v25  ;;  %v3644_v37 = vcombine.low %v135_v26, %v139_v27  ;;  %v121_v13 = vld [vmem:[#allocation5 + $0x58] sm:$0xff] }
  0x3f   :  { %563 = vmatpush1.bf16.msra.mxu0 %v3626_v19  ;;  %636 = vmatpush1.bf16.msra.mxu1 %v3628_v21  ;;  %v146_v33 = vld [vmem:[#allocation5 + $0x120] sm:$0xff]  ;;  %v147_v35 = vld [vmem:[#allocation5 + $0x128] sm:$0xff]  ;;  %v125_v14 = vld [vmem:[#allocation5 + $0x78] sm:$0xff]  ;;  %v3631_v17 = vcombine.high %v120_v10, %v124_v11 }
  0x40   :  { %564 = vmatprep.subr.bf16.mxu0 %v3635_v22  ;;  %637 = vmatprep.subr.bf16.mxu1 %v3637_v23  ;;  %v3651_v38 = vcombine.high %v142_v32, %v146_v33  ;;  %v3653_v39 = vcombine.high %v143_v34, %v147_v35  ;;  %v150_v40 = vld [vmem:[#allocation5 + $0x140] sm:$0xff]  ;;  %v151_v42 = vld [vmem:[#allocation5 + $0x148] sm:$0xff]  ;;  %v3650_v44 = vcombine.low %v142_v32, %v146_v33  ;;  %v128_v19 = vld [vmem:[#allocation5 + $0x90] sm:$0xff] }
  0x41   :  { %v154_v41 = vld [vmem:[#allocation5 + $0x160] sm:$0xff]  ;;  %v155_v43 = vld [vmem:[#allocation5 + $0x168] sm:$0xff]  ;;  %v3652_v45 = vcombine.low %v143_v34, %v147_v35  ;;  %v3633_v18 = vcombine.high %v121_v13, %v125_v14  ;;  %v132_v20 = vld [vmem:[#allocation5 + $0xb0] sm:$0xff]  ;;  %v3630_v23 = vcombine.low %v120_v10, %v124_v11  ;;  %v3632_v24 = vcombine.low %v121_v13, %v125_v14 }
  0x42   :  { %v3659_v46 = vcombine.high %v150_v40, %v154_v41  ;;  %v158_v47 = vld [vmem:[#allocation5 + $0x180] sm:$0xff]  ;;  %v3661_v48 = vcombine.high %v151_v42, %v155_v43  ;;  %v159_v50 = vld [vmem:[#allocation5 + $0x188] sm:$0xff]  ;;  %v3658_v52 = vcombine.low %v150_v40, %v154_v41  ;;  %v3660_v53 = vcombine.low %v151_v42, %v155_v43  ;;  %v129_v21 = vld [vmem:[#allocation5 + $0x98] sm:$0xff] }
  0x43   :  { %565 = vmatpush1.bf16.msra.mxu0 %v3634_v28  ;;  %638 = vmatpush1.bf16.msra.mxu1 %v3636_v29  ;;  %v162_v49 = vld [vmem:[#allocation5 + $0x1a0] sm:$0xff]  ;;  %v163_v51 = vld [vmem:[#allocation5 + $0x1a8] sm:$0xff]  ;;  %v133_v22 = vld [vmem:[#allocation5 + $0xb8] sm:$0xff]  ;;  %v3639_v25 = vcombine.high %v128_v19, %v132_v20  ;;  %v3638_v32 = vcombine.low %v128_v19, %v132_v20 }
  0x44   :  { %566 = vmatprep.subr.bf16.mxu0 %v3643_v30  ;;  %639 = vmatprep.subr.bf16.mxu1 %v3645_v31  ;;  %v3667_v54 = vcombine.high %v158_v47, %v162_v49  ;;  %v166_v55 = vld [vmem:[#allocation5 + $0x1c0] sm:$0xff]  ;;  %v3669_v56 = vcombine.high %v159_v50, %v163_v51  ;;  %v167_v58 = vld [vmem:[#allocation5 + $0x1c8] sm:$0xff]  ;;  %v3666_v60 = vcombine.low %v158_v47, %v162_v49  ;;  %v136_v27 = vld [vmem:[#allocation5 + $0xd0] sm:$0xff] }
  0x45   :  { %v170_v57 = vld [vmem:[#allocation5 + $0x1e0] sm:$0xff]  ;;  %v171_v59 = vld [vmem:[#allocation5 + $0x1e8] sm:$0xff]  ;;  %v3668_v61 = vcombine.low %v159_v50, %v163_v51  ;;  %v3641_v26 = vcombine.high %v129_v21, %v133_v22  ;;  %v140_v28 = vld [vmem:[#allocation5 + $0xf0] sm:$0xff]  ;;  %v3640_v33 = vcombine.low %v129_v21, %v133_v22 }
  0x46   :  { %v3675_v62 = vcombine.high %v166_v55, %v170_v57  ;;  %v3677_v63 = vcombine.high %v167_v58, %v171_v59  ;;  %v3674_v5 = vcombine.low %v166_v55, %v170_v57  ;;  %v3676_v6 = vcombine.low %v167_v58, %v171_v59  ;;  %v4371_v12 = vld [vmem:[%s6145_s0] sm:$0xff]   ;;  %v4380_v29 = vld [vmem:[%s6145_s0 + $0x8] sm:$0xff]   ;;  %v137_v30 = vld [vmem:[#allocation5 + $0xd8] sm:$0xff] }
  0x47   :  { %567 = vmatpush1.bf16.msra.mxu0 %v3642_v36  ;;  %640 = vmatpush1.bf16.msra.mxu1 %v3644_v37  ;;  %v141_v31 = vld [vmem:[#allocation5 + $0xf8] sm:$0xff]  ;;  %v3647_v34 = vcombine.high %v136_v27, %v140_v28  ;;  %v144_v36 = vld [vmem:[#allocation5 + $0x110] sm:$0xff]  ;;  %v3646_v40 = vcombine.low %v136_v27, %v140_v28  ;;  %v853_v10 = vld [vmem:[#allocation7 + $0x8] sm:$0xff] }
  0x48   :  { %568 = vmatprep.subr.bf16.mxu0 %v3651_v38  ;;  %641 = vmatprep.subr.bf16.mxu1 %v3653_v39  ;;  %v3649_v35 = vcombine.high %v137_v30, %v141_v31  ;;  %v148_v37 = vld [vmem:[#allocation5 + $0x130] sm:$0xff]  ;;  %v145_v38 = vld [vmem:[#allocation5 + $0x118] sm:$0xff]  ;;  %v3648_v41 = vcombine.low %v137_v30, %v141_v31  ;;  %v857_v11 = vld [vmem:[#allocation7 + $0x28] sm:$0xff] }
  0x49   :  { %v149_v39 = vld [vmem:[#allocation5 + $0x138] sm:$0xff]  ;;  %v3655_v42 = vcombine.high %v144_v36, %v148_v37  ;;  %v3654_v49 = vcombine.low %v144_v36, %v148_v37  ;;  %v861_v19 = vld [vmem:[#allocation7 + $0x48] sm:$0xff]  ;;  %v4411_v22 = vcombine.low %v853_v10, %v857_v11  ;;  %v968_v0 = vld [vmem:[#allocation7 + $0x3a0] sm:$0xff] }
  0x4a   :  { %v3657_v43 = vcombine.high %v145_v38, %v149_v39  ;;  %v153_v47 = vld [vmem:[#allocation5 + $0x158] sm:$0xff]  ;;  %v3656_v50 = vcombine.low %v145_v38, %v149_v39  ;;  %v865_v20 = vld [vmem:[#allocation7 + $0x68] sm:$0xff] }
  0x4b   :  { %569 = vmatpush1.bf16.msra.mxu0 %v3650_v44  ;;  %642 = vmatpush1.bf16.msra.mxu1 %v3652_v45  ;;  %v152_v44 = vld [vmem:[#allocation5 + $0x150] sm:$0xff]  ;;  %v161_v55 = vld [vmem:[#allocation5 + $0x198] sm:$0xff]  ;;  %6428 = vst [vmem:[#allocation22_spill] sm:$0xff] %v4411_v22  ;;  %v869_v27 = vld [vmem:[#allocation7 + $0x88] sm:$0xff]  ;;  %v4425_v31 = vcombine.low %v861_v19, %v865_v20 }
  0x4c   :  { %570 = vmatprep.subr.bf16.mxu0 %v3659_v46  ;;  %643 = vmatprep.subr.bf16.mxu1 %v3661_v48  ;;  %v156_v45 = vld [vmem:[#allocation5 + $0x170] sm:$0xff]  ;;  %v157_v48 = vld [vmem:[#allocation5 + $0x178] sm:$0xff]  ;;  %v873_v28 = vld [vmem:[#allocation7 + $0xa8] sm:$0xff] }
  0x4d   :  { %v4389_v46 = vld [vmem:[%s6145_s0 + $0x10] sm:$0xff]   ;;  %v3663_v51 = vcombine.high %v152_v44, %v156_v45  ;;  %v3662_v57 = vcombine.low %v152_v44, %v156_v45  ;;  %v3664_v58 = vcombine.low %v153_v47, %v157_v48  ;;  %v169_v1 = vld [vmem:[#allocation5 + $0x1d8] sm:$0xff]  ;;  %6432 = vst [vmem:[#allocation26_spill] sm:$0xff] %v4425_v31  ;;  %v881_v36 = vld [vmem:[#allocation7 + $0xe8] sm:$0xff]  ;;  %v4439_v38 = vcombine.low %v869_v27, %v873_v28 }
  0x4e   :  { %v173_v2 = vld [vmem:[#allocation5 + $0x1f8] sm:$0xff]  ;;  %v889_v44 = vld [vmem:[#allocation7 + $0x128] sm:$0xff] }
  0x4f   :  { %571 = vmatpush1.bf16.msra.mxu0 %v3658_v52  ;;  %644 = vmatpush1.bf16.msra.mxu1 %v3660_v53  ;;  %v3665_v52 = vcombine.high %v153_v47, %v157_v48  ;;  %v160_v53 = vld [vmem:[#allocation5 + $0x190] sm:$0xff]  ;;  %v3680_v14 = vcombine.low %v169_v1, %v173_v2  ;;  %6436 = vst [vmem:[#allocation30_spill] sm:$0xff] %v4439_v38 }
  0x50   :  { %572 = vmatprep.subr.bf16.mxu0 %v3667_v54  ;;  %645 = vmatprep.subr.bf16.mxu1 %v3669_v56  ;;  %v164_v54 = vld [vmem:[#allocation5 + $0x1b0] sm:$0xff]  ;;  %v165_v56 = vld [vmem:[#allocation5 + $0x1b8] sm:$0xff] }
  0x51   :  { %v3671_v59 = vcombine.high %v160_v53, %v164_v54  ;;  %v3670_v3 = vcombine.low %v160_v53, %v164_v54  ;;  %v3672_v4 = vcombine.low %v161_v55, %v165_v56  ;;  %v897_v53 = vld [vmem:[#allocation7 + $0x168] sm:$0xff] }
  0x53   :  { %573 = vmatpush1.bf16.msra.mxu0 %v3666_v60  ;;  %646 = vmatpush1.bf16.msra.mxu1 %v3668_v61  ;;  %v3673_v60 = vcombine.high %v161_v55, %v165_v56  ;;  %v168_v61 = vld [vmem:[#allocation5 + $0x1d0] sm:$0xff] }
  0x54   :  { %574 = vmatprep.subr.bf16.mxu0 %v3675_v62  ;;  %647 = vmatprep.subr.bf16.mxu1 %v3677_v63  ;;  %v172_v62 = vld [vmem:[#allocation5 + $0x1f0] sm:$0xff]  ;;  %v4398_v63 = vld [vmem:[%s6145_s0 + $0x18] sm:$0xff]  }
  0x55   :  { %v3678_v13 = vcombine.low %v168_v61, %v172_v62 }
  0x57   :  { %575 = vmatpush1.bf16.msra.mxu0 %v3674_v5  ;;  %648 = vmatpush1.bf16.msra.mxu1 %v3676_v6  ;;  %v3679_v5 = vcombine.high %v168_v61, %v172_v62  ;;  %v3681_v6 = vcombine.high %v169_v1, %v173_v2 }
  0x58   :  { %706 = vmatprep.subr.bf16.mxu0 %v3623_v7  ;;  %779 = vmatprep.subr.bf16.mxu1 %v3625_v9  ;;  %v852_v7 = vld [vmem:[#allocation7] sm:$0xff] }
  0x59   :  { %v856_v9 = vld [vmem:[#allocation7 + $0x20] sm:$0xff] }
  0x5a   :  { %593 = vmatmul.mubr.bf16.vlgmr.msra.gmra.mrb[0].mxu0 %v4371_v12  ;;  %666 = vmatmul.mubr.bf16.vlgmr.msra.gmra.mrb[0].mxu1 %v4371_v12  ;;  %v4408_v21 = vcombine.low %v852_v7, %v856_v9 }
  0x5b   :  { %707 = vmatpush1.bf16.msra.mxu0 %v3622_v15  ;;  %780 = vmatpush1.bf16.msra.mxu1 %v3624_v16  ;;  %v4402_v15 = vcombine.high %v852_v7, %v856_v9  ;;  %v4405_v16 = vcombine.high %v853_v10, %v857_v11  ;;  %v916_v11 = vld [vmem:[#allocation7 + $0x200] sm:$0xff] }
  0x5c   :  { %708 = vmatprep.subr.bf16.mxu0 %v3631_v17  ;;  %781 = vmatprep.subr.bf16.mxu1 %v3633_v18  ;;  %v860_v17 = vld [vmem:[#allocation7 + $0x40] sm:$0xff]  ;;  %6427 = vst [vmem:[#allocation21_spill] sm:$0xff] %v4408_v21 }
  0x5d   :  { %602 = vmatprep.mubr.bf16.mxu0 %v6152_v8  ;;  %675 = vmatprep.mubr.bf16.mxu1 %v6152_v8  ;;  %6425 = vst [vmem:[#allocation19_spill] sm:$0xff] %v4402_v15  ;;  %6426 = vst [vmem:[#allocation20_spill] sm:$0xff] %v4405_v16  ;;  %v864_v18 = vld [vmem:[#allocation7 + $0x60] sm:$0xff] }
  0x5e   :  { %v4421_v30 = vcombine.low %v860_v17, %v864_v18 }
  0x5f   :  { %709 = vmatpush1.bf16.msra.mxu0 %v3630_v23  ;;  %782 = vmatpush1.bf16.msra.mxu1 %v3632_v24  ;;  %v4413_v23 = vcombine.high %v860_v17, %v864_v18  ;;  %v4416_v24 = vcombine.high %v861_v19, %v865_v20  ;;  %v921_v17 = vld [vmem:[#allocation7 + $0x228] sm:$0xff] }
  0x60   :  { %710 = vmatprep.subr.bf16.mxu0 %v3639_v25  ;;  %783 = vmatprep.subr.bf16.mxu1 %v3641_v26  ;;  %v868_v25 = vld [vmem:[#allocation7 + $0x80] sm:$0xff]  ;;  %6431 = vst [vmem:[#allocation25_spill] sm:$0xff] %v4421_v30 }
  0x61   :  { %6429 = vst [vmem:[#allocation23_spill] sm:$0xff] %v4413_v23  ;;  %6430 = vst [vmem:[#allocation24_spill] sm:$0xff] %v4416_v24  ;;  %v872_v26 = vld [vmem:[#allocation7 + $0xa0] sm:$0xff] }
  0x62   :  { %603 = vmatmul.mubr.bf16.gmra.mrb[4].mxu0 %v4380_v29  ;;  %676 = vmatmul.mubr.bf16.gmra.mrb[4].mxu1 %v4380_v29  ;;  %v4435_v37 = vcombine.low %v868_v25, %v872_v26 }
  0x63   :  { %711 = vmatpush1.bf16.msra.mxu0 %v3638_v32  ;;  %784 = vmatpush1.bf16.msra.mxu1 %v3640_v33  ;;  %v4427_v32 = vcombine.high %v868_v25, %v872_v26  ;;  %v4430_v33 = vcombine.high %v869_v27, %v873_v28  ;;  %v924_v26 = vld [vmem:[#allocation7 + $0x240] sm:$0xff]  ;;  %v925_v28 = vld [vmem:[#allocation7 + $0x248] sm:$0xff] }
  0x64   :  { %712 = vmatprep.subr.bf16.mxu0 %v3647_v34  ;;  %785 = vmatprep.subr.bf16.mxu1 %v3649_v35  ;;  %v876_v34 = vld [vmem:[#allocation7 + $0xc0] sm:$0xff]  ;;  %6435 = vst [vmem:[#allocation29_spill] sm:$0xff] %v4435_v37 }
  0x65   :  { %612 = vmatprep.mubr.bf16.mxu0 %v6152_v8  ;;  %685 = vmatprep.mubr.bf16.mxu1 %v6152_v8  ;;  %6433 = vst [vmem:[#allocation27_spill] sm:$0xff] %v4427_v32  ;;  %6434 = vst [vmem:[#allocation28_spill] sm:$0xff] %v4430_v33  ;;  %v880_v35 = vld [vmem:[#allocation7 + $0xe0] sm:$0xff] }
  0x66   :  { %v4441_v39 = vcombine.high %v876_v34, %v880_v35  ;;  %v4448_v45 = vcombine.low %v876_v34, %v880_v35  ;;  %v928_v27 = vld [vmem:[#allocation7 + $0x260] sm:$0xff]  ;;  %v929_v34 = vld [vmem:[#allocation7 + $0x268] sm:$0xff] }
  0x67   :  { %713 = vmatpush1.bf16.msra.mxu0 %v3646_v40  ;;  %786 = vmatpush1.bf16.msra.mxu1 %v3648_v41  ;;  %v884_v41 = vld [vmem:[#allocation7 + $0x100] sm:$0xff] }
  0x68   :  { %714 = vmatprep.subr.bf16.mxu0 %v3655_v42  ;;  %787 = vmatprep.subr.bf16.mxu1 %v3657_v43  ;;  %6437 = vst [vmem:[#allocation31_spill] sm:$0xff] %v4441_v39  ;;  %v888_v42 = vld [vmem:[#allocation7 + $0x120] sm:$0xff]  ;;  %v885_v43 = vld [vmem:[#allocation7 + $0x108] sm:$0xff]  ;;  %6439 = vst [vmem:[#allocation33_spill] sm:$0xff] %v4448_v45 }
  0x69   :  { %v4455_v48 = vcombine.high %v884_v41, %v888_v42  ;;  %v4467_v54 = vcombine.low %v885_v43, %v889_v44 }
  0x6a   :  { %613 = vmatmul.mubr.bf16.gmra.mrb[8].mxu0 %v4389_v46  ;;  %686 = vmatmul.mubr.bf16.gmra.mrb[8].mxu1 %v4389_v46 }
  0x6b   :  { %715 = vmatpush1.bf16.msra.mxu0 %v3654_v49  ;;  %788 = vmatpush1.bf16.msra.mxu1 %v3656_v50  ;;  %6441 = vst [vmem:[#allocation35_spill] sm:$0xff] %v4455_v48  ;;  %v4458_v49 = vcombine.high %v885_v43, %v889_v44  ;;  %v892_v50 = vld [vmem:[#allocation7 + $0x140] sm:$0xff]  ;;  %6444 = vst [vmem:[#allocation38_spill] sm:$0xff] %v4467_v54  ;;  %v933_v43 = vld [vmem:[#allocation7 + $0x288] sm:$0xff] }
  0x6c   :  { %716 = vmatprep.subr.bf16.mxu0 %v3663_v51  ;;  %789 = vmatprep.subr.bf16.mxu1 %v3665_v52  ;;  %v896_v51 = vld [vmem:[#allocation7 + $0x160] sm:$0xff]  ;;  %v893_v52 = vld [vmem:[#allocation7 + $0x148] sm:$0xff] }
  0x6d   :  { %622 = vmatprep.mubr.bf16.mxu0 %v6152_v8  ;;  %695 = vmatprep.mubr.bf16.mxu1 %v6152_v8  ;;  %6442 = vst [vmem:[#allocation36_spill] sm:$0xff] %v4458_v49  ;;  %v4469_v55 = vcombine.high %v892_v50, %v896_v51  ;;  %v4472_v56 = vcombine.high %v893_v52, %v897_v53  ;;  %v937_v44 = vld [vmem:[#allocation7 + $0x2a8] sm:$0xff] }
  0x6e   :  { %v4476_v61 = vcombine.low %v892_v50, %v896_v51  ;;  %v4481_v62 = vcombine.low %v893_v52, %v897_v53  ;;  %v4531_v50 = vcombine.low %v924_v26, %v928_v27  ;;  %v4535_v51 = vcombine.low %v925_v28, %v929_v34 }
  0x6f   :  { %717 = vmatpush1.bf16.msra.mxu0 %v3662_v57  ;;  %790 = vmatpush1.bf16.msra.mxu1 %v3664_v58  ;;  %6445 = vst [vmem:[#allocation39_spill] sm:$0xff] %v4469_v55  ;;  %6446 = vst [vmem:[#allocation40_spill] sm:$0xff] %v4472_v56  ;;  %v900_v57 = vld [vmem:[#allocation7 + $0x180] sm:$0xff]  ;;  %v4540_v53 = vcombine.high %v933_v43, %v937_v44 }
  0x70   :  { %718 = vmatprep.subr.bf16.mxu0 %v3671_v59  ;;  %791 = vmatprep.subr.bf16.mxu1 %v3673_v60  ;;  %v904_v58 = vld [vmem:[#allocation7 + $0x1a0] sm:$0xff]  ;;  %v901_v59 = vld [vmem:[#allocation7 + $0x188] sm:$0xff]  ;;  %6447 = vst [vmem:[#allocation41_spill] sm:$0xff] %v4476_v61  ;;  %6448 = vst [vmem:[#allocation42_spill] sm:$0xff] %v4481_v62 }
  0x71   :  { %v905_v60 = vld [vmem:[#allocation7 + $0x1a8] sm:$0xff]  ;;  %v4483_v1 = vcombine.high %v900_v57, %v904_v58  ;;  %6463 = vst [vmem:[#allocation57_spill] sm:$0xff] %v4531_v50  ;;  %6464 = vst [vmem:[#allocation58_spill] sm:$0xff] %v4535_v51 }
  0x72   :  { %623 = vmatmul.mubr.bf16.gmra.mrb[12].mxu0 %v4398_v63  ;;  %696 = vmatmul.mubr.bf16.gmra.mrb[12].mxu1 %v4398_v63  ;;  %v4486_v2 = vcombine.high %v901_v59, %v905_v60  ;;  %v4495_v7 = vcombine.low %v901_v59, %v905_v60  ;;  %6466 = vst [vmem:[#allocation60_spill] sm:$0xff] %v4540_v53  ;;  %v941_v59 = vld [vmem:[#allocation7 + $0x2c8] sm:$0xff] }
  0x73   :  { %719 = vmatpush1.bf16.msra.mxu0 %v3670_v3  ;;  %792 = vmatpush1.bf16.msra.mxu1 %v3672_v4  ;;  %6449 = vst [vmem:[#allocation43_spill] sm:$0xff] %v4483_v1  ;;  %v908_v3 = vld [vmem:[#allocation7 + $0x1c0] sm:$0xff]  ;;  %v945_v60 = vld [vmem:[#allocation7 + $0x2e8] sm:$0xff] }
  0x74   :  { %720 = vmatprep.subr.bf16.mxu0 %v3679_v5  ;;  %793 = vmatprep.subr.bf16.mxu1 %v3681_v6  ;;  %6450 = vst [vmem:[#allocation44_spill] sm:$0xff] %v4486_v2  ;;  %v912_v4 = vld [vmem:[#allocation7 + $0x1e0] sm:$0xff]  ;;  %v909_v5 = vld [vmem:[#allocation7 + $0x1c8] sm:$0xff]  ;;  %6452 = vst [vmem:[#allocation46_spill] sm:$0xff] %v4495_v7 }
  0x75   :  { %738 = vmatprep.mubr.bf16.mxu0 %v6152_v8  ;;  %811 = vmatprep.mubr.bf16.mxu1 %v6152_v8  ;;  %v913_v6 = vld [vmem:[#allocation7 + $0x1e8] sm:$0xff]  ;;  %v4497_v9 = vcombine.high %v908_v3, %v912_v4  ;;  %v4504_v18 = vcombine.low %v908_v3, %v912_v4  ;;  %v4547_v4 = vcombine.low %v933_v43, %v937_v44 }
  0x76   :  { %v4500_v10 = vcombine.high %v909_v5, %v913_v6  ;;  %v4509_v19 = vcombine.low %v909_v5, %v913_v6  ;;  %v4552_v6 = vcombine.high %v941_v59, %v945_v60  ;;  %v957_v43 = vld [vmem:[#allocation7 + $0x348] sm:$0xff] }
  0x77   :  { %721 = vmatpush1.bf16.msra.mxu0 %v3678_v13  ;;  %794 = vmatpush1.bf16.msra.mxu1 %v3680_v14  ;;  %6453 = vst [vmem:[#allocation47_spill] sm:$0xff] %v4497_v9  ;;  %v920_v13 = vld [vmem:[#allocation7 + $0x220] sm:$0xff]  ;;  %v917_v14 = vld [vmem:[#allocation7 + $0x208] sm:$0xff]  ;;  %6455 = vst [vmem:[#allocation49_spill] sm:$0xff] %v4504_v18 }
  0x78   :  { %1620 = vmatprep.subr.bf16.mxu0 %v4402_v15  ;;  %1661 = vmatprep.subr.bf16.mxu1 %v4405_v16  ;;  %6454 = vst [vmem:[#allocation48_spill] sm:$0xff] %v4500_v10  ;;  %6456 = vst [vmem:[#allocation50_spill] sm:$0xff] %v4509_v19  ;;  %v4511_v20 = vcombine.high %v916_v11, %v920_v13  ;;  %v4514_v25 = vcombine.high %v917_v14, %v921_v17  ;;  %v961_v44 = vld [vmem:[#allocation7 + $0x368] sm:$0xff] }
  0x79   :  { %v4523_v35 = vcombine.low %v917_v14, %v921_v17  ;;  %6468 = vst [vmem:[#allocation62_spill] sm:$0xff] %v4547_v4  ;;  %6470 = vst [vmem:[#allocation64_spill] sm:$0xff] %v4552_v6  ;;  %v949_v14 = vld [vmem:[#allocation7 + $0x308] sm:$0xff] }
  0x7a   :  { %739 = vmatmul.mubr.bf16.vlgmr.msra.gmra.mrb[16].mxu0 %v4371_v12  ;;  %812 = vmatmul.mubr.bf16.vlgmr.msra.gmra.mrb[16].mxu1 %v4371_v12  ;;  %v877_v12 = vld [vmem:[#allocation7 + $0xc8] sm:$0xff]  ;;  %6457 = vst [vmem:[#allocation51_spill] sm:$0xff] %v4511_v20  ;;  %6458 = vst [vmem:[#allocation52_spill] sm:$0xff] %v4514_v25 }
  0x7b   :  { %1621 = vmatpush1.bf16.msra.mxu0 %v4408_v21  ;;  %1662 = vmatpush1.bf16.msra.mxu1 %v4411_v22  ;;  %v4444_v40 = vcombine.high %v877_v12, %v881_v36  ;;  %v4453_v47 = vcombine.low %v877_v12, %v881_v36  ;;  %6460 = vst [vmem:[#allocation54_spill] sm:$0xff] %v4523_v35  ;;  %v953_v17 = vld [vmem:[#allocation7 + $0x328] sm:$0xff] }
  0x7c   :  { %1622 = vmatprep.subr.bf16.mxu0 %v4413_v23  ;;  %1663 = vmatprep.subr.bf16.mxu1 %v4416_v24  ;;  %v4525_v12 = vcombine.high %v924_v26, %v928_v27  ;;  %v4528_v36 = vcombine.high %v925_v28, %v929_v34  ;;  %v4559_v27 = vcombine.low %v941_v59, %v945_v60 }
  0x7d   :  { %748 = vmatprep.mubr.bf16.mxu0 %v6152_v8  ;;  %821 = vmatprep.mubr.bf16.mxu1 %v6152_v8  ;;  %6438 = vst [vmem:[#allocation32_spill] sm:$0xff] %v4444_v40  ;;  %6440 = vst [vmem:[#allocation34_spill] sm:$0xff] %v4453_v47  ;;  %v4564_v34 = vcombine.high %v949_v14, %v953_v17  ;;  %v4576_v60 = vcombine.high %v957_v43, %v961_v44 }
  0x7e   :  { %6461 = vst [vmem:[#allocation55_spill] sm:$0xff] %v4525_v12  ;;  %6462 = vst [vmem:[#allocation56_spill] sm:$0xff] %v4528_v36 }
  0x7f   :  { %1623 = vmatpush1.bf16.msra.mxu0 %v4421_v30  ;;  %1664 = vmatpush1.bf16.msra.mxu1 %v4425_v31  ;;  %6472 = vst [vmem:[#allocation66_spill] sm:$0xff] %v4559_v27  ;;  %6474 = vst [vmem:[#allocation68_spill] sm:$0xff] %v4564_v34 }
  0x80   :  { %1624 = vmatprep.subr.bf16.mxu0 %v4427_v32  ;;  %1665 = vmatprep.subr.bf16.mxu1 %v4430_v33  ;;  %6478 = vst [vmem:[#allocation72_spill] sm:$0xff] %v4576_v60 }
  0x82   :  { %749 = vmatmul.mubr.bf16.gmra.mrb[20].mxu0 %v4380_v29  ;;  %822 = vmatmul.mubr.bf16.gmra.mrb[20].mxu1 %v4380_v29  ;;  %v4463_v29 = vcombine.low %v884_v41, %v888_v42  ;;  %v932_v41 = vld [vmem:[#allocation7 + $0x280] sm:$0xff] }
  0x83   :  { %1625 = vmatpush1.bf16.msra.mxu0 %v4435_v37  ;;  %1666 = vmatpush1.bf16.msra.mxu1 %v4439_v38  ;;  %v936_v42 = vld [vmem:[#allocation7 + $0x2a0] sm:$0xff] }
  0x84   :  { %1626 = vmatprep.subr.bf16.mxu0 %v4441_v39  ;;  %1667 = vmatprep.subr.bf16.mxu1 %v4444_v40  ;;  %6443 = vst [vmem:[#allocation37_spill] sm:$0xff] %v4463_v29  ;;  %v4537_v52 = vcombine.high %v932_v41, %v936_v42  ;;  %v4543_v3 = vcombine.low %v932_v41, %v936_v42  ;;  %v956_v41 = vld [vmem:[#allocation7 + $0x340] sm:$0xff] }
  0x85   :  { %758 = vmatprep.mubr.bf16.mxu0 %v6152_v8  ;;  %831 = vmatprep.mubr.bf16.mxu1 %v6152_v8  ;;  %v960_v42 = vld [vmem:[#allocation7 + $0x360] sm:$0xff] }
  0x86   :  { %6465 = vst [vmem:[#allocation59_spill] sm:$0xff] %v4537_v52  ;;  %6467 = vst [vmem:[#allocation61_spill] sm:$0xff] %v4543_v3  ;;  %v4573_v59 = vcombine.high %v956_v41, %v960_v42 }
  0x87   :  { %1627 = vmatpush1.bf16.msra.mxu0 %v4448_v45  ;;  %1668 = vmatpush1.bf16.msra.mxu1 %v4453_v47 }
  0x88   :  { %1628 = vmatprep.subr.bf16.mxu0 %v4455_v48  ;;  %1669 = vmatprep.subr.bf16.mxu1 %v4458_v49  ;;  %6477 = vst [vmem:[#allocation71_spill] sm:$0xff] %v4573_v59 }
  0x8a   :  { %759 = vmatmul.mubr.bf16.gmra.mrb[24].mxu0 %v4389_v46  ;;  %832 = vmatmul.mubr.bf16.gmra.mrb[24].mxu1 %v4389_v46  ;;  %v4491_v46 = vcombine.low %v900_v57, %v904_v58  ;;  %v940_v57 = vld [vmem:[#allocation7 + $0x2c0] sm:$0xff] }
  0x8b   :  { %1629 = vmatpush1.bf16.msra.mxu0 %v4463_v29  ;;  %1670 = vmatpush1.bf16.msra.mxu1 %v4467_v54  ;;  %v944_v58 = vld [vmem:[#allocation7 + $0x2e0] sm:$0xff] }
  0x8c   :  { %1630 = vmatprep.subr.bf16.mxu0 %v4469_v55  ;;  %1671 = vmatprep.subr.bf16.mxu1 %v4472_v56  ;;  %6451 = vst [vmem:[#allocation45_spill] sm:$0xff] %v4491_v46  ;;  %v4549_v5 = vcombine.high %v940_v57, %v944_v58  ;;  %v4555_v26 = vcombine.low %v940_v57, %v944_v58 }
  0x8d   :  { %768 = vmatprep.mubr.bf16.mxu0 %v6152_v8  ;;  %841 = vmatprep.mubr.bf16.mxu1 %v6152_v8  ;;  %v4571_v58 = vcombine.low %v949_v14, %v953_v17 }
  0x8e   :  { %6469 = vst [vmem:[#allocation63_spill] sm:$0xff] %v4549_v5  ;;  %6471 = vst [vmem:[#allocation65_spill] sm:$0xff] %v4555_v26 }
  0x8f   :  { %1631 = vmatpush1.bf16.msra.mxu0 %v4476_v61  ;;  %1672 = vmatpush1.bf16.msra.mxu1 %v4481_v62  ;;  %6476 = vst [vmem:[#allocation70_spill] sm:$0xff] %v4571_v58 }
  0x90   :  { %1632 = vmatprep.subr.bf16.mxu0 %v4483_v1  ;;  %1673 = vmatprep.subr.bf16.mxu1 %v4486_v2 }
  0x92   :  { %769 = vmatmul.mubr.bf16.gmra.mrb[28].mxu0 %v4398_v63  ;;  %842 = vmatmul.mubr.bf16.gmra.mrb[28].mxu1 %v4398_v63  ;;  %v4519_v63 = vcombine.low %v916_v11, %v920_v13  ;;  %v948_v11 = vld [vmem:[#allocation7 + $0x300] sm:$0xff] }
  0x93   :  { %1633 = vmatpush1.bf16.msra.mxu0 %v4491_v46  ;;  %1674 = vmatpush1.bf16.msra.mxu1 %v4495_v7  ;;  %v952_v13 = vld [vmem:[#allocation7 + $0x320] sm:$0xff] }
  0x94   :  { %1634 = vmatprep.subr.bf16.mxu0 %v4497_v9  ;;  %1675 = vmatprep.subr.bf16.mxu1 %v4500_v10  ;;  %6459 = vst [vmem:[#allocation53_spill] sm:$0xff] %v4519_v63  ;;  %v4561_v28 = vcombine.high %v948_v11, %v952_v13  ;;  %v4567_v57 = vcombine.low %v948_v11, %v952_v13 }
  0x95   :  { %1652 = vmatprep.mubr.bf16.mxu0 %v6152_v8  ;;  %1693 = vmatprep.mubr.bf16.mxu1 %v6152_v8  ;;  %v964_v8 = vld [vmem:[#allocation7 + $0x380] sm:$0xff]  ;;  %v4579_v11 = vcombine.low %v956_v41, %v960_v42  ;;  %v4583_v13 = vcombine.low %v957_v43, %v961_v44 }
  0x96   :  { %6473 = vst [vmem:[#allocation67_spill] sm:$0xff] %v4561_v28  ;;  %6475 = vst [vmem:[#allocation69_spill] sm:$0xff] %v4567_v57  ;;  %v4585_v14 = vcombine.high %v964_v8, %v968_v0  ;;  %v4591_v41 = vcombine.low %v964_v8, %v968_v0 }
  0x97   :  { %1635 = vmatpush1.bf16.msra.mxu0 %v4504_v18  ;;  %1676 = vmatpush1.bf16.msra.mxu1 %v4509_v19  ;;  %6479 = vst [vmem:[#allocation73_spill] sm:$0xff] %v4579_v11  ;;  %6480 = vst [vmem:[#allocation74_spill] sm:$0xff] %v4583_v13 }
  0x98   :  { %1636 = vmatprep.subr.bf16.mxu0 %v4511_v20  ;;  %1677 = vmatprep.subr.bf16.mxu1 %v4514_v25  ;;  %6481 = vst [vmem:[#allocation75_spill] sm:$0xff] %v4585_v14  ;;  %6483 = vst [vmem:[#allocation77_spill] sm:$0xff] %v4591_v41 }
  0x9b   :  { %1637 = vmatpush1.bf16.msra.mxu0 %v4519_v63  ;;  %1678 = vmatpush1.bf16.msra.mxu1 %v4523_v35 }
  0x9c   :  { %1638 = vmatprep.subr.bf16.mxu0 %v4525_v12  ;;  %1679 = vmatprep.subr.bf16.mxu1 %v4528_v36 }
  0x9f   :  { %1639 = vmatpush1.bf16.msra.mxu0 %v4531_v50  ;;  %1680 = vmatpush1.bf16.msra.mxu1 %v4535_v51 }
  0xa0   :  { %1640 = vmatprep.subr.bf16.mxu0 %v4537_v52  ;;  %1681 = vmatprep.subr.bf16.mxu1 %v4540_v53 }
  0xa3   :  { %1641 = vmatpush1.bf16.msra.mxu0 %v4543_v3  ;;  %1682 = vmatpush1.bf16.msra.mxu1 %v4547_v4  ;;  %v891_v4 = vld [vmem:[#allocation7 + $0x138] sm:$0xff] }
  0xa4   :  { %1642 = vmatprep.subr.bf16.mxu0 %v4549_v5  ;;  %1683 = vmatprep.subr.bf16.mxu1 %v4552_v6  ;;  %v965_v6 = vld [vmem:[#allocation7 + $0x388] sm:$0xff] }
  0xa5   :  { %v969_v5 = vld [vmem:[#allocation7 + $0x3a8] sm:$0xff] }
  0xa6   :  { %v4588_v17 = vcombine.high %v965_v6, %v969_v5  ;;  %v4595_v42 = vcombine.low %v965_v6, %v969_v5 }
  0xa7   :  { %1643 = vmatpush1.bf16.msra.mxu0 %v4555_v26  ;;  %1684 = vmatpush1.bf16.msra.mxu1 %v4559_v27  ;;  %v973_v27 = vld [vmem:[#allocation7 + $0x3c8] sm:$0xff] }
  0xa8   :  { %1644 = vmatprep.subr.bf16.mxu0 %v4561_v28  ;;  %1685 = vmatprep.subr.bf16.mxu1 %v4564_v34  ;;  %6482 = vst [vmem:[#allocation76_spill] sm:$0xff] %v4588_v17  ;;  %v972_v34 = vld [vmem:[#allocation7 + $0x3c0] sm:$0xff]  ;;  %v977_v26 = vld [vmem:[#allocation7 + $0x3e8] sm:$0xff]  ;;  %6484 = vst [vmem:[#allocation78_spill] sm:$0xff] %v4595_v42 }
  0xa9   :  { %v976_v28 = vld [vmem:[#allocation7 + $0x3e0] sm:$0xff]  ;;  %v4600_v44 = vcombine.high %v973_v27, %v977_v26  ;;  %v4607_v8 = vcombine.low %v973_v27, %v977_v26 }
  0xaa   :  { %v4597_v43 = vcombine.high %v972_v34, %v976_v28  ;;  %v4603_v0 = vcombine.low %v972_v34, %v976_v28 }
  0xab   :  { %1645 = vmatpush1.bf16.msra.mxu0 %v4567_v57  ;;  %1686 = vmatpush1.bf16.msra.mxu1 %v4571_v58  ;;  %6486 = vst [vmem:[#allocation80_spill] sm:$0xff] %v4600_v44  ;;  %v855_v58 = vld [vmem:[#allocation7 + $0x18] sm:$0xff]  ;;  %6488 = vst [vmem:[#allocation82_spill] sm:$0xff] %v4607_v8 }
  0xac   :  { %1646 = vmatprep.subr.bf16.mxu0 %v4573_v59  ;;  %1687 = vmatprep.subr.bf16.mxu1 %v4576_v60  ;;  %6485 = vst [vmem:[#allocation79_spill] sm:$0xff] %v4597_v43  ;;  %v854_v60 = vld [vmem:[#allocation7 + $0x10] sm:$0xff]  ;;  %v859_v57 = vld [vmem:[#allocation7 + $0x38] sm:$0xff]  ;;  %6487 = vst [vmem:[#allocation81_spill] sm:$0xff] %v4603_v0 }
  0xad   :  { %v858_v59 = vld [vmem:[#allocation7 + $0x30] sm:$0xff]  ;;  %v4612_v6 = vcombine.high %v855_v58, %v859_v57  ;;  %v4619_v26 = vcombine.low %v855_v58, %v859_v57 }
  0xae   :  { %v4609_v5 = vcombine.high %v854_v60, %v858_v59  ;;  %v4615_v28 = vcombine.low %v854_v60, %v858_v59 }
  0xaf   :  { %1647 = vmatpush1.bf16.msra.mxu0 %v4579_v11  ;;  %1688 = vmatpush1.bf16.msra.mxu1 %v4583_v13  ;;  %6490 = vst [vmem:[#allocation84_spill] sm:$0xff] %v4612_v6  ;;  %v863_v13 = vld [vmem:[#allocation7 + $0x58] sm:$0xff]  ;;  %6492 = vst [vmem:[#allocation86_spill] sm:$0xff] %v4619_v26 }
  0xb0   :  { %1648 = vmatprep.subr.bf16.mxu0 %v4585_v14  ;;  %1689 = vmatprep.subr.bf16.mxu1 %v4588_v17  ;;  %6489 = vst [vmem:[#allocation83_spill] sm:$0xff] %v4609_v5  ;;  %v862_v17 = vld [vmem:[#allocation7 + $0x50] sm:$0xff]  ;;  %v867_v11 = vld [vmem:[#allocation7 + $0x78] sm:$0xff]  ;;  %6491 = vst [vmem:[#allocation85_spill] sm:$0xff] %v4615_v28 }
  0xb1   :  { %v866_v14 = vld [vmem:[#allocation7 + $0x70] sm:$0xff]  ;;  %v4624_v34 = vcombine.high %v863_v13, %v867_v11  ;;  %v4633_v57 = vcombine.low %v863_v13, %v867_v11 }
  0xb2   :  { %v4621_v27 = vcombine.high %v862_v17, %v866_v14  ;;  %v4629_v59 = vcombine.low %v862_v17, %v866_v14 }
  0xb3   :  { %1649 = vmatpush1.bf16.msra.mxu0 %v4591_v41  ;;  %1690 = vmatpush1.bf16.msra.mxu1 %v4595_v42  ;;  %6494 = vst [vmem:[#allocation88_spill] sm:$0xff] %v4624_v34  ;;  %v6495_v42 = vmov 0   ;;  %v871_v41 = vld [vmem:[#allocation7 + $0x98] sm:$0xff]  ;;  %6497 = vst [vmem:[#allocation90_spill] sm:$0xff] %v4633_v57 }
  0xb4   :  { %1650 = vmatprep.subr.bf16.mxu0 %v4597_v43  ;;  %1691 = vmatprep.subr.bf16.mxu1 %v4600_v44  ;;  %6493 = vst [vmem:[#allocation87_spill] sm:$0xff] %v4621_v27  ;;  %v870_v44 = vld [vmem:[#allocation7 + $0x90] sm:$0xff]  ;;  %6496 = vst [vmem:[#allocation89_spill] sm:$0xff] %v4629_v59 }
  0xb5   :  { %v874_v43 = vld [vmem:[#allocation7 + $0xb0] sm:$0xff] }
  0xb6   :  { %v4635_v58 = vcombine.high %v870_v44, %v874_v43  ;;  %v4643_v14 = vcombine.low %v870_v44, %v874_v43 }
  0xb7   :  { %1651 = vmatpush1.bf16.msra.mxu0 %v4603_v0  ;;  %1692 = vmatpush1.bf16.msra.mxu1 %v4607_v8  ;;  %v875_v0 = vld [vmem:[#allocation7 + $0xb8] sm:$0xff] }
  0xb8   :  { %1702 = vmatprep.subr.bf16.mxu0 %v4609_v5  ;;  %1743 = vmatprep.subr.bf16.mxu1 %v4612_v6  ;;  %6498 = vst [vmem:[#allocation91_spill] sm:$0xff] %v4635_v58  ;;  %v4638_v60 = vcombine.high %v871_v41, %v875_v0  ;;  %v878_v6 = vld [vmem:[#allocation7 + $0xd0] sm:$0xff]  ;;  %v879_v8 = vld [vmem:[#allocation7 + $0xd8] sm:$0xff]  ;;  %6500 = vst [vmem:[#allocation93_spill] sm:$0xff] %v4643_v14  ;;  %v4647_v11 = vcombine.low %v871_v41, %v875_v0 }
  0xb9   :  { %v882_v5 = vld [vmem:[#allocation7 + $0xf0] sm:$0xff] }
  0xba   :  { %1653 = vmatmul.mubr.bf16.vlgmr.msra.gmra.mrb[32].mxu0 %v6495_v42  ;;  %1694 = vmatmul.mubr.bf16.vlgmr.msra.gmra.mrb[32].mxu1 %v6495_v42  ;;  %6499 = vst [vmem:[#allocation92_spill] sm:$0xff] %v4638_v60  ;;  %6501 = vst [vmem:[#allocation94_spill] sm:$0xff] %v4647_v11  ;;  %v4649_v13 = vcombine.high %v878_v6, %v882_v5  ;;  %v4655_v43 = vcombine.low %v878_v6, %v882_v5 }
  0xbb   :  { %1703 = vmatpush1.bf16.msra.mxu0 %v4615_v28  ;;  %1744 = vmatpush1.bf16.msra.mxu1 %v4619_v26  ;;  %v883_v28 = vld [vmem:[#allocation7 + $0xf8] sm:$0xff] }
  0xbc   :  { %1704 = vmatprep.subr.bf16.mxu0 %v4621_v27  ;;  %1745 = vmatprep.subr.bf16.mxu1 %v4624_v34  ;;  %6502 = vst [vmem:[#allocation95_spill] sm:$0xff] %v4649_v13  ;;  %v4652_v17 = vcombine.high %v879_v8, %v883_v28  ;;  %v886_v34 = vld [vmem:[#allocation7 + $0x110] sm:$0xff]  ;;  %v887_v26 = vld [vmem:[#allocation7 + $0x118] sm:$0xff]  ;;  %6504 = vst [vmem:[#allocation97_spill] sm:$0xff] %v4655_v43  ;;  %v4659_v41 = vcombine.low %v879_v8, %v883_v28 }
  0xbd   :  { %1734 = vmatprep.mubr.bf16.mxu0 %v6495_v42  ;;  %1775 = vmatprep.mubr.bf16.mxu1 %v6495_v42  ;;  %v890_v27 = vld [vmem:[#allocation7 + $0x130] sm:$0xff]  ;;  %v4664_v0 = vcombine.high %v887_v26, %v891_v4  ;;  %v4671_v8 = vcombine.low %v887_v26, %v891_v4 }
  0xbe   :  { %6503 = vst [vmem:[#allocation96_spill] sm:$0xff] %v4652_v17  ;;  %6505 = vst [vmem:[#allocation98_spill] sm:$0xff] %v4659_v41  ;;  %v4661_v44 = vcombine.high %v886_v34, %v890_v27  ;;  %v4667_v5 = vcombine.low %v886_v34, %v890_v27 }
  0xbf   :  { %1705 = vmatpush1.bf16.msra.mxu0 %v4629_v59  ;;  %1746 = vmatpush1.bf16.msra.mxu1 %v4633_v57  ;;  %6507 = vst [vmem:[#allocation100_spill] sm:$0xff] %v4664_v0  ;;  %v895_v57 = vld [vmem:[#allocation7 + $0x158] sm:$0xff]  ;;  %6509 = vst [vmem:[#allocation102_spill] sm:$0xff] %v4671_v8 }
  0xc0   :  { %1706 = vmatprep.subr.bf16.mxu0 %v4635_v58  ;;  %1747 = vmatprep.subr.bf16.mxu1 %v4638_v60  ;;  %6506 = vst [vmem:[#allocation99_spill] sm:$0xff] %v4661_v44  ;;  %v894_v60 = vld [vmem:[#allocation7 + $0x150] sm:$0xff]  ;;  %v899_v59 = vld [vmem:[#allocation7 + $0x178] sm:$0xff]  ;;  %6508 = vst [vmem:[#allocation101_spill] sm:$0xff] %v4667_v5 }
  0xc1   :  { %v898_v58 = vld [vmem:[#allocation7 + $0x170] sm:$0xff]  ;;  %v4676_v28 = vcombine.high %v895_v57, %v899_v59  ;;  %v4683_v4 = vcombine.low %v895_v57, %v899_v59 }
  0xc2   :  { %v4673_v6 = vcombine.high %v894_v60, %v898_v58  ;;  %v4679_v27 = vcombine.low %v894_v60, %v898_v58 }
  0xc3   :  { %1707 = vmatpush1.bf16.msra.mxu0 %v4643_v14  ;;  %1748 = vmatpush1.bf16.msra.mxu1 %v4647_v11  ;;  %6511 = vst [vmem:[#allocation104_spill] sm:$0xff] %v4676_v28  ;;  %v903_v11 = vld [vmem:[#allocation7 + $0x198] sm:$0xff]  ;;  %6513 = vst [vmem:[#allocation106_spill] sm:$0xff] %v4683_v4 }
  0xc4   :  { %1708 = vmatprep.subr.bf16.mxu0 %v4649_v13  ;;  %1749 = vmatprep.subr.bf16.mxu1 %v4652_v17  ;;  %6510 = vst [vmem:[#allocation103_spill] sm:$0xff] %v4673_v6  ;;  %v902_v17 = vld [vmem:[#allocation7 + $0x190] sm:$0xff]  ;;  %v907_v14 = vld [vmem:[#allocation7 + $0x1b8] sm:$0xff]  ;;  %6512 = vst [vmem:[#allocation105_spill] sm:$0xff] %v4679_v27 }
  0xc5   :  { %v906_v13 = vld [vmem:[#allocation7 + $0x1b0] sm:$0xff]  ;;  %v4688_v34 = vcombine.high %v903_v11, %v907_v14  ;;  %v4695_v59 = vcombine.low %v903_v11, %v907_v14 }
  0xc6   :  { %v4685_v26 = vcombine.high %v902_v17, %v906_v13  ;;  %v4691_v58 = vcombine.low %v902_v17, %v906_v13 }
  0xc7   :  { %1709 = vmatpush1.bf16.msra.mxu0 %v4655_v43  ;;  %1750 = vmatpush1.bf16.msra.mxu1 %v4659_v41  ;;  %6515 = vst [vmem:[#allocation108_spill] sm:$0xff] %v4688_v34  ;;  %v911_v41 = vld [vmem:[#allocation7 + $0x1d8] sm:$0xff]  ;;  %6517 = vst [vmem:[#allocation110_spill] sm:$0xff] %v4695_v59 }
  0xc8   :  { %1710 = vmatprep.subr.bf16.mxu0 %v4661_v44  ;;  %1751 = vmatprep.subr.bf16.mxu1 %v4664_v0  ;;  %6514 = vst [vmem:[#allocation107_spill] sm:$0xff] %v4685_v26  ;;  %v910_v0 = vld [vmem:[#allocation7 + $0x1d0] sm:$0xff]  ;;  %v915_v43 = vld [vmem:[#allocation7 + $0x1f8] sm:$0xff]  ;;  %6516 = vst [vmem:[#allocation109_spill] sm:$0xff] %v4691_v58 }
  0xc9   :  { %v914_v44 = vld [vmem:[#allocation7 + $0x1f0] sm:$0xff]  ;;  %v4700_v60 = vcombine.high %v911_v41, %v915_v43  ;;  %v4707_v14 = vcombine.low %v911_v41, %v915_v43 }
  0xca   :  { %v4697_v57 = vcombine.high %v910_v0, %v914_v44  ;;  %v4703_v13 = vcombine.low %v910_v0, %v914_v44 }
  0xcb   :  { %1711 = vmatpush1.bf16.msra.mxu0 %v4667_v5  ;;  %1752 = vmatpush1.bf16.msra.mxu1 %v4671_v8  ;;  %6519 = vst [vmem:[#allocation112_spill] sm:$0xff] %v4700_v60  ;;  %v919_v8 = vld [vmem:[#allocation7 + $0x218] sm:$0xff]  ;;  %6521 = vst [vmem:[#allocation114_spill] sm:$0xff] %v4707_v14 }
  0xcc   :  { %1712 = vmatprep.subr.bf16.mxu0 %v4673_v6  ;;  %1753 = vmatprep.subr.bf16.mxu1 %v4676_v28  ;;  %6518 = vst [vmem:[#allocation111_spill] sm:$0xff] %v4697_v57  ;;  %v918_v28 = vld [vmem:[#allocation7 + $0x210] sm:$0xff]  ;;  %v923_v5 = vld [vmem:[#allocation7 + $0x238] sm:$0xff]  ;;  %6520 = vst [vmem:[#allocation113_spill] sm:$0xff] %v4703_v13 }
  0xcd   :  { %v922_v6 = vld [vmem:[#allocation7 + $0x230] sm:$0xff]  ;;  %v4712_v17 = vcombine.high %v919_v8, %v923_v5  ;;  %v4719_v43 = vcombine.low %v919_v8, %v923_v5 }
  0xce   :  { %v4709_v11 = vcombine.high %v918_v28, %v922_v6  ;;  %v4715_v44 = vcombine.low %v918_v28, %v922_v6 }
  0xcf   :  { %1713 = vmatpush1.bf16.msra.mxu0 %v4679_v27  ;;  %1754 = vmatpush1.bf16.msra.mxu1 %v4683_v4  ;;  %6523 = vst [vmem:[#allocation116_spill] sm:$0xff] %v4712_v17  ;;  %v927_v4 = vld [vmem:[#allocation7 + $0x258] sm:$0xff]  ;;  %6525 = vst [vmem:[#allocation118_spill] sm:$0xff] %v4719_v43 }
  0xd0   :  { %1714 = vmatprep.subr.bf16.mxu0 %v4685_v26  ;;  %1755 = vmatprep.subr.bf16.mxu1 %v4688_v34  ;;  %6522 = vst [vmem:[#allocation115_spill] sm:$0xff] %v4709_v11  ;;  %v926_v34 = vld [vmem:[#allocation7 + $0x250] sm:$0xff]  ;;  %v931_v27 = vld [vmem:[#allocation7 + $0x278] sm:$0xff]  ;;  %6524 = vst [vmem:[#allocation117_spill] sm:$0xff] %v4715_v44 }
  0xd1   :  { %v930_v26 = vld [vmem:[#allocation7 + $0x270] sm:$0xff]  ;;  %v4724_v0 = vcombine.high %v927_v4, %v931_v27  ;;  %v4731_v5 = vcombine.low %v927_v4, %v931_v27 }
  0xd2   :  { %v4721_v41 = vcombine.high %v926_v34, %v930_v26  ;;  %v4727_v6 = vcombine.low %v926_v34, %v930_v26 }
  0xd3   :  { %1715 = vmatpush1.bf16.msra.mxu0 %v4691_v58  ;;  %1756 = vmatpush1.bf16.msra.mxu1 %v4695_v59  ;;  %6527 = vst [vmem:[#allocation120_spill] sm:$0xff] %v4724_v0  ;;  %v935_v59 = vld [vmem:[#allocation7 + $0x298] sm:$0xff]  ;;  %6529 = vst [vmem:[#allocation122_spill] sm:$0xff] %v4731_v5 }
  0xd4   :  { %1716 = vmatprep.subr.bf16.mxu0 %v4697_v57  ;;  %1757 = vmatprep.subr.bf16.mxu1 %v4700_v60  ;;  %6526 = vst [vmem:[#allocation119_spill] sm:$0xff] %v4721_v41  ;;  %v934_v60 = vld [vmem:[#allocation7 + $0x290] sm:$0xff]  ;;  %v939_v58 = vld [vmem:[#allocation7 + $0x2b8] sm:$0xff]  ;;  %6528 = vst [vmem:[#allocation121_spill] sm:$0xff] %v4727_v6 }
  0xd5   :  { %v938_v57 = vld [vmem:[#allocation7 + $0x2b0] sm:$0xff]  ;;  %v4736_v28 = vcombine.high %v935_v59, %v939_v58  ;;  %v4743_v27 = vcombine.low %v935_v59, %v939_v58 }
  0xd6   :  { %v4733_v8 = vcombine.high %v934_v60, %v938_v57  ;;  %v4739_v26 = vcombine.low %v934_v60, %v938_v57 }
  0xd7   :  { %1717 = vmatpush1.bf16.msra.mxu0 %v4703_v13  ;;  %1758 = vmatpush1.bf16.msra.mxu1 %v4707_v14  ;;  %6531 = vst [vmem:[#allocation124_spill] sm:$0xff] %v4736_v28  ;;  %v943_v14 = vld [vmem:[#allocation7 + $0x2d8] sm:$0xff]  ;;  %6533 = vst [vmem:[#allocation126_spill] sm:$0xff] %v4743_v27 }
  0xd8   :  { %1718 = vmatprep.subr.bf16.mxu0 %v4709_v11  ;;  %1759 = vmatprep.subr.bf16.mxu1 %v4712_v17  ;;  %6530 = vst [vmem:[#allocation123_spill] sm:$0xff] %v4733_v8  ;;  %v942_v17 = vld [vmem:[#allocation7 + $0x2d0] sm:$0xff]  ;;  %v947_v13 = vld [vmem:[#allocation7 + $0x2f8] sm:$0xff]  ;;  %6532 = vst [vmem:[#allocation125_spill] sm:$0xff] %v4739_v26 }
  0xd9   :  { %v946_v11 = vld [vmem:[#allocation7 + $0x2f0] sm:$0xff]  ;;  %v4748_v34 = vcombine.high %v943_v14, %v947_v13  ;;  %v4755_v58 = vcombine.low %v943_v14, %v947_v13 }
  0xda   :  { %v4745_v4 = vcombine.high %v942_v17, %v946_v11  ;;  %v4751_v57 = vcombine.low %v942_v17, %v946_v11 }
  0xdb   :  { %1719 = vmatpush1.bf16.msra.mxu0 %v4715_v44  ;;  %1760 = vmatpush1.bf16.msra.mxu1 %v4719_v43  ;;  %6535 = vst [vmem:[#allocation128_spill] sm:$0xff] %v4748_v34  ;;  %v951_v43 = vld [vmem:[#allocation7 + $0x318] sm:$0xff]  ;;  %6537 = vst [vmem:[#allocation130_spill] sm:$0xff] %v4755_v58 }
  0xdc   :  { %1720 = vmatprep.subr.bf16.mxu0 %v4721_v41  ;;  %1761 = vmatprep.subr.bf16.mxu1 %v4724_v0  ;;  %6534 = vst [vmem:[#allocation127_spill] sm:$0xff] %v4745_v4  ;;  %v950_v0 = vld [vmem:[#allocation7 + $0x310] sm:$0xff]  ;;  %v955_v44 = vld [vmem:[#allocation7 + $0x338] sm:$0xff]  ;;  %6536 = vst [vmem:[#allocation129_spill] sm:$0xff] %v4751_v57 }
  0xdd   :  { %v954_v41 = vld [vmem:[#allocation7 + $0x330] sm:$0xff]  ;;  %v4760_v60 = vcombine.high %v951_v43, %v955_v44  ;;  %v4767_v13 = vcombine.low %v951_v43, %v955_v44 }
  0xde   :  { %v4757_v59 = vcombine.high %v950_v0, %v954_v41  ;;  %v4763_v11 = vcombine.low %v950_v0, %v954_v41 }
  0xdf   :  { %1721 = vmatpush1.bf16.msra.mxu0 %v4727_v6  ;;  %1762 = vmatpush1.bf16.msra.mxu1 %v4731_v5  ;;  %6539 = vst [vmem:[#allocation132_spill] sm:$0xff] %v4760_v60  ;;  %v959_v5 = vld [vmem:[#allocation7 + $0x358] sm:$0xff]  ;;  %6541 = vst [vmem:[#allocation134_spill] sm:$0xff] %v4767_v13 }
  0xe0   :  { %1722 = vmatprep.subr.bf16.mxu0 %v4733_v8  ;;  %1763 = vmatprep.subr.bf16.mxu1 %v4736_v28  ;;  %6538 = vst [vmem:[#allocation131_spill] sm:$0xff] %v4757_v59  ;;  %v958_v28 = vld [vmem:[#allocation7 + $0x350] sm:$0xff]  ;;  %v963_v6 = vld [vmem:[#allocation7 + $0x378] sm:$0xff]  ;;  %6540 = vst [vmem:[#allocation133_spill] sm:$0xff] %v4763_v11 }
  0xe1   :  { %v962_v8 = vld [vmem:[#allocation7 + $0x370] sm:$0xff]  ;;  %v4772_v17 = vcombine.high %v959_v5, %v963_v6  ;;  %v4779_v44 = vcombine.low %v959_v5, %v963_v6 }
  0xe2   :  { %v4769_v14 = vcombine.high %v958_v28, %v962_v8  ;;  %v4775_v41 = vcombine.low %v958_v28, %v962_v8 }
  0xe3   :  { %1723 = vmatpush1.bf16.msra.mxu0 %v4739_v26  ;;  %1764 = vmatpush1.bf16.msra.mxu1 %v4743_v27  ;;  %6543 = vst [vmem:[#allocation136_spill] sm:$0xff] %v4772_v17  ;;  %v967_v27 = vld [vmem:[#allocation7 + $0x398] sm:$0xff]  ;;  %6545 = vst [vmem:[#allocation138_spill] sm:$0xff] %v4779_v44 }
  0xe4   :  { %1724 = vmatprep.subr.bf16.mxu0 %v4745_v4  ;;  %1765 = vmatprep.subr.bf16.mxu1 %v4748_v34  ;;  %6542 = vst [vmem:[#allocation135_spill] sm:$0xff] %v4769_v14  ;;  %v966_v34 = vld [vmem:[#allocation7 + $0x390] sm:$0xff]  ;;  %v971_v26 = vld [vmem:[#allocation7 + $0x3b8] sm:$0xff]  ;;  %6544 = vst [vmem:[#allocation137_spill] sm:$0xff] %v4775_v41 }
  0xe5   :  { %v970_v4 = vld [vmem:[#allocation7 + $0x3b0] sm:$0xff]  ;;  %v4784_v0 = vcombine.high %v967_v27, %v971_v26  ;;  %v4791_v6 = vcombine.low %v967_v27, %v971_v26  ;;  %v6555_v27 = vld [vmem:[#allocation62_spill] sm:$0xff] }
  0xe6   :  { %v4781_v43 = vcombine.high %v966_v34, %v970_v4  ;;  %v4787_v8 = vcombine.low %v966_v34, %v970_v4  ;;  %v6556_v34 = vld [vmem:[#allocation63_spill] sm:$0xff] }
  0xe7   :  { %1725 = vmatpush1.bf16.msra.mxu0 %v4751_v57  ;;  %1766 = vmatpush1.bf16.msra.mxu1 %v4755_v58  ;;  %6547 = vst [vmem:[#allocation140_spill] sm:$0xff] %v4784_v0  ;;  %v975_v58 = vld [vmem:[#allocation7 + $0x3d8] sm:$0xff]  ;;  %6549 = vst [vmem:[#allocation142_spill] sm:$0xff] %v4791_v6 }
  0xe8   :  { %1726 = vmatprep.subr.bf16.mxu0 %v4757_v59  ;;  %1767 = vmatprep.subr.bf16.mxu1 %v4760_v60  ;;  %6546 = vst [vmem:[#allocation139_spill] sm:$0xff] %v4781_v43  ;;  %v974_v60 = vld [vmem:[#allocation7 + $0x3d0] sm:$0xff]  ;;  %v979_v57 = vld [vmem:[#allocation7 + $0x3f8] sm:$0xff]  ;;  %6548 = vst [vmem:[#allocation141_spill] sm:$0xff] %v4787_v8 }
  0xe9   :  { %v978_v59 = vld [vmem:[#allocation7 + $0x3f0] sm:$0xff]  ;;  %v4796_v28 = vcombine.high %v975_v58, %v979_v57  ;;  %v4803_v4 = vcombine.low %v975_v58, %v979_v57  ;;  %v6558_v58 = vld [vmem:[#allocation65_spill] sm:$0xff] }
  0xea   :  { %v4793_v5 = vcombine.high %v974_v60, %v978_v59  ;;  %v6557_v57 = vld [vmem:[#allocation64_spill] sm:$0xff] }
  0xeb   :  { %1727 = vmatpush1.bf16.msra.mxu0 %v4763_v11  ;;  %1768 = vmatpush1.bf16.msra.mxu1 %v4767_v13  ;;  %6551 = vst [vmem:[#allocation144_spill] sm:$0xff] %v4796_v28  ;;  %6553 = vst [vmem:[#allocation146_spill] sm:$0xff] %v4803_v4 }
  0xec   :  { %1728 = vmatprep.subr.bf16.mxu0 %v4769_v14  ;;  %1769 = vmatprep.subr.bf16.mxu1 %v4772_v17  ;;  %6550 = vst [vmem:[#allocation143_spill] sm:$0xff] %v4793_v5  ;;  %v4799_v17 = vcombine.low %v974_v60, %v978_v59  ;;  %v6559_v60 = vld [vmem:[#allocation66_spill] sm:$0xff] }
  0xee   :  { %6552 = vst [vmem:[#allocation145_spill] sm:$0xff] %v4799_v17 }
  0xef   :  { %1729 = vmatpush1.bf16.msra.mxu0 %v4775_v41  ;;  %1770 = vmatpush1.bf16.msra.mxu1 %v4779_v44 }
  0xf0   :  { %1730 = vmatprep.subr.bf16.mxu0 %v4781_v43  ;;  %1771 = vmatprep.subr.bf16.mxu1 %v4784_v0 }
  0xf3   :  { %1731 = vmatpush1.bf16.msra.mxu0 %v4787_v8  ;;  %1772 = vmatpush1.bf16.msra.mxu1 %v4791_v6 }
  0xf4   :  { %1732 = vmatprep.subr.bf16.mxu0 %v4793_v5  ;;  %1773 = vmatprep.subr.bf16.mxu1 %v4796_v28 }
  0xf7   :  { %1733 = vmatpush1.bf16.msra.mxu0 %v4799_v17  ;;  %1774 = vmatpush1.bf16.msra.mxu1 %v4803_v4 }
  0xf8   :  { %1842 = vmatprep.subr.bf16.mxu0 %v4402_v15  ;;  %1883 = vmatprep.subr.bf16.mxu1 %v4405_v16 }
  0xfa   :  { %1735 = vmatmul.mubr.bf16.vlgmr.msra.gmra.mrb[36].mxu0 %v6495_v42  ;;  %1776 = vmatmul.mubr.bf16.vlgmr.msra.gmra.mrb[36].mxu1 %v6495_v42  ;;  %v176_v42 = vlaneseq }
  0xfb   :  { %1843 = vmatpush1.bf16.msra.mxu0 %v4408_v21  ;;  %1884 = vmatpush1.bf16.msra.mxu1 %v4411_v22 }
  0xfc   :  { %1844 = vmatprep.subr.bf16.mxu0 %v4413_v23  ;;  %1885 = vmatprep.subr.bf16.mxu1 %v4416_v24  ;;  %v4853_v26 = vshrl.u32 %v176_v42, 7 }
  0xfe   :  { %6554 = vst [vmem:[#allocation147_spill] sm:$0xff] %v4853_v26  ;;  %v6309_v59 = vsub.s32 0, %v4853_v26  ;;  %v6314_v42 = vsub.s32 2, %v4853_v26 }
  0xff   :  { %1845 = vmatpush1.bf16.msra.mxu0 %v4421_v30  ;;  %1886 = vmatpush1.bf16.msra.mxu1 %v4425_v31 }
 0x100   :  { %1846 = vmatprep.subr.bf16.mxu0 %v4427_v32  ;;  %1887 = vmatprep.subr.bf16.mxu1 %v4430_v33 }
 0x103   :  { %1847 = vmatpush1.bf16.msra.mxu0 %v4435_v37  ;;  %1888 = vmatpush1.bf16.msra.mxu1 %v4439_v38 }
 0x104   :  { %1848 = vmatprep.subr.bf16.mxu0 %v4441_v39  ;;  %1889 = vmatprep.subr.bf16.mxu1 %v4444_v40 }
 0x107   :  { %1849 = vmatpush1.bf16.msra.mxu0 %v4448_v45  ;;  %1890 = vmatpush1.bf16.msra.mxu1 %v4453_v47 }
 0x108   :  { %1850 = vmatprep.subr.bf16.mxu0 %v4455_v48  ;;  %1891 = vmatprep.subr.bf16.mxu1 %v4458_v49 }
 0x10b   :  { %1851 = vmatpush1.bf16.msra.mxu0 %v4463_v29  ;;  %1892 = vmatpush1.bf16.msra.mxu1 %v4467_v54 }
 0x10c   :  { %1852 = vmatprep.subr.bf16.mxu0 %v4469_v55  ;;  %1893 = vmatprep.subr.bf16.mxu1 %v4472_v56 }
 0x10f   :  { %1853 = vmatpush1.bf16.msra.mxu0 %v4476_v61  ;;  %1894 = vmatpush1.bf16.msra.mxu1 %v4481_v62 }
 0x110   :  { %1854 = vmatprep.subr.bf16.mxu0 %v4483_v1  ;;  %1895 = vmatprep.subr.bf16.mxu1 %v4486_v2 }
 0x113   :  { %1855 = vmatpush1.bf16.msra.mxu0 %v4491_v46  ;;  %1896 = vmatpush1.bf16.msra.mxu1 %v4495_v7 }
 0x114   :  { %1856 = vmatprep.subr.bf16.mxu0 %v4497_v9  ;;  %1897 = vmatprep.subr.bf16.mxu1 %v4500_v10  ;;  %v6578_v10 = vld [vmem:[#allocation79_spill] sm:$0xff] }
 0x115   :  { %v6587_v9 = vld [vmem:[#allocation83_spill] sm:$0xff] }
 0x117   :  { %1857 = vmatpush1.bf16.msra.mxu0 %v4504_v18  ;;  %1898 = vmatpush1.bf16.msra.mxu1 %v4509_v19  ;;  %v6574_v18 = vld [vmem:[#allocation76_spill] sm:$0xff] }
 0x118   :  { %1858 = vmatprep.subr.bf16.mxu0 %v4511_v20  ;;  %1899 = vmatprep.subr.bf16.mxu1 %v4514_v25  ;;  %v6570_v25 = vld [vmem:[#allocation74_spill] sm:$0xff]  ;;  %v6571_v20 = vld [vmem:[#allocation75_spill] sm:$0xff] }
 0x11b   :  { %1859 = vmatpush1.bf16.msra.mxu0 %v4519_v63  ;;  %1900 = vmatpush1.bf16.msra.mxu1 %v4523_v35 }
 0x11c   :  { %1860 = vmatprep.subr.bf16.mxu0 %v4525_v12  ;;  %1901 = vmatprep.subr.bf16.mxu1 %v4528_v36  ;;  %v6567_v36 = vld [vmem:[#allocation73_spill] sm:$0xff]  ;;  %v6568_v12 = vsub.s32 3, %v4853_v26 }
 0x11f   :  { %1861 = vmatpush1.bf16.msra.mxu0 %v4531_v50  ;;  %1902 = vmatpush1.bf16.msra.mxu1 %v4535_v51  ;;  %v6560_v51 = vld [vmem:[#allocation67_spill] sm:$0xff] }
 0x120   :  { %1862 = vmatprep.subr.bf16.mxu0 %v4537_v52  ;;  %1903 = vmatprep.subr.bf16.mxu1 %v4540_v53  ;;  %v6564_v53 = vld [vmem:[#allocation71_spill] sm:$0xff] }
 0x123   :  { %1863 = vmatpush1.bf16.msra.mxu0 %v4543_v3  ;;  %1904 = vmatpush1.bf16.msra.mxu1 %v6555_v27  ;;  %v4865_v3 = vld [vmem:[%s6148_s3] sm:$0xff]  ;;  %v6561_v27 = vld [vmem:[#allocation68_spill] sm:$0xff] }
 0x124   :  { %1864 = vmatprep.subr.bf16.mxu0 %v6556_v34  ;;  %1905 = vmatprep.subr.bf16.mxu1 %v6557_v57  ;;  %v6562_v57 = vld [vmem:[#allocation69_spill] sm:$0xff]  ;;  %v6565_v34 = vld [vmem:[#allocation72_spill] sm:$0xff] }
 0x127   :  { %1865 = vmatpush1.bf16.msra.mxu0 %v6558_v58  ;;  %1906 = vmatpush1.bf16.msra.mxu1 %v6559_v60  ;;  %v4874_v58 = vrot.slane %v4865_v3, %v6309_v59  ;;  %v6563_v60 = vld [vmem:[#allocation70_spill] sm:$0xff]  ;;  %v6566_v59 = vsub.s32 1, %v4853_v26 }
 0x128   :  { %1866 = vmatprep.subr.bf16.mxu0 %v6560_v51  ;;  %1907 = vmatprep.subr.bf16.mxu1 %v6561_v27  ;;  %v4884_v27 = vrot.slane %v4865_v3, %v6314_v42  ;;  %v4902_v42 = vrot.slane %v4865_v3, %v6568_v12 }
 0x129   :  { %v4894_v51 = vrot.slane %v4865_v3, %v6566_v59 }
 0x12b   :  { %1867 = vmatpush1.bf16.msra.mxu0 %v6562_v57  ;;  %1908 = vmatpush1.bf16.msra.mxu1 %v6563_v60 }
 0x12c   :  { %1868 = vmatprep.subr.bf16.mxu0 %v6564_v53  ;;  %1909 = vmatprep.subr.bf16.mxu1 %v6565_v34 }
 0x12d   :  { %v4879_v52 = vpop.f32.mrb[0].mxu0  ;;  %v4887_v57 = vpop.f32.mrb[0].mxu1 }
 0x12e   :  { %v4889_v50 = vpop.f32.mrb[1].mxu0  ;;  %v4896_v60 = vpop.f32.mrb[1].mxu1 }
 0x12f   :  { %v598_v53 = vpop.f32.mrb[2].mxu0  ;;  %1869 = vmatpush1.bf16.msra.mxu0 %v6567_v36  ;;  %v671_v35 = vpop.f32.mrb[2].mxu1  ;;  %1910 = vmatpush1.bf16.msra.mxu1 %v6570_v25 }
 0x130   :  { %v4905_v34 = vadd.f32 %v598_v53, %v4874_v58  ;;  %v600_v63 = vpop.f32.mrb[3].mxu0  ;;  %1870 = vmatprep.subr.bf16.mxu0 %v6571_v20  ;;  %v4910_v59 = vadd.f32 %v671_v35, %v4884_v27  ;;  %v673_v36 = vpop.f32.mrb[3].mxu1  ;;  %1911 = vmatprep.subr.bf16.mxu1 %v6574_v18  ;;  %v6576_v53 = vld [vmem:[#allocation77_spill] sm:$0xff]  ;;  %v6579_v20 = vld [vmem:[#allocation80_spill] sm:$0xff] }
 0x131   :  { %v4913_v19 = vadd.f32 %v600_v63, %v4894_v51  ;;  %v4917_v12 = vadd.f32 %v673_v36, %v4902_v42  ;;  %v6583_v18 = vld [vmem:[#allocation81_spill] sm:$0xff] }
 0x132   :  { %6569 = vst [vmem:[#allocation148_spill] sm:$0xff] %v4905_v34  ;;  %6572 = vst [vmem:[#allocation149_spill] sm:$0xff] %v4910_v59  ;;  %v6577_v34 = vld [vmem:[#allocation78_spill] sm:$0xff] }
 0x133   :  { %6573 = vst [vmem:[#allocation150_spill] sm:$0xff] %v4913_v19  ;;  %6575 = vst [vmem:[#allocation151_spill] sm:$0xff] %v4917_v12  ;;  %1871 = vmatpush1.bf16.msra.mxu0 %v6576_v53  ;;  %1912 = vmatpush1.bf16.msra.mxu1 %v6577_v34  ;;  %v6586_v34 = vld [vmem:[#allocation82_spill] sm:$0xff] }
 0x134   :  { %1872 = vmatprep.subr.bf16.mxu0 %v6578_v10  ;;  %1913 = vmatprep.subr.bf16.mxu1 %v6579_v20 }
 0x135   :  { %v604_v25 = vpop.f32.mrb[4].mxu0  ;;  %v677_v63 = vpop.f32.mrb[4].mxu1 }
 0x136   :  { %v4924_v35 = vadd.f32 %v604_v25, %v4874_v58  ;;  %v606_v19 = vpop.f32.mrb[5].mxu0  ;;  %v4927_v59 = vadd.f32 %v677_v63, %v4884_v27  ;;  %v679_v12 = vpop.f32.mrb[5].mxu1 }
 0x137   :  { %v4930_v36 = vadd.f32 %v606_v19, %v4894_v51  ;;  %v608_v53 = vpop.f32.mrb[6].mxu0  ;;  %1873 = vmatpush1.bf16.msra.mxu0 %v6583_v18  ;;  %v4934_v10 = vadd.f32 %v679_v12, %v4902_v42  ;;  %v681_v25 = vpop.f32.mrb[6].mxu1  ;;  %1914 = vmatpush1.bf16.msra.mxu1 %v6586_v34 }
 0x138   :  { %6580 = vst [vmem:[#allocation152_spill] sm:$0xff] %v4924_v35  ;;  %6581 = vst [vmem:[#allocation153_spill] sm:$0xff] %v4927_v59  ;;  %v4937_v20 = vadd.f32 %v608_v53, %v4874_v58  ;;  %v610_v35 = vpop.f32.mrb[7].mxu0  ;;  %1924 = vmatprep.subr.bf16.mxu0 %v6587_v9  ;;  %v4942_v63 = vadd.f32 %v681_v25, %v4884_v27  ;;  %v6590_v59 = vld [vmem:[#allocation84_spill] sm:$0xff] }
 0x139   :  { %6582 = vst [vmem:[#allocation154_spill] sm:$0xff] %v4930_v36  ;;  %6584 = vst [vmem:[#allocation155_spill] sm:$0xff] %v4934_v10  ;;  %v4945_v19 = vadd.f32 %v610_v35, %v4894_v51  ;;  %v683_v36 = vpop.f32.mrb[7].mxu1  ;;  %1965 = vmatprep.subr.bf16.mxu1 %v6590_v59 }
 0x13a   :  { %6585 = vst [vmem:[#allocation156_spill] sm:$0xff] %v4937_v20  ;;  %6588 = vst [vmem:[#allocation157_spill] sm:$0xff] %v4942_v63  ;;  %v4949_v12 = vadd.f32 %v683_v36, %v4902_v42 }
 0x13b   :  { %6589 = vst [vmem:[#allocation158_spill] sm:$0xff] %v4945_v19 }
 0x13c   :  { %6591 = vst [vmem:[#allocation159_spill] sm:$0xff] %v4949_v12 }
 0x13d   :  { %v614_v53 = vpop.f32.mrb[8].mxu0  ;;  %v687_v10 = vpop.f32.mrb[8].mxu1 }
 0x13e   :  { %v4952_v20 = vadd.f32 %v614_v53, %v4874_v58  ;;  %v616_v34 = vpop.f32.mrb[9].mxu0  ;;  %v4955_v9 = vadd.f32 %v687_v10, %v4884_v27  ;;  %v689_v35 = vpop.f32.mrb[9].mxu1 }
 0x13f   :  { %v4958_v25 = vadd.f32 %v616_v34, %v4894_v51  ;;  %v618_v19 = vpop.f32.mrb[10].mxu0  ;;  %v4961_v63 = vadd.f32 %v689_v35, %v4902_v42  ;;  %v691_v12 = vpop.f32.mrb[10].mxu1 }
 0x140   :  { %6592 = vst [vmem:[#allocation160_spill] sm:$0xff] %v4952_v20  ;;  %6593 = vst [vmem:[#allocation161_spill] sm:$0xff] %v4955_v9  ;;  %v4964_v36 = vadd.f32 %v618_v19, %v4874_v58  ;;  %v620_v59 = vpop.f32.mrb[11].mxu0  ;;  %v4967_v53 = vadd.f32 %v691_v12, %v4884_v27  ;;  %v693_v10 = vpop.f32.mrb[11].mxu1 }
 0x141   :  { %6594 = vst [vmem:[#allocation162_spill] sm:$0xff] %v4958_v25  ;;  %6595 = vst [vmem:[#allocation163_spill] sm:$0xff] %v4961_v63  ;;  %v4970_v20 = vadd.f32 %v620_v59, %v4894_v51  ;;  %v4973_v34 = vadd.f32 %v693_v10, %v4902_v42 }
 0x142   :  { %6596 = vst [vmem:[#allocation164_spill] sm:$0xff] %v4964_v36  ;;  %6597 = vst [vmem:[#allocation165_spill] sm:$0xff] %v4967_v53 }
 0x143   :  { %6598 = vst [vmem:[#allocation166_spill] sm:$0xff] %v4970_v20  ;;  %6599 = vst [vmem:[#allocation167_spill] sm:$0xff] %v4973_v34 }
 0x145   :  { %v624_v25 = vpop.f32.mrb[12].mxu0  ;;  %v697_v35 = vpop.f32.mrb[12].mxu1 }
 0x146   :  { %v4976_v9 = vadd.f32 %v624_v25, %v4874_v58  ;;  %v626_v63 = vpop.f32.mrb[13].mxu0  ;;  %v4979_v19 = vadd.f32 %v697_v35, %v4884_v27  ;;  %v699_v12 = vpop.f32.mrb[13].mxu1  ;;  %v6331_v25 = vsub.s32 4, %v4853_v26 }
 0x147   :  { %v4982_v36 = vadd.f32 %v626_v63, %v4894_v51  ;;  %v628_v53 = vpop.f32.mrb[14].mxu0  ;;  %v4985_v59 = vadd.f32 %v699_v12, %v4902_v42  ;;  %v701_v34 = vpop.f32.mrb[14].mxu1  ;;  %v198_v12 = vsub.s32 5, %v4853_v26 }
 0x148   :  { %6600 = vst [vmem:[#allocation168_spill] sm:$0xff] %v4976_v9  ;;  %6601 = vst [vmem:[#allocation169_spill] sm:$0xff] %v4979_v19  ;;  %v4988_v10 = vadd.f32 %v628_v53, %v4874_v58  ;;  %v630_v20 = vpop.f32.mrb[15].mxu0  ;;  %v4992_v9 = vadd.f32 %v701_v34, %v4884_v27  ;;  %v703_v63 = vpop.f32.mrb[15].mxu1  ;;  %v5005_v53 = vrot.slane %v4865_v3, %v6331_v25 }
 0x149   :  { %6602 = vst [vmem:[#allocation170_spill] sm:$0xff] %v4982_v36  ;;  %6603 = vst [vmem:[#allocation171_spill] sm:$0xff] %v4985_v59  ;;  %v4995_v35 = vadd.f32 %v630_v20, %v4894_v51  ;;  %v202_v36 = vsub.s32 6, %v4853_v26  ;;  %v4999_v19 = vadd.f32 %v703_v63, %v4902_v42  ;;  %v5018_v63 = vrot.slane %v4865_v3, %v198_v12 }
 0x14a   :  { %6604 = vst [vmem:[#allocation172_spill] sm:$0xff] %v4988_v10  ;;  %6605 = vst [vmem:[#allocation173_spill] sm:$0xff] %v4992_v9  ;;  %v206_v10 = vsub.s32 7, %v4853_v26 }
 0x14b   :  { %6606 = vst [vmem:[#allocation174_spill] sm:$0xff] %v4995_v35  ;;  %6607 = vst [vmem:[#allocation175_spill] sm:$0xff] %v4999_v19  ;;  %v5011_v20 = vrot.slane %v4865_v3, %v202_v36 }
 0x14c   :  { %v5023_v25 = vrot.slane %v4865_v3, %v206_v10 }
 0x14d   :  { %v5008_v34 = vpop.f32.mrb[16].mxu0  ;;  %v5013_v35 = vpop.f32.mrb[16].mxu1 }
 0x14e   :  { %v5015_v9 = vpop.f32.mrb[17].mxu0  ;;  %v5020_v19 = vpop.f32.mrb[17].mxu1 }
 0x14f   :  { %v744_v59 = vpop.f32.mrb[18].mxu0  ;;  %v817_v18 = vpop.f32.mrb[18].mxu1 }
 0x150   :  { %v5026_v26 = vadd.f32 %v744_v59, %v5005_v53  ;;  %v746_v7 = vpop.f32.mrb[19].mxu0  ;;  %v5029_v36 = vadd.f32 %v817_v18, %v5011_v20  ;;  %v819_v2 = vpop.f32.mrb[19].mxu1 }
 0x151   :  { %v5032_v46 = vadd.f32 %v746_v7, %v5018_v63  ;;  %v5035_v12 = vadd.f32 %v819_v2, %v5023_v25 }
 0x152   :  { %6608 = vst [vmem:[#allocation176_spill] sm:$0xff] %v5026_v26  ;;  %6609 = vst [vmem:[#allocation177_spill] sm:$0xff] %v5029_v36 }
 0x153   :  { %6610 = vst [vmem:[#allocation178_spill] sm:$0xff] %v5032_v46  ;;  %6611 = vst [vmem:[#allocation179_spill] sm:$0xff] %v5035_v12 }
 0x155   :  { %v750_v1 = vpop.f32.mrb[20].mxu0  ;;  %v823_v3 = vpop.f32.mrb[20].mxu1 }
 0x156   :  { %v5038_v62 = vadd.f32 %v750_v1, %v5005_v53  ;;  %v752_v10 = vpop.f32.mrb[21].mxu0  ;;  %v5041_v59 = vadd.f32 %v823_v3, %v5011_v20  ;;  %v825_v18 = vpop.f32.mrb[21].mxu1 }
 0x157   :  { %v5044_v26 = vadd.f32 %v752_v10, %v5018_v63  ;;  %v754_v36 = vpop.f32.mrb[22].mxu0  ;;  %v5047_v7 = vadd.f32 %v825_v18, %v5023_v25  ;;  %v827_v12 = vpop.f32.mrb[22].mxu1 }
 0x158   :  { %6612 = vst [vmem:[#allocation180_spill] sm:$0xff] %v5038_v62  ;;  %6613 = vst [vmem:[#allocation181_spill] sm:$0xff] %v5041_v59  ;;  %v5050_v2 = vadd.f32 %v754_v36, %v5005_v53  ;;  %v756_v46 = vpop.f32.mrb[23].mxu0  ;;  %v5053_v1 = vadd.f32 %v827_v12, %v5011_v20  ;;  %v829_v3 = vpop.f32.mrb[23].mxu1 }
 0x159   :  { %6614 = vst [vmem:[#allocation182_spill] sm:$0xff] %v5044_v26  ;;  %6615 = vst [vmem:[#allocation183_spill] sm:$0xff] %v5047_v7  ;;  %v5056_v62 = vadd.f32 %v756_v46, %v5018_v63  ;;  %v5059_v10 = vadd.f32 %v829_v3, %v5023_v25 }
 0x15a   :  { %6616 = vst [vmem:[#allocation184_spill] sm:$0xff] %v5050_v2  ;;  %6617 = vst [vmem:[#allocation185_spill] sm:$0xff] %v5053_v1 }
 0x15b   :  { %6618 = vst [vmem:[#allocation186_spill] sm:$0xff] %v5056_v62  ;;  %6619 = vst [vmem:[#allocation187_spill] sm:$0xff] %v5059_v10 }
 0x15d   :  { %v760_v26 = vpop.f32.mrb[24].mxu0  ;;  %v833_v18 = vpop.f32.mrb[24].mxu1 }
 0x15e   :  { %v5062_v59 = vadd.f32 %v760_v26, %v5005_v53  ;;  %v762_v7 = vpop.f32.mrb[25].mxu0  ;;  %v5065_v36 = vadd.f32 %v833_v18, %v5011_v20  ;;  %v835_v12 = vpop.f32.mrb[25].mxu1 }
 0x15f   :  { %v5068_v2 = vadd.f32 %v762_v7, %v5018_v63  ;;  %v764_v1 = vpop.f32.mrb[26].mxu0  ;;  %v5071_v46 = vadd.f32 %v835_v12, %v5023_v25  ;;  %v837_v10 = vpop.f32.mrb[26].mxu1 }
 0x160   :  { %6620 = vst [vmem:[#allocation188_spill] sm:$0xff] %v5062_v59  ;;  %6621 = vst [vmem:[#allocation189_spill] sm:$0xff] %v5065_v36  ;;  %v5074_v3 = vadd.f32 %v764_v1, %v5005_v53  ;;  %v766_v62 = vpop.f32.mrb[27].mxu0  ;;  %v5077_v26 = vadd.f32 %v837_v10, %v5011_v20  ;;  %v839_v18 = vpop.f32.mrb[27].mxu1 }
 0x161   :  { %6622 = vst [vmem:[#allocation190_spill] sm:$0xff] %v5068_v2  ;;  %6623 = vst [vmem:[#allocation191_spill] sm:$0xff] %v5071_v46  ;;  %v5080_v59 = vadd.f32 %v766_v62, %v5018_v63  ;;  %v5083_v7 = vadd.f32 %v839_v18, %v5023_v25 }
 0x162   :  { %6624 = vst [vmem:[#allocation192_spill] sm:$0xff] %v5074_v3  ;;  %6625 = vst [vmem:[#allocation193_spill] sm:$0xff] %v5077_v26 }
 0x163   :  { %6626 = vst [vmem:[#allocation194_spill] sm:$0xff] %v5080_v59  ;;  %6627 = vst [vmem:[#allocation195_spill] sm:$0xff] %v5083_v7 }
 0x165   :  { %v770_v2 = vpop.f32.mrb[28].mxu0  ;;  %v843_v12 = vpop.f32.mrb[28].mxu1 }
 0x166   :  { %v5086_v36 = vadd.f32 %v770_v2, %v5005_v53  ;;  %v772_v46 = vpop.f32.mrb[29].mxu0  ;;  %v5089_v1 = vadd.f32 %v843_v12, %v5011_v20  ;;  %v845_v10 = vpop.f32.mrb[29].mxu1 }
 0x167   :  { %v5092_v3 = vadd.f32 %v772_v46, %v5018_v63  ;;  %v774_v26 = vpop.f32.mrb[30].mxu0  ;;  %v5095_v62 = vadd.f32 %v845_v10, %v5023_v25  ;;  %v847_v7 = vpop.f32.mrb[30].mxu1  ;;  %v668_v10 = vadd.f32 %v4887_v57, %v4884_v27 }
 0x168   :  { %6628 = vst [vmem:[#allocation196_spill] sm:$0xff] %v5086_v36  ;;  %6629 = vst [vmem:[#allocation197_spill] sm:$0xff] %v5089_v1  ;;  %v5098_v18 = vadd.f32 %v774_v26, %v5005_v53  ;;  %v776_v59 = vpop.f32.mrb[31].mxu0  ;;  %v5101_v2 = vadd.f32 %v847_v7, %v5011_v20  ;;  %v849_v12 = vpop.f32.mrb[31].mxu1  ;;  %v597_v26 = vadd.f32 %v4889_v50, %v4894_v51 }
 0x169   :  { %6630 = vst [vmem:[#allocation198_spill] sm:$0xff] %v5092_v3  ;;  %6631 = vst [vmem:[#allocation199_spill] sm:$0xff] %v5095_v62  ;;  %v5104_v36 = vadd.f32 %v776_v59, %v5018_v63  ;;  %v5107_v46 = vadd.f32 %v849_v12, %v5023_v25  ;;  %v595_v3 = vadd.f32 %v4879_v52, %v4874_v58 }
 0x16a   :  { %6632 = vst [vmem:[#allocation200_spill] sm:$0xff] %v5098_v18  ;;  %6633 = vst [vmem:[#allocation201_spill] sm:$0xff] %v5101_v2  ;;  %v670_v7 = vadd.f32 %v4896_v60, %v4902_v42 }
 0x16b   :  { %6634 = vst [vmem:[#allocation202_spill] sm:$0xff] %v5104_v36  ;;  %6635 = vst [vmem:[#allocation203_spill] sm:$0xff] %v5107_v46 }
 0x18d   :  { %v1654_v18 = vpop.f32.mrb[32].mxu0  ;;  %v1695_v59 = vpop.f32.mrb[32].mxu1 }
 0x18e   :  { %v1784_v2 = vadd.f32 %v1654_v18, %v595_v3  ;;  %v1656_v36 = vpop.f32.mrb[33].mxu0  ;;  %v1786_v62 = vadd.f32 %v1695_v59, %v668_v10  ;;  %v1697_v12 = vpop.f32.mrb[33].mxu1 }
 0x18f   :  { %v1785_v1 = vadd.f32 %v1656_v36, %v597_v26  ;;  %v1658_v46 = vpop.f32.mrb[34].mxu0  ;;  %v1787_v61 = vadd.f32 %v1697_v12, %v670_v7  ;;  %v1699_v56 = vpop.f32.mrb[34].mxu1 }
 0x190   :  { %v1659_v52 = vpop.f32.mrb[35].mxu0  ;;  %v1700_v58 = vpop.f32.mrb[35].mxu1  ;;  %v3810_v55 = vmul.f32 -1.442695, %v1784_v2  ;;  %v3812_v27 = vmul.f32 -1.442695, %v1786_v62  ;;  %v741_v56 = vadd.f32 %v5008_v34, %v5005_v53 }
 0x191   :  { %v3811_v57 = vmul.f32 -1.442695, %v1785_v1  ;;  %v3813_v54 = vmul.f32 -1.442695, %v1787_v61  ;;  %v814_v1 = vadd.f32 %v5013_v35, %v5011_v20  ;;  %v816_v61 = vadd.f32 %v5020_v19, %v5023_v25 }
 0x192   :  { %3952 = vpow2.f32 %v3810_v55  ;;  %v743_v55 = vadd.f32 %v5015_v9, %v5018_v63 }
 0x193   :  { %3954 = vpow2.f32 %v3812_v27 }
 0x194   :  { %3956 = vpow2.f32 %v3811_v57 }
 0x195   :  { %3958 = vpow2.f32 %v3813_v54 }
 0x19c   :  { %v3953_v50 = vpop.eup %3952 }
 0x19d   :  { %v3955_v51 = vpop.eup %3954  ;;  %v1804_v3 = vadd.f32 1.0, %v3953_v50 }
 0x19e   :  { %v3957_v60 = vpop.eup %3956  ;;  %v1806_v36 = vadd.f32 1.0, %v3955_v51 }
 0x19f   :  { %v3959_v42 = vpop.eup %3958  ;;  %v1805_v18 = vadd.f32 1.0, %v3957_v60  ;;  %3960 = vrcp.f32 %v1804_v3 }
 0x1a0   :  { %v1807_v46 = vadd.f32 1.0, %v3959_v42  ;;  %3962 = vrcp.f32 %v1806_v36 }
 0x1a1   :  { %3964 = vrcp.f32 %v1805_v18 }
 0x1a2   :  { %3966 = vrcp.f32 %v1807_v46 }
 0x1a9   :  { %v3961_v19 = vpop.eup %3960 }
 0x1aa   :  { %v3963_v25 = vpop.eup %3962 }
 0x1ab   :  { %v3965_v52 = vpop.eup %3964  ;;  %v1830_v50 = vmul.f32 0.0, %v3963_v25  ;;  %v6645_v25 = vld [vmem:[#allocation94_spill] sm:$0xff] }
 0x1ac   :  { %v3967_v58 = vpop.eup %3966 }
 0x1ad   :  { %v1831_v60 = vmul.f32 0.0, %v3967_v58  ;;  %v6647_v58 = vld [vmem:[#allocation96_spill] sm:$0xff] }
 0x1cd   :  { %v1736_v54 = vpop.f32.mrb[36].mxu0  ;;  %v1777_v2 = vpop.f32.mrb[36].mxu1 }
 0x1ce   :  { %v1788_v62 = vadd.f32 %v1736_v54, %v741_v56  ;;  %v1738_v10 = vpop.f32.mrb[37].mxu0  ;;  %v1790_v26 = vadd.f32 %v1777_v2, %v814_v1  ;;  %v1779_v53 = vpop.f32.mrb[37].mxu1 }
 0x1cf   :  { %v1789_v7 = vadd.f32 %v1738_v10, %v743_v55  ;;  %v1740_v34 = vpop.f32.mrb[38].mxu0  ;;  %v1791_v59 = vadd.f32 %v1779_v53, %v816_v61  ;;  %v1781_v35 = vpop.f32.mrb[38].mxu1  ;;  %v6636_v53 = vld [vmem:[#allocation85_spill] sm:$0xff] }
 0x1d0   :  { %3968 = vtanh.f32 %v1788_v62  ;;  %v1741_v20 = vpop.f32.mrb[39].mxu0  ;;  %v3814_v12 = vmul.f32 -1.442695, %v1790_v26  ;;  %v1782_v9 = vpop.f32.mrb[39].mxu1  ;;  %v6637_v34 = vld [vmem:[#allocation86_spill] sm:$0xff]  ;;  %v6639_v35 = vld [vmem:[#allocation88_spill] sm:$0xff] }
 0x1d1   :  { %3970 = vtanh.f32 %v1789_v7  ;;  %v3815_v63 = vmul.f32 -1.442695, %v1791_v59  ;;  %v6638_v59 = vld [vmem:[#allocation87_spill] sm:$0xff]  ;;  %v6640_v20 = vld [vmem:[#allocation89_spill] sm:$0xff] }
 0x1d2   :  { %3972 = vpow2.f32 %v3814_v12  ;;  %v6641_v12 = vld [vmem:[#allocation90_spill] sm:$0xff]  ;;  %v6642_v9 = vld [vmem:[#allocation91_spill] sm:$0xff] }
 0x1d3   :  { %3974 = vpow2.f32 %v3815_v63  ;;  %v6643_v63 = vld [vmem:[#allocation92_spill] sm:$0xff] }
 0x1da   :  { %v3969_v27 = vpop.eup %3968 }
 0x1db   :  { %v3971_v57 = vpop.eup %3970  ;;  %v1832_v51 = vmul.f32 %v3969_v27, %v3961_v19  ;;  %v6644_v19 = vld [vmem:[#allocation93_spill] sm:$0xff] }
 0x1dc   :  { %v1833_v42 = vmul.f32 %v3971_v57, %v3965_v52  ;;  %v3973_v3 = vpop.eup %3972  ;;  %v6646_v52 = vld [vmem:[#allocation95_spill] sm:$0xff]  ;;  %v6648_v27 = vld [vmem:[#allocation97_spill] sm:$0xff]  ;;  %v6649_v57 = vld [vmem:[#allocation98_spill] sm:$0xff] }
 0x1dd   :  { %v5125_v36 = vadd.f32 %v1832_v51, %v1830_v50  ;;  %v3975_v18 = vpop.eup %3974  ;;  %v1824_v46 = vadd.f32 1.0, %v3973_v3  ;;  %v6650_v50 = vld [vmem:[#allocation99_spill] sm:$0xff]  ;;  %v6651_v51 = vld [vmem:[#allocation100_spill] sm:$0xff] }
 0x1de   :  { %v5127_v56 = vadd.f32 %v1833_v42, %v1831_v60  ;;  %v1825_v1 = vadd.f32 1.0, %v3975_v18  ;;  %v6652_v60 = vld [vmem:[#allocation101_spill] sm:$0xff]  ;;  %v6653_v42 = vld [vmem:[#allocation102_spill] sm:$0xff]  ;;  %v6654_v3 = vld [vmem:[#allocation103_spill] sm:$0xff] }
 0x1df   :  { %3976 = vtanh.f32 %v5125_v36  ;;  %v6655_v18 = vld [vmem:[#allocation104_spill] sm:$0xff] }
 0x1e0   :  { %3978 = vrcp.f32 %v1824_v46  ;;  %v6656_v46 = vld [vmem:[#allocation105_spill] sm:$0xff] }
 0x1e1   :  { %3980 = vtanh.f32 %v5127_v56 }
 0x1e2   :  { %3982 = vrcp.f32 %v1825_v1  ;;  %v6657_v1 = vld [vmem:[#allocation106_spill] sm:$0xff] }
 0x1e9   :  { %v3977_v55 = vpop.eup %3976 }
 0x1ea   :  { %v3979_v54 = vpop.eup %3978 }
 0x1eb   :  { %v3981_v61 = vpop.eup %3980  ;;  %v1838_v2 = vmul.f32 %v3979_v54, %v3977_v55  ;;  %v6658_v55 = vld [vmem:[#allocation107_spill] sm:$0xff]  ;;  %v6659_v54 = vld [vmem:[#allocation108_spill] sm:$0xff] }
 0x1ec   :  { %v3983_v62 = vpop.eup %3982 }
 0x1ed   :  { %v1839_v10 = vmul.f32 %v3983_v62, %v3981_v61  ;;  %v5131_v7 = vpack.c.bf16 %v1838_v2, %v1838_v2  ;;  %v6660_v61 = vld [vmem:[#allocation109_spill] sm:$0xff]  ;;  %v6661_v62 = vld [vmem:[#allocation110_spill] sm:$0xff]  ;;  %v6662_v2 = vld [vmem:[#allocation111_spill] sm:$0xff] }
 0x1ef   :  { %v1841_v26 = vpack.c.bf16 %v1839_v10, %v1839_v10  ;;  %v6663_v10 = vld [vmem:[#allocation112_spill] sm:$0xff] }
 0x1f1   :  { %1874 = vmatprep.mubr.bf16.mxu0 %v1841_v26  ;;  %1915 = vmatprep.mubr.bf16.mxu1 %v1841_v26 }
 0x1f2   :  { %1875 = vmatmul.mubr.bf16.vlgmr.msra.gmra.mrb[40].mxu0 %v5131_v7  ;;  %1916 = vmatmul.mubr.bf16.vlgmr.msra.gmra.mrb[40].mxu1 %v5131_v7 }
 0x1f3   :  { %1925 = vmatpush1.bf16.msra.mxu0 %v6636_v53  ;;  %1966 = vmatpush1.bf16.msra.mxu1 %v6637_v34 }
 0x1f4   :  { %1956 = vmatprep.mubr.bf16.mxu0 %v1841_v26  ;;  %1997 = vmatprep.mubr.bf16.mxu1 %v1841_v26  ;;  %v6664_v26 = vld [vmem:[#allocation113_spill] sm:$0xff] }
 0x1f5   :  { %1926 = vmatprep.subr.bf16.mxu0 %v6638_v59  ;;  %1967 = vmatprep.subr.bf16.mxu1 %v6639_v35 }
 0x1f7   :  { %1927 = vmatpush1.bf16.msra.mxu0 %v6640_v20  ;;  %1968 = vmatpush1.bf16.msra.mxu1 %v6641_v12 }
 0x1f8   :  { %1928 = vmatprep.subr.bf16.mxu0 %v6642_v9  ;;  %1969 = vmatprep.subr.bf16.mxu1 %v6643_v63 }
 0x1fb   :  { %1929 = vmatpush1.bf16.msra.mxu0 %v6644_v19  ;;  %1970 = vmatpush1.bf16.msra.mxu1 %v6645_v25 }
 0x1fc   :  { %1930 = vmatprep.subr.bf16.mxu0 %v6646_v52  ;;  %1971 = vmatprep.subr.bf16.mxu1 %v6647_v58 }
 0x1ff   :  { %1931 = vmatpush1.bf16.msra.mxu0 %v6648_v27  ;;  %1972 = vmatpush1.bf16.msra.mxu1 %v6649_v57 }
 0x200   :  { %1932 = vmatprep.subr.bf16.mxu0 %v6650_v50  ;;  %1973 = vmatprep.subr.bf16.mxu1 %v6651_v51 }
 0x203   :  { %1933 = vmatpush1.bf16.msra.mxu0 %v6652_v60  ;;  %1974 = vmatpush1.bf16.msra.mxu1 %v6653_v42 }
 0x204   :  { %1934 = vmatprep.subr.bf16.mxu0 %v6654_v3  ;;  %1975 = vmatprep.subr.bf16.mxu1 %v6655_v18  ;;  %v6665_v3 = vld [vmem:[#allocation114_spill] sm:$0xff]  ;;  %v6666_v18 = vld [vmem:[#allocation115_spill] sm:$0xff] }
 0x207   :  { %1935 = vmatpush1.bf16.msra.mxu0 %v6656_v46  ;;  %1976 = vmatpush1.bf16.msra.mxu1 %v6657_v1  ;;  %v6667_v46 = vld [vmem:[#allocation116_spill] sm:$0xff]  ;;  %v6668_v1 = vld [vmem:[#allocation117_spill] sm:$0xff] }
 0x208   :  { %1936 = vmatprep.subr.bf16.mxu0 %v6658_v55  ;;  %1977 = vmatprep.subr.bf16.mxu1 %v6659_v54  ;;  %v6669_v55 = vld [vmem:[#allocation118_spill] sm:$0xff]  ;;  %v6670_v54 = vld [vmem:[#allocation119_spill] sm:$0xff] }
 0x20b   :  { %1937 = vmatpush1.bf16.msra.mxu0 %v6660_v61  ;;  %1978 = vmatpush1.bf16.msra.mxu1 %v6661_v62  ;;  %v6671_v61 = vld [vmem:[#allocation120_spill] sm:$0xff]  ;;  %v6672_v62 = vld [vmem:[#allocation121_spill] sm:$0xff] }
 0x20c   :  { %1938 = vmatprep.subr.bf16.mxu0 %v6662_v2  ;;  %1979 = vmatprep.subr.bf16.mxu1 %v6663_v10  ;;  %v6673_v2 = vld [vmem:[#allocation122_spill] sm:$0xff]  ;;  %v6674_v10 = vld [vmem:[#allocation123_spill] sm:$0xff] }
 0x20f   :  { %1939 = vmatpush1.bf16.msra.mxu0 %v6664_v26  ;;  %1980 = vmatpush1.bf16.msra.mxu1 %v6665_v3  ;;  %v6675_v26 = vld [vmem:[#allocation124_spill] sm:$0xff]  ;;  %v6676_v3 = vld [vmem:[#allocation125_spill] sm:$0xff] }
 0x210   :  { %1940 = vmatprep.subr.bf16.mxu0 %v6666_v18  ;;  %1981 = vmatprep.subr.bf16.mxu1 %v6667_v46  ;;  %v6677_v18 = vld [vmem:[#allocation126_spill] sm:$0xff]  ;;  %v6678_v46 = vld [vmem:[#allocation127_spill] sm:$0xff] }
 0x213   :  { %1941 = vmatpush1.bf16.msra.mxu0 %v6668_v1  ;;  %1982 = vmatpush1.bf16.msra.mxu1 %v6669_v55  ;;  %v6679_v1 = vld [vmem:[#allocation128_spill] sm:$0xff]  ;;  %v6680_v55 = vld [vmem:[#allocation129_spill] sm:$0xff] }
 0x214   :  { %1942 = vmatprep.subr.bf16.mxu0 %v6670_v54  ;;  %1983 = vmatprep.subr.bf16.mxu1 %v6671_v61  ;;  %v6681_v54 = vld [vmem:[#allocation130_spill] sm:$0xff]  ;;  %v6682_v61 = vld [vmem:[#allocation131_spill] sm:$0xff] }
 0x217   :  { %1943 = vmatpush1.bf16.msra.mxu0 %v6672_v62  ;;  %1984 = vmatpush1.bf16.msra.mxu1 %v6673_v2  ;;  %v6683_v62 = vld [vmem:[#allocation132_spill] sm:$0xff] }
 0x218   :  { %1944 = vmatprep.subr.bf16.mxu0 %v6674_v10  ;;  %1985 = vmatprep.subr.bf16.mxu1 %v6675_v26 }
 0x21b   :  { %1945 = vmatpush1.bf16.msra.mxu0 %v6676_v3  ;;  %1986 = vmatpush1.bf16.msra.mxu1 %v6677_v18  ;;  %v6684_v3 = vld [vmem:[#allocation136_spill] sm:$0xff] }
 0x21c   :  { %1946 = vmatprep.subr.bf16.mxu0 %v6678_v46  ;;  %1987 = vmatprep.subr.bf16.mxu1 %v6679_v1 }
 0x21f   :  { %1947 = vmatpush1.bf16.msra.mxu0 %v6680_v55  ;;  %1988 = vmatpush1.bf16.msra.mxu1 %v6681_v54 }
 0x220   :  { %1948 = vmatprep.subr.bf16.mxu0 %v6682_v61  ;;  %1989 = vmatprep.subr.bf16.mxu1 %v6683_v62 }
 0x223   :  { %1949 = vmatpush1.bf16.msra.mxu0 %v4763_v11  ;;  %1990 = vmatpush1.bf16.msra.mxu1 %v4767_v13 }
 0x224   :  { %1950 = vmatprep.subr.bf16.mxu0 %v4769_v14  ;;  %1991 = vmatprep.subr.bf16.mxu1 %v6684_v3 }
 0x227   :  { %1951 = vmatpush1.bf16.msra.mxu0 %v4775_v41  ;;  %1992 = vmatpush1.bf16.msra.mxu1 %v4779_v44 }
 0x228   :  { %1952 = vmatprep.subr.bf16.mxu0 %v4781_v43  ;;  %1993 = vmatprep.subr.bf16.mxu1 %v4784_v0 }
 0x22b   :  { %1953 = vmatpush1.bf16.msra.mxu0 %v4787_v8  ;;  %1994 = vmatpush1.bf16.msra.mxu1 %v4791_v6 }
 0x22c   :  { %1954 = vmatprep.subr.bf16.mxu0 %v4793_v5  ;;  %1995 = vmatprep.subr.bf16.mxu1 %v4796_v28 }
 0x22f   :  { %1955 = vmatpush1.bf16.msra.mxu0 %v4799_v17  ;;  %1996 = vmatpush1.bf16.msra.mxu1 %v4803_v4 }
 0x230   :  { %2064 = vmatprep.subr.bf16.mxu0 %v4402_v15  ;;  %2105 = vmatprep.subr.bf16.mxu1 %v4405_v16 }
 0x232   :  { %1957 = vmatmul.mubr.bf16.vlgmr.msra.gmra.mrb[44].mxu0 %v5131_v7  ;;  %1998 = vmatmul.mubr.bf16.vlgmr.msra.gmra.mrb[44].mxu1 %v5131_v7  ;;  %v6685_v7 = vld [vmem:[#allocation38_spill] sm:$0xff] }
 0x233   :  { %2065 = vmatpush1.bf16.msra.mxu0 %v4408_v21  ;;  %2106 = vmatpush1.bf16.msra.mxu1 %v4411_v22 }
 0x234   :  { %2066 = vmatprep.subr.bf16.mxu0 %v4413_v23  ;;  %2107 = vmatprep.subr.bf16.mxu1 %v4416_v24  ;;  %v6734_v24 = vld [vmem:[#allocation150_spill] sm:$0xff]  ;;  %v6735_v23 = vld [vmem:[#allocation151_spill] sm:$0xff] }
 0x237   :  { %2067 = vmatpush1.bf16.msra.mxu0 %v4421_v30  ;;  %2108 = vmatpush1.bf16.msra.mxu1 %v4425_v31  ;;  %v6733_v31 = vld [vmem:[#allocation149_spill] sm:$0xff] }
 0x238   :  { %2068 = vmatprep.subr.bf16.mxu0 %v4427_v32  ;;  %2109 = vmatprep.subr.bf16.mxu1 %v4430_v33  ;;  %v6686_v33 = vld [vmem:[#allocation39_spill] sm:$0xff]  ;;  %v6732_v32 = vld [vmem:[#allocation148_spill] sm:$0xff] }
 0x23b   :  { %2069 = vmatpush1.bf16.msra.mxu0 %v4435_v37  ;;  %2110 = vmatpush1.bf16.msra.mxu1 %v4439_v38  ;;  %v6687_v37 = vld [vmem:[#allocation40_spill] sm:$0xff]  ;;  %v6688_v38 = vld [vmem:[#allocation41_spill] sm:$0xff] }
 0x23c   :  { %2070 = vmatprep.subr.bf16.mxu0 %v4441_v39  ;;  %2111 = vmatprep.subr.bf16.mxu1 %v4444_v40  ;;  %v6689_v39 = vld [vmem:[#allocation42_spill] sm:$0xff]  ;;  %v6690_v40 = vld [vmem:[#allocation43_spill] sm:$0xff] }
 0x23f   :  { %2071 = vmatpush1.bf16.msra.mxu0 %v4448_v45  ;;  %2112 = vmatpush1.bf16.msra.mxu1 %v4453_v47  ;;  %v6691_v45 = vld [vmem:[#allocation44_spill] sm:$0xff]  ;;  %v6692_v47 = vld [vmem:[#allocation45_spill] sm:$0xff] }
 0x240   :  { %2072 = vmatprep.subr.bf16.mxu0 %v4455_v48  ;;  %2113 = vmatprep.subr.bf16.mxu1 %v4458_v49  ;;  %v6693_v48 = vld [vmem:[#allocation46_spill] sm:$0xff]  ;;  %v6694_v49 = vld [vmem:[#allocation47_spill] sm:$0xff] }
 0x243   :  { %2073 = vmatpush1.bf16.msra.mxu0 %v4463_v29  ;;  %2114 = vmatpush1.bf16.msra.mxu1 %v6685_v7  ;;  %v6695_v29 = vld [vmem:[#allocation48_spill] sm:$0xff]  ;;  %v6696_v7 = vld [vmem:[#allocation49_spill] sm:$0xff] }
 0x244   :  { %2074 = vmatprep.subr.bf16.mxu0 %v6686_v33  ;;  %2115 = vmatprep.subr.bf16.mxu1 %v6687_v37  ;;  %v6697_v33 = vld [vmem:[#allocation50_spill] sm:$0xff]  ;;  %v6698_v37 = vld [vmem:[#allocation51_spill] sm:$0xff] }
 0x247   :  { %2075 = vmatpush1.bf16.msra.mxu0 %v6688_v38  ;;  %2116 = vmatpush1.bf16.msra.mxu1 %v6689_v39  ;;  %v6699_v38 = vld [vmem:[#allocation52_spill] sm:$0xff]  ;;  %v6700_v39 = vld [vmem:[#allocation53_spill] sm:$0xff] }
 0x248   :  { %2076 = vmatprep.subr.bf16.mxu0 %v6690_v40  ;;  %2117 = vmatprep.subr.bf16.mxu1 %v6691_v45  ;;  %v6701_v40 = vld [vmem:[#allocation54_spill] sm:$0xff]  ;;  %v6702_v45 = vld [vmem:[#allocation55_spill] sm:$0xff] }
 0x24b   :  { %2077 = vmatpush1.bf16.msra.mxu0 %v6692_v47  ;;  %2118 = vmatpush1.bf16.msra.mxu1 %v6693_v48  ;;  %v6703_v47 = vld [vmem:[#allocation56_spill] sm:$0xff]  ;;  %v6704_v48 = vld [vmem:[#allocation57_spill] sm:$0xff] }
 0x24c   :  { %2078 = vmatprep.subr.bf16.mxu0 %v6694_v49  ;;  %2119 = vmatprep.subr.bf16.mxu1 %v6695_v29  ;;  %v6705_v49 = vld [vmem:[#allocation58_spill] sm:$0xff]  ;;  %v6706_v29 = vld [vmem:[#allocation59_spill] sm:$0xff] }
 0x24f   :  { %2079 = vmatpush1.bf16.msra.mxu0 %v6696_v7  ;;  %2120 = vmatpush1.bf16.msra.mxu1 %v6697_v33  ;;  %v6707_v7 = vld [vmem:[#allocation60_spill] sm:$0xff]  ;;  %v6708_v33 = vld [vmem:[#allocation61_spill] sm:$0xff] }
 0x250   :  { %2080 = vmatprep.subr.bf16.mxu0 %v6698_v37  ;;  %2121 = vmatprep.subr.bf16.mxu1 %v6699_v38  ;;  %v6709_v37 = vld [vmem:[#allocation62_spill] sm:$0xff]  ;;  %v6710_v38 = vld [vmem:[#allocation63_spill] sm:$0xff] }
 0x253   :  { %2081 = vmatpush1.bf16.msra.mxu0 %v6700_v39  ;;  %2122 = vmatpush1.bf16.msra.mxu1 %v6701_v40  ;;  %v6711_v39 = vld [vmem:[#allocation64_spill] sm:$0xff]  ;;  %v6712_v40 = vld [vmem:[#allocation65_spill] sm:$0xff] }
 0x254   :  { %2082 = vmatprep.subr.bf16.mxu0 %v6702_v45  ;;  %2123 = vmatprep.subr.bf16.mxu1 %v6703_v47  ;;  %v6713_v45 = vld [vmem:[#allocation66_spill] sm:$0xff]  ;;  %v6714_v47 = vld [vmem:[#allocation67_spill] sm:$0xff] }
 0x257   :  { %2083 = vmatpush1.bf16.msra.mxu0 %v6704_v48  ;;  %2124 = vmatpush1.bf16.msra.mxu1 %v6705_v49  ;;  %v6715_v48 = vld [vmem:[#allocation68_spill] sm:$0xff]  ;;  %v6716_v49 = vld [vmem:[#allocation69_spill] sm:$0xff] }
 0x258   :  { %2084 = vmatprep.subr.bf16.mxu0 %v6706_v29  ;;  %2125 = vmatprep.subr.bf16.mxu1 %v6707_v7  ;;  %v6717_v29 = vld [vmem:[#allocation70_spill] sm:$0xff]  ;;  %v6718_v7 = vld [vmem:[#allocation71_spill] sm:$0xff] }
 0x25b   :  { %2085 = vmatpush1.bf16.msra.mxu0 %v6708_v33  ;;  %2126 = vmatpush1.bf16.msra.mxu1 %v6709_v37  ;;  %v6719_v33 = vld [vmem:[#allocation72_spill] sm:$0xff]  ;;  %v6720_v37 = vld [vmem:[#allocation73_spill] sm:$0xff] }
 0x25c   :  { %2086 = vmatprep.subr.bf16.mxu0 %v6710_v38  ;;  %2127 = vmatprep.subr.bf16.mxu1 %v6711_v39  ;;  %v6721_v38 = vld [vmem:[#allocation74_spill] sm:$0xff]  ;;  %v6722_v39 = vld [vmem:[#allocation75_spill] sm:$0xff] }
 0x25f   :  { %2087 = vmatpush1.bf16.msra.mxu0 %v6712_v40  ;;  %2128 = vmatpush1.bf16.msra.mxu1 %v6713_v45  ;;  %v6723_v40 = vld [vmem:[#allocation76_spill] sm:$0xff]  ;;  %v6724_v45 = vld [vmem:[#allocation77_spill] sm:$0xff] }
 0x260   :  { %2088 = vmatprep.subr.bf16.mxu0 %v6714_v47  ;;  %2129 = vmatprep.subr.bf16.mxu1 %v6715_v48  ;;  %v6725_v47 = vld [vmem:[#allocation78_spill] sm:$0xff]  ;;  %v6726_v48 = vld [vmem:[#allocation79_spill] sm:$0xff] }
 0x263   :  { %2089 = vmatpush1.bf16.msra.mxu0 %v6716_v49  ;;  %2130 = vmatpush1.bf16.msra.mxu1 %v6717_v29  ;;  %v6727_v49 = vld [vmem:[#allocation80_spill] sm:$0xff]  ;;  %v6728_v29 = vld [vmem:[#allocation81_spill] sm:$0xff] }
 0x264   :  { %2090 = vmatprep.subr.bf16.mxu0 %v6718_v7  ;;  %2131 = vmatprep.subr.bf16.mxu1 %v6719_v33  ;;  %v6729_v7 = vld [vmem:[#allocation82_spill] sm:$0xff]  ;;  %v6730_v33 = vld [vmem:[#allocation83_spill] sm:$0xff] }
 0x267   :  { %2091 = vmatpush1.bf16.msra.mxu0 %v6720_v37  ;;  %2132 = vmatpush1.bf16.msra.mxu1 %v6721_v38  ;;  %v6731_v37 = vld [vmem:[#allocation84_spill] sm:$0xff] }
 0x268   :  { %2092 = vmatprep.subr.bf16.mxu0 %v6722_v39  ;;  %2133 = vmatprep.subr.bf16.mxu1 %v6723_v40 }
 0x26b   :  { %2093 = vmatpush1.bf16.msra.mxu0 %v6724_v45  ;;  %2134 = vmatpush1.bf16.msra.mxu1 %v6725_v47 }
 0x26c   :  { %2094 = vmatprep.subr.bf16.mxu0 %v6726_v48  ;;  %2135 = vmatprep.subr.bf16.mxu1 %v6727_v49 }
 0x26f   :  { %2095 = vmatpush1.bf16.msra.mxu0 %v6728_v29  ;;  %2136 = vmatpush1.bf16.msra.mxu1 %v6729_v7 }
 0x270   :  { %2146 = vmatprep.subr.bf16.mxu0 %v6730_v33  ;;  %2187 = vmatprep.subr.bf16.mxu1 %v6731_v37 }
 0x2c5   :  { %v1876_v38 = vpop.f32.mrb[40].mxu0  ;;  %v1917_v39 = vpop.f32.mrb[40].mxu1 }
 0x2c6   :  { %v2006_v40 = vadd.f32 %v1876_v38, %v6732_v32  ;;  %v2008_v45 = vadd.f32 %v1917_v39, %v6733_v31  ;;  %v1878_v30 = vpop.f32.mrb[41].mxu0  ;;  %v1919_v47 = vpop.f32.mrb[41].mxu1 }
 0x2c7   :  { %v2007_v48 = vadd.f32 %v1878_v30, %v6734_v24  ;;  %v2009_v49 = vadd.f32 %v1919_v47, %v6735_v23  ;;  %v1880_v22 = vpop.f32.mrb[42].mxu0  ;;  %v1921_v29 = vpop.f32.mrb[42].mxu1  ;;  %v6737_v47 = vld [vmem:[#allocation177_spill] sm:$0xff] }
 0x2c8   :  { %v1881_v21 = vpop.f32.mrb[43].mxu0  ;;  %v1922_v7 = vpop.f32.mrb[43].mxu1  ;;  %v3816_v16 = vmul.f32 -1.442695, %v2006_v40  ;;  %v3818_v33 = vmul.f32 -1.442695, %v2008_v45 }
 0x2c9   :  { %v3817_v15 = vmul.f32 -1.442695, %v2007_v48  ;;  %v3819_v37 = vmul.f32 -1.442695, %v2009_v49  ;;  %v6736_v40 = vld [vmem:[#allocation176_spill] sm:$0xff]  ;;  %v6739_v49 = vld [vmem:[#allocation179_spill] sm:$0xff] }
 0x2ca   :  { %3984 = vpow2.f32 %v3816_v16 }
 0x2cb   :  { %3986 = vpow2.f32 %v3818_v33 }
 0x2cc   :  { %3988 = vpow2.f32 %v3817_v15 }
 0x2cd   :  { %3990 = vpow2.f32 %v3819_v37  ;;  %v6738_v37 = vld [vmem:[#allocation178_spill] sm:$0xff] }
 0x2d4   :  { %v3985_v32 = vpop.eup %3984 }
 0x2d5   :  { %v3987_v31 = vpop.eup %3986  ;;  %v2026_v4 = vadd.f32 1.0, %v3985_v32 }
 0x2d6   :  { %v3989_v38 = vpop.eup %3988  ;;  %v2028_v24 = vadd.f32 1.0, %v3987_v31 }
 0x2d7   :  { %v3991_v39 = vpop.eup %3990  ;;  %v2027_v30 = vadd.f32 1.0, %v3989_v38  ;;  %3992 = vrcp.f32 %v2026_v4 }
 0x2d8   :  { %v2029_v23 = vadd.f32 1.0, %v3991_v39  ;;  %3994 = vrcp.f32 %v2028_v24 }
 0x2d9   :  { %3996 = vrcp.f32 %v2027_v30 }
 0x2da   :  { %3998 = vrcp.f32 %v2029_v23 }
 0x2e1   :  { %v3993_v24 = vpop.eup %3992 }
 0x2e2   :  { %v3995_v30 = vpop.eup %3994 }
 0x305   :  { %v1958_v21 = vpop.f32.mrb[44].mxu0  ;;  %v1999_v22 = vpop.f32.mrb[44].mxu1 }
 0x306   :  { %v2010_v45 = vadd.f32 %v1958_v21, %v6736_v40  ;;  %v2012_v16 = vadd.f32 %v1999_v22, %v6737_v47  ;;  %v1960_v33 = vpop.f32.mrb[45].mxu0  ;;  %v2001_v15 = vpop.f32.mrb[45].mxu1  ;;  %v2052_v47 = vmul.f32 %v3995_v30, %v5125_v36  ;;  %v6740_v30 = vld [vmem:[#allocation103_spill] sm:$0xff] }
 0x307   :  { %v2011_v48 = vadd.f32 %v1960_v33, %v6738_v37  ;;  %v2013_v29 = vadd.f32 %v2001_v15, %v6739_v49  ;;  %v1962_v7 = vpop.f32.mrb[46].mxu0  ;;  %v2003_v32 = vpop.f32.mrb[46].mxu1 }
 0x308   :  { %4000 = vtanh.f32 %v2010_v45  ;;  %v3820_v31 = vmul.f32 -1.442695, %v2012_v16  ;;  %v1963_v4 = vpop.f32.mrb[47].mxu0  ;;  %v2004_v38 = vpop.f32.mrb[47].mxu1 }
 0x309   :  { %4002 = vtanh.f32 %v2011_v48  ;;  %v3821_v39 = vmul.f32 -1.442695, %v2013_v29  ;;  %v3997_v21 = vpop.eup %3996 }
 0x30a   :  { %4004 = vpow2.f32 %v3820_v31  ;;  %v3999_v22 = vpop.eup %3998 }
 0x30b   :  { %4006 = vpow2.f32 %v3821_v39  ;;  %v2053_v37 = vmul.f32 %v3999_v22, %v5127_v56  ;;  %v6742_v22 = vld [vmem:[#allocation105_spill] sm:$0xff] }
 0x312   :  { %v4001_v40 = vpop.eup %4000 }
 0x313   :  { %v4003_v23 = vpop.eup %4002  ;;  %v2054_v33 = vmul.f32 %v4001_v40, %v3993_v24  ;;  %v6743_v40 = vld [vmem:[#allocation106_spill] sm:$0xff] }
 0x314   :  { %v4005_v15 = vpop.eup %4004  ;;  %v2055_v45 = vmul.f32 %v4003_v23, %v3997_v21  ;;  %v6741_v21 = vld [vmem:[#allocation104_spill] sm:$0xff]  ;;  %v6744_v23 = vld [vmem:[#allocation107_spill] sm:$0xff] }
 0x315   :  { %v4007_v16 = vpop.eup %4006  ;;  %v5275_v49 = vadd.f32 %v2054_v33, %v2052_v47  ;;  %v2046_v48 = vadd.f32 1.0, %v4005_v15  ;;  %v6745_v47 = vld [vmem:[#allocation108_spill] sm:$0xff]  ;;  %v6746_v33 = vld [vmem:[#allocation109_spill] sm:$0xff]  ;;  %v6747_v15 = vld [vmem:[#allocation110_spill] sm:$0xff] }
 0x316   :  { %v5277_v29 = vadd.f32 %v2055_v45, %v2053_v37  ;;  %v2047_v7 = vadd.f32 1.0, %v4007_v16  ;;  %v6748_v37 = vld [vmem:[#allocation111_spill] sm:$0xff]  ;;  %v6749_v45 = vld [vmem:[#allocation112_spill] sm:$0xff]  ;;  %v6750_v16 = vld [vmem:[#allocation113_spill] sm:$0xff] }
 0x317   :  { %4008 = vtanh.f32 %v5275_v49 }
 0x318   :  { %4010 = vrcp.f32 %v2046_v48  ;;  %v6751_v48 = vld [vmem:[#allocation114_spill] sm:$0xff] }
 0x319   :  { %4012 = vtanh.f32 %v5277_v29 }
 0x31a   :  { %4014 = vrcp.f32 %v2047_v7  ;;  %v6752_v7 = vld [vmem:[#allocation115_spill] sm:$0xff] }
 0x321   :  { %v4009_v32 = vpop.eup %4008 }
 0x322   :  { %v4011_v36 = vpop.eup %4010 }
 0x323   :  { %v4013_v31 = vpop.eup %4012  ;;  %v2060_v38 = vmul.f32 %v4011_v36, %v4009_v32  ;;  %v6753_v32 = vld [vmem:[#allocation116_spill] sm:$0xff]  ;;  %v6754_v36 = vld [vmem:[#allocation117_spill] sm:$0xff] }
 0x324   :  { %v4015_v4 = vpop.eup %4014 }
 0x325   :  { %v2061_v56 = vmul.f32 %v4015_v4, %v4013_v31  ;;  %v5281_v24 = vpack.c.bf16 %v2060_v38, %v2060_v38  ;;  %v6755_v31 = vld [vmem:[#allocation118_spill] sm:$0xff]  ;;  %v6756_v4 = vld [vmem:[#allocation119_spill] sm:$0xff]  ;;  %v6757_v38 = vld [vmem:[#allocation120_spill] sm:$0xff] }
 0x327   :  { %v2063_v39 = vpack.c.bf16 %v2061_v56, %v2061_v56  ;;  %v6758_v56 = vld [vmem:[#allocation121_spill] sm:$0xff] }
 0x329   :  { %2096 = vmatprep.mubr.bf16.mxu0 %v2063_v39  ;;  %2137 = vmatprep.mubr.bf16.mxu1 %v2063_v39 }
 0x32a   :  { %2097 = vmatmul.mubr.bf16.vlgmr.msra.gmra.mrb[48].mxu0 %v5281_v24  ;;  %2138 = vmatmul.mubr.bf16.vlgmr.msra.gmra.mrb[48].mxu1 %v5281_v24 }
 0x32b   :  { %2147 = vmatpush1.bf16.msra.mxu0 %v6636_v53  ;;  %2188 = vmatpush1.bf16.msra.mxu1 %v6637_v34 }
 0x32c   :  { %2178 = vmatprep.mubr.bf16.mxu0 %v2063_v39  ;;  %2219 = vmatprep.mubr.bf16.mxu1 %v2063_v39  ;;  %v6759_v39 = vld [vmem:[#allocation125_spill] sm:$0xff] }
 0x32d   :  { %2148 = vmatprep.subr.bf16.mxu0 %v6638_v59  ;;  %2189 = vmatprep.subr.bf16.mxu1 %v6639_v35 }
 0x32f   :  { %2149 = vmatpush1.bf16.msra.mxu0 %v6640_v20  ;;  %2190 = vmatpush1.bf16.msra.mxu1 %v6641_v12 }
 0x330   :  { %2150 = vmatprep.subr.bf16.mxu0 %v6642_v9  ;;  %2191 = vmatprep.subr.bf16.mxu1 %v6643_v63 }
 0x333   :  { %2151 = vmatpush1.bf16.msra.mxu0 %v6644_v19  ;;  %2192 = vmatpush1.bf16.msra.mxu1 %v6645_v25 }
 0x334   :  { %2152 = vmatprep.subr.bf16.mxu0 %v6646_v52  ;;  %2193 = vmatprep.subr.bf16.mxu1 %v6647_v58 }
 0x337   :  { %2153 = vmatpush1.bf16.msra.mxu0 %v6648_v27  ;;  %2194 = vmatpush1.bf16.msra.mxu1 %v6649_v57 }
 0x338   :  { %2154 = vmatprep.subr.bf16.mxu0 %v6650_v50  ;;  %2195 = vmatprep.subr.bf16.mxu1 %v6651_v51 }
 0x33b   :  { %2155 = vmatpush1.bf16.msra.mxu0 %v6652_v60  ;;  %2196 = vmatpush1.bf16.msra.mxu1 %v6653_v42 }
 0x33c   :  { %2156 = vmatprep.subr.bf16.mxu0 %v6740_v30  ;;  %2197 = vmatprep.subr.bf16.mxu1 %v6741_v21 }
 0x33f   :  { %2157 = vmatpush1.bf16.msra.mxu0 %v6742_v22  ;;  %2198 = vmatpush1.bf16.msra.mxu1 %v6743_v40 }
 0x340   :  { %2158 = vmatprep.subr.bf16.mxu0 %v6744_v23  ;;  %2199 = vmatprep.subr.bf16.mxu1 %v6745_v47 }
 0x343   :  { %2159 = vmatpush1.bf16.msra.mxu0 %v6746_v33  ;;  %2200 = vmatpush1.bf16.msra.mxu1 %v6747_v15 }
 0x344   :  { %2160 = vmatprep.subr.bf16.mxu0 %v6748_v37  ;;  %2201 = vmatprep.subr.bf16.mxu1 %v6749_v45 }
 0x347   :  { %2161 = vmatpush1.bf16.msra.mxu0 %v6750_v16  ;;  %2202 = vmatpush1.bf16.msra.mxu1 %v6751_v48 }
 0x348   :  { %2162 = vmatprep.subr.bf16.mxu0 %v6752_v7  ;;  %2203 = vmatprep.subr.bf16.mxu1 %v6753_v32 }
 0x34b   :  { %2163 = vmatpush1.bf16.msra.mxu0 %v6754_v36  ;;  %2204 = vmatpush1.bf16.msra.mxu1 %v6755_v31 }
 0x34c   :  { %2164 = vmatprep.subr.bf16.mxu0 %v6756_v4  ;;  %2205 = vmatprep.subr.bf16.mxu1 %v6757_v38 }
 0x34f   :  { %2165 = vmatpush1.bf16.msra.mxu0 %v6758_v56  ;;  %2206 = vmatpush1.bf16.msra.mxu1 %v6673_v2 }
 0x350   :  { %2166 = vmatprep.subr.bf16.mxu0 %v6674_v10  ;;  %2207 = vmatprep.subr.bf16.mxu1 %v6675_v26 }
 0x353   :  { %2167 = vmatpush1.bf16.msra.mxu0 %v6759_v39  ;;  %2208 = vmatpush1.bf16.msra.mxu1 %v6677_v18 }
 0x354   :  { %2168 = vmatprep.subr.bf16.mxu0 %v6678_v46  ;;  %2209 = vmatprep.subr.bf16.mxu1 %v6679_v1 }
 0x357   :  { %2169 = vmatpush1.bf16.msra.mxu0 %v6680_v55  ;;  %2210 = vmatpush1.bf16.msra.mxu1 %v6681_v54 }
 0x358   :  { %2170 = vmatprep.subr.bf16.mxu0 %v6682_v61  ;;  %2211 = vmatprep.subr.bf16.mxu1 %v6683_v62  ;;  %v6829_v62 = vld [vmem:[#allocation154_spill] sm:$0xff]  ;;  %v6830_v61 = vld [vmem:[#allocation155_spill] sm:$0xff] }
 0x35b   :  { %2171 = vmatpush1.bf16.msra.mxu0 %v4763_v11  ;;  %2212 = vmatpush1.bf16.msra.mxu1 %v4767_v13  ;;  %v6828_v13 = vld [vmem:[#allocation153_spill] sm:$0xff] }
 0x35c   :  { %2172 = vmatprep.subr.bf16.mxu0 %v4769_v14  ;;  %2213 = vmatprep.subr.bf16.mxu1 %v6684_v3  ;;  %v6760_v14 = vld [vmem:[#allocation146_spill] sm:$0xff]  ;;  %v6761_v3 = vld [vmem:[#allocation19_spill] sm:$0xff] }
 0x35f   :  { %2173 = vmatpush1.bf16.msra.mxu0 %v4775_v41  ;;  %2214 = vmatpush1.bf16.msra.mxu1 %v4779_v44  ;;  %v6762_v41 = vld [vmem:[#allocation20_spill] sm:$0xff] }
 0x360   :  { %2174 = vmatprep.subr.bf16.mxu0 %v4781_v43  ;;  %2215 = vmatprep.subr.bf16.mxu1 %v4784_v0  ;;  %v6763_v0 = vld [vmem:[#allocation21_spill] sm:$0xff]  ;;  %v6772_v43 = vld [vmem:[#allocation30_spill] sm:$0xff]  ;;  %v6827_v44 = vld [vmem:[#allocation152_spill] sm:$0xff] }
 0x363   :  { %2175 = vmatpush1.bf16.msra.mxu0 %v4787_v8  ;;  %2216 = vmatpush1.bf16.msra.mxu1 %v4791_v6  ;;  %v6764_v8 = vld [vmem:[#allocation22_spill] sm:$0xff]  ;;  %v6765_v6 = vld [vmem:[#allocation23_spill] sm:$0xff] }
 0x364   :  { %2176 = vmatprep.subr.bf16.mxu0 %v4793_v5  ;;  %2217 = vmatprep.subr.bf16.mxu1 %v4796_v28  ;;  %v6766_v5 = vld [vmem:[#allocation24_spill] sm:$0xff]  ;;  %v6767_v28 = vld [vmem:[#allocation25_spill] sm:$0xff] }
 0x367   :  { %2177 = vmatpush1.bf16.msra.mxu0 %v4799_v17  ;;  %2218 = vmatpush1.bf16.msra.mxu1 %v6760_v14  ;;  %v6768_v17 = vld [vmem:[#allocation26_spill] sm:$0xff]  ;;  %v6769_v14 = vld [vmem:[#allocation27_spill] sm:$0xff] }
 0x368   :  { %2286 = vmatprep.subr.bf16.mxu0 %v6761_v3  ;;  %2327 = vmatprep.subr.bf16.mxu1 %v6762_v41  ;;  %v6770_v3 = vld [vmem:[#allocation28_spill] sm:$0xff]  ;;  %v6771_v41 = vld [vmem:[#allocation29_spill] sm:$0xff] }
 0x36a   :  { %2179 = vmatmul.mubr.bf16.vlgmr.msra.gmra.mrb[52].mxu0 %v5281_v24  ;;  %2220 = vmatmul.mubr.bf16.vlgmr.msra.gmra.mrb[52].mxu1 %v5281_v24  ;;  %v6773_v24 = vld [vmem:[#allocation31_spill] sm:$0xff] }
 0x36b   :  { %2287 = vmatpush1.bf16.msra.mxu0 %v6763_v0  ;;  %2328 = vmatpush1.bf16.msra.mxu1 %v6764_v8  ;;  %v6774_v0 = vld [vmem:[#allocation32_spill] sm:$0xff]  ;;  %v6775_v8 = vld [vmem:[#allocation33_spill] sm:$0xff] }
 0x36c   :  { %2288 = vmatprep.subr.bf16.mxu0 %v6765_v6  ;;  %2329 = vmatprep.subr.bf16.mxu1 %v6766_v5  ;;  %v6776_v6 = vld [vmem:[#allocation34_spill] sm:$0xff]  ;;  %v6777_v5 = vld [vmem:[#allocation35_spill] sm:$0xff] }
 0x36f   :  { %2289 = vmatpush1.bf16.msra.mxu0 %v6767_v28  ;;  %2330 = vmatpush1.bf16.msra.mxu1 %v6768_v17  ;;  %v6778_v28 = vld [vmem:[#allocation36_spill] sm:$0xff]  ;;  %v6779_v17 = vld [vmem:[#allocation37_spill] sm:$0xff] }
 0x370   :  { %2290 = vmatprep.subr.bf16.mxu0 %v6769_v14  ;;  %2331 = vmatprep.subr.bf16.mxu1 %v6770_v3  ;;  %v6780_v14 = vld [vmem:[#allocation38_spill] sm:$0xff]  ;;  %v6781_v3 = vld [vmem:[#allocation39_spill] sm:$0xff] }
 0x373   :  { %2291 = vmatpush1.bf16.msra.mxu0 %v6771_v41  ;;  %2332 = vmatpush1.bf16.msra.mxu1 %v6772_v43  ;;  %v6782_v41 = vld [vmem:[#allocation40_spill] sm:$0xff]  ;;  %v6783_v43 = vld [vmem:[#allocation41_spill] sm:$0xff] }
 0x374   :  { %2292 = vmatprep.subr.bf16.mxu0 %v6773_v24  ;;  %2333 = vmatprep.subr.bf16.mxu1 %v6774_v0  ;;  %v6784_v24 = vld [vmem:[#allocation42_spill] sm:$0xff]  ;;  %v6785_v0 = vld [vmem:[#allocation43_spill] sm:$0xff] }
 0x377   :  { %2293 = vmatpush1.bf16.msra.mxu0 %v6775_v8  ;;  %2334 = vmatpush1.bf16.msra.mxu1 %v6776_v6  ;;  %v6786_v8 = vld [vmem:[#allocation44_spill] sm:$0xff]  ;;  %v6787_v6 = vld [vmem:[#allocation45_spill] sm:$0xff] }
 0x378   :  { %2294 = vmatprep.subr.bf16.mxu0 %v6777_v5  ;;  %2335 = vmatprep.subr.bf16.mxu1 %v6778_v28  ;;  %v6788_v5 = vld [vmem:[#allocation46_spill] sm:$0xff]  ;;  %v6789_v28 = vld [vmem:[#allocation47_spill] sm:$0xff] }
 0x37b   :  { %2295 = vmatpush1.bf16.msra.mxu0 %v6779_v17  ;;  %2336 = vmatpush1.bf16.msra.mxu1 %v6780_v14  ;;  %v6790_v17 = vld [vmem:[#allocation48_spill] sm:$0xff]  ;;  %v6791_v14 = vld [vmem:[#allocation49_spill] sm:$0xff] }
 0x37c   :  { %2296 = vmatprep.subr.bf16.mxu0 %v6781_v3  ;;  %2337 = vmatprep.subr.bf16.mxu1 %v6782_v41  ;;  %v6792_v3 = vld [vmem:[#allocation50_spill] sm:$0xff]  ;;  %v6793_v41 = vld [vmem:[#allocation51_spill] sm:$0xff] }
 0x37f   :  { %2297 = vmatpush1.bf16.msra.mxu0 %v6783_v43  ;;  %2338 = vmatpush1.bf16.msra.mxu1 %v6784_v24  ;;  %v6794_v43 = vld [vmem:[#allocation52_spill] sm:$0xff]  ;;  %v6795_v24 = vld [vmem:[#allocation53_spill] sm:$0xff] }
 0x380   :  { %2298 = vmatprep.subr.bf16.mxu0 %v6785_v0  ;;  %2339 = vmatprep.subr.bf16.mxu1 %v6786_v8  ;;  %v6796_v0 = vld [vmem:[#allocation54_spill] sm:$0xff]  ;;  %v6797_v8 = vld [vmem:[#allocation55_spill] sm:$0xff] }
 0x383   :  { %2299 = vmatpush1.bf16.msra.mxu0 %v6787_v6  ;;  %2340 = vmatpush1.bf16.msra.mxu1 %v6788_v5  ;;  %v6798_v6 = vld [vmem:[#allocation56_spill] sm:$0xff]  ;;  %v6799_v5 = vld [vmem:[#allocation57_spill] sm:$0xff] }
 0x384   :  { %2300 = vmatprep.subr.bf16.mxu0 %v6789_v28  ;;  %2341 = vmatprep.subr.bf16.mxu1 %v6790_v17  ;;  %v6800_v28 = vld [vmem:[#allocation58_spill] sm:$0xff]  ;;  %v6801_v17 = vld [vmem:[#allocation59_spill] sm:$0xff] }
 0x387   :  { %2301 = vmatpush1.bf16.msra.mxu0 %v6791_v14  ;;  %2342 = vmatpush1.bf16.msra.mxu1 %v6792_v3  ;;  %v6802_v14 = vld [vmem:[#allocation60_spill] sm:$0xff]  ;;  %v6803_v3 = vld [vmem:[#allocation61_spill] sm:$0xff] }
 0x388   :  { %2302 = vmatprep.subr.bf16.mxu0 %v6793_v41  ;;  %2343 = vmatprep.subr.bf16.mxu1 %v6794_v43  ;;  %v6804_v41 = vld [vmem:[#allocation62_spill] sm:$0xff]  ;;  %v6805_v43 = vld [vmem:[#allocation63_spill] sm:$0xff] }
 0x38b   :  { %2303 = vmatpush1.bf16.msra.mxu0 %v6795_v24  ;;  %2344 = vmatpush1.bf16.msra.mxu1 %v6796_v0  ;;  %v6806_v24 = vld [vmem:[#allocation64_spill] sm:$0xff]  ;;  %v6807_v0 = vld [vmem:[#allocation65_spill] sm:$0xff] }
 0x38c   :  { %2304 = vmatprep.subr.bf16.mxu0 %v6797_v8  ;;  %2345 = vmatprep.subr.bf16.mxu1 %v6798_v6  ;;  %v6808_v8 = vld [vmem:[#allocation66_spill] sm:$0xff]  ;;  %v6809_v6 = vld [vmem:[#allocation67_spill] sm:$0xff] }
 0x38f   :  { %2305 = vmatpush1.bf16.msra.mxu0 %v6799_v5  ;;  %2346 = vmatpush1.bf16.msra.mxu1 %v6800_v28  ;;  %v6810_v5 = vld [vmem:[#allocation68_spill] sm:$0xff]  ;;  %v6811_v28 = vld [vmem:[#allocation69_spill] sm:$0xff] }
 0x390   :  { %2306 = vmatprep.subr.bf16.mxu0 %v6801_v17  ;;  %2347 = vmatprep.subr.bf16.mxu1 %v6802_v14  ;;  %v6812_v17 = vld [vmem:[#allocation70_spill] sm:$0xff]  ;;  %v6813_v14 = vld [vmem:[#allocation71_spill] sm:$0xff] }
 0x393   :  { %2307 = vmatpush1.bf16.msra.mxu0 %v6803_v3  ;;  %2348 = vmatpush1.bf16.msra.mxu1 %v6804_v41  ;;  %v6814_v3 = vld [vmem:[#allocation72_spill] sm:$0xff]  ;;  %v6815_v41 = vld [vmem:[#allocation73_spill] sm:$0xff] }
 0x394   :  { %2308 = vmatprep.subr.bf16.mxu0 %v6805_v43  ;;  %2349 = vmatprep.subr.bf16.mxu1 %v6806_v24  ;;  %v6816_v43 = vld [vmem:[#allocation74_spill] sm:$0xff]  ;;  %v6817_v24 = vld [vmem:[#allocation75_spill] sm:$0xff] }
 0x397   :  { %2309 = vmatpush1.bf16.msra.mxu0 %v6807_v0  ;;  %2350 = vmatpush1.bf16.msra.mxu1 %v6808_v8  ;;  %v6818_v0 = vld [vmem:[#allocation76_spill] sm:$0xff]  ;;  %v6819_v8 = vld [vmem:[#allocation77_spill] sm:$0xff] }
 0x398   :  { %2310 = vmatprep.subr.bf16.mxu0 %v6809_v6  ;;  %2351 = vmatprep.subr.bf16.mxu1 %v6810_v5  ;;  %v6820_v6 = vld [vmem:[#allocation78_spill] sm:$0xff]  ;;  %v6821_v5 = vld [vmem:[#allocation79_spill] sm:$0xff] }
 0x39b   :  { %2311 = vmatpush1.bf16.msra.mxu0 %v6811_v28  ;;  %2352 = vmatpush1.bf16.msra.mxu1 %v6812_v17  ;;  %v6822_v28 = vld [vmem:[#allocation80_spill] sm:$0xff]  ;;  %v6823_v17 = vld [vmem:[#allocation81_spill] sm:$0xff] }
 0x39c   :  { %2312 = vmatprep.subr.bf16.mxu0 %v6813_v14  ;;  %2353 = vmatprep.subr.bf16.mxu1 %v6814_v3  ;;  %v6824_v14 = vld [vmem:[#allocation82_spill] sm:$0xff]  ;;  %v6825_v3 = vld [vmem:[#allocation83_spill] sm:$0xff] }
 0x39f   :  { %2313 = vmatpush1.bf16.msra.mxu0 %v6815_v41  ;;  %2354 = vmatpush1.bf16.msra.mxu1 %v6816_v43  ;;  %v6826_v41 = vld [vmem:[#allocation84_spill] sm:$0xff] }
 0x3a0   :  { %2314 = vmatprep.subr.bf16.mxu0 %v6817_v24  ;;  %2355 = vmatprep.subr.bf16.mxu1 %v6818_v0 }
 0x3a3   :  { %2315 = vmatpush1.bf16.msra.mxu0 %v6819_v8  ;;  %2356 = vmatpush1.bf16.msra.mxu1 %v6820_v6 }
 0x3a4   :  { %2316 = vmatprep.subr.bf16.mxu0 %v6821_v5  ;;  %2357 = vmatprep.subr.bf16.mxu1 %v6822_v28 }
 0x3a7   :  { %2317 = vmatpush1.bf16.msra.mxu0 %v6823_v17  ;;  %2358 = vmatpush1.bf16.msra.mxu1 %v6824_v14 }
 0x3a8   :  { %2368 = vmatprep.subr.bf16.mxu0 %v6825_v3  ;;  %2409 = vmatprep.subr.bf16.mxu1 %v6826_v41 }
 0x3fd   :  { %v2098_v43 = vpop.f32.mrb[48].mxu0  ;;  %v2139_v24 = vpop.f32.mrb[48].mxu1 }
 0x3fe   :  { %v2228_v0 = vadd.f32 %v2098_v43, %v6827_v44  ;;  %v2230_v8 = vadd.f32 %v2139_v24, %v6828_v13  ;;  %v2100_v11 = vpop.f32.mrb[49].mxu0  ;;  %v2141_v6 = vpop.f32.mrb[49].mxu1 }
 0x3ff   :  { %v2229_v5 = vadd.f32 %v2100_v11, %v6829_v62  ;;  %v2231_v28 = vadd.f32 %v2141_v6, %v6830_v61  ;;  %v2102_v54 = vpop.f32.mrb[50].mxu0  ;;  %v2143_v17 = vpop.f32.mrb[50].mxu1 }
 0x400   :  { %v2103_v55 = vpop.f32.mrb[51].mxu0  ;;  %v2144_v14 = vpop.f32.mrb[51].mxu1  ;;  %v3822_v1 = vmul.f32 -1.442695, %v2228_v0  ;;  %v3824_v3 = vmul.f32 -1.442695, %v2230_v8 }
 0x401   :  { %v3823_v46 = vmul.f32 -1.442695, %v2229_v5  ;;  %v3825_v41 = vmul.f32 -1.442695, %v2231_v28  ;;  %v6831_v0 = vld [vmem:[#allocation180_spill] sm:$0xff]  ;;  %v6832_v5 = vld [vmem:[#allocation181_spill] sm:$0xff] }
 0x402   :  { %4016 = vpow2.f32 %v3822_v1  ;;  %v6834_v55 = vld [vmem:[#allocation183_spill] sm:$0xff] }
 0x403   :  { %4018 = vpow2.f32 %v3824_v3 }
 0x404   :  { %4020 = vpow2.f32 %v3823_v46 }
 0x405   :  { %4022 = vpow2.f32 %v3825_v41  ;;  %v6833_v41 = vld [vmem:[#allocation182_spill] sm:$0xff] }
 0x40c   :  { %v4017_v44 = vpop.eup %4016 }
 0x40d   :  { %v4019_v13 = vpop.eup %4018  ;;  %v2248_v18 = vadd.f32 1.0, %v4017_v44 }
 0x40e   :  { %v4021_v43 = vpop.eup %4020  ;;  %v2250_v11 = vadd.f32 1.0, %v4019_v13 }
 0x40f   :  { %v4023_v24 = vpop.eup %4022  ;;  %v2249_v62 = vadd.f32 1.0, %v4021_v43  ;;  %4024 = vrcp.f32 %v2248_v18 }
 0x410   :  { %v2251_v6 = vadd.f32 1.0, %v4023_v24  ;;  %4026 = vrcp.f32 %v2250_v11 }
 0x411   :  { %4028 = vrcp.f32 %v2249_v62 }
 0x412   :  { %4030 = vrcp.f32 %v2251_v6 }
 0x419   :  { %v4025_v11 = vpop.eup %4024 }
 0x41a   :  { %v4027_v62 = vpop.eup %4026 }
 0x43d   :  { %v2180_v17 = vpop.f32.mrb[52].mxu0  ;;  %v2221_v14 = vpop.f32.mrb[52].mxu1 }
 0x43e   :  { %v2232_v8 = vadd.f32 %v2180_v17, %v6831_v0  ;;  %v2234_v28 = vadd.f32 %v2221_v14, %v6832_v5  ;;  %v2182_v3 = vpop.f32.mrb[53].mxu0  ;;  %v2223_v46 = vpop.f32.mrb[53].mxu1  ;;  %v2274_v5 = vmul.f32 %v4027_v62, %v5275_v49  ;;  %v6835_v62 = vld [vmem:[#allocation126_spill] sm:$0xff] }
 0x43f   :  { %v2233_v1 = vadd.f32 %v2182_v3, %v6833_v41  ;;  %v2235_v54 = vadd.f32 %v2223_v46, %v6834_v55  ;;  %v2184_v61 = vpop.f32.mrb[54].mxu0  ;;  %v2225_v44 = vpop.f32.mrb[54].mxu1 }
 0x440   :  { %4032 = vtanh.f32 %v2232_v8  ;;  %v3826_v13 = vmul.f32 -1.442695, %v2234_v28  ;;  %v2185_v18 = vpop.f32.mrb[55].mxu0  ;;  %v2226_v43 = vpop.f32.mrb[55].mxu1 }
 0x441   :  { %4034 = vtanh.f32 %v2233_v1  ;;  %v3827_v24 = vmul.f32 -1.442695, %v2235_v54  ;;  %v4029_v17 = vpop.eup %4028 }
 0x442   :  { %4036 = vpow2.f32 %v3826_v13  ;;  %v4031_v14 = vpop.eup %4030 }
 0x443   :  { %4038 = vpow2.f32 %v3827_v24  ;;  %v2275_v41 = vmul.f32 %v4031_v14, %v5277_v29  ;;  %v6837_v14 = vld [vmem:[#allocation128_spill] sm:$0xff] }
 0x44a   :  { %v4033_v0 = vpop.eup %4032 }
 0x44b   :  { %v4035_v6 = vpop.eup %4034  ;;  %v2276_v3 = vmul.f32 %v4033_v0, %v4025_v11  ;;  %v6838_v0 = vld [vmem:[#allocation129_spill] sm:$0xff] }
 0x44c   :  { %v4037_v46 = vpop.eup %4036  ;;  %v2277_v8 = vmul.f32 %v4035_v6, %v4029_v17  ;;  %v6836_v17 = vld [vmem:[#allocation127_spill] sm:$0xff]  ;;  %v6839_v6 = vld [vmem:[#allocation130_spill] sm:$0xff] }
 0x44d   :  { %v4039_v28 = vpop.eup %4038  ;;  %v5425_v55 = vadd.f32 %v2276_v3, %v2274_v5  ;;  %v2268_v1 = vadd.f32 1.0, %v4037_v46  ;;  %v6840_v5 = vld [vmem:[#allocation131_spill] sm:$0xff]  ;;  %v6841_v3 = vld [vmem:[#allocation132_spill] sm:$0xff]  ;;  %v6842_v46 = vld [vmem:[#allocation133_spill] sm:$0xff] }
 0x44e   :  { %v5427_v54 = vadd.f32 %v2277_v8, %v2275_v41  ;;  %v2269_v61 = vadd.f32 1.0, %v4039_v28  ;;  %v6843_v41 = vld [vmem:[#allocation134_spill] sm:$0xff]  ;;  %v6844_v8 = vld [vmem:[#allocation135_spill] sm:$0xff]  ;;  %v6845_v28 = vld [vmem:[#allocation136_spill] sm:$0xff] }
 0x44f   :  { %4040 = vtanh.f32 %v5425_v55 }
 0x450   :  { %4042 = vrcp.f32 %v2268_v1  ;;  %v6846_v1 = vld [vmem:[#allocation137_spill] sm:$0xff] }
 0x451   :  { %4044 = vtanh.f32 %v5427_v54 }
 0x452   :  { %4046 = vrcp.f32 %v2269_v61  ;;  %v6847_v61 = vld [vmem:[#allocation138_spill] sm:$0xff] }
 0x459   :  { %v4041_v44 = vpop.eup %4040 }
 0x45a   :  { %v4043_v49 = vpop.eup %4042 }
 0x45b   :  { %v4045_v13 = vpop.eup %4044  ;;  %v2282_v43 = vmul.f32 %v4043_v49, %v4041_v44  ;;  %v6848_v44 = vld [vmem:[#allocation139_spill] sm:$0xff]  ;;  %v6849_v49 = vld [vmem:[#allocation140_spill] sm:$0xff] }
 0x45c   :  { %v4047_v18 = vpop.eup %4046 }
 0x45d   :  { %v2283_v29 = vmul.f32 %v4047_v18, %v4045_v13  ;;  %v5431_v11 = vpack.c.bf16 %v2282_v43, %v2282_v43  ;;  %v6850_v13 = vld [vmem:[#allocation141_spill] sm:$0xff]  ;;  %v6851_v18 = vld [vmem:[#allocation142_spill] sm:$0xff]  ;;  %v6852_v43 = vld [vmem:[#allocation143_spill] sm:$0xff] }
 0x45f   :  { %v2285_v24 = vpack.c.bf16 %v2283_v29, %v2283_v29  ;;  %v6853_v29 = vld [vmem:[#allocation144_spill] sm:$0xff] }
 0x461   :  { %2318 = vmatprep.mubr.bf16.mxu0 %v2285_v24  ;;  %2359 = vmatprep.mubr.bf16.mxu1 %v2285_v24 }
 0x462   :  { %2319 = vmatmul.mubr.bf16.vlgmr.msra.gmra.mrb[56].mxu0 %v5431_v11  ;;  %2360 = vmatmul.mubr.bf16.vlgmr.msra.gmra.mrb[56].mxu1 %v5431_v11 }
 0x463   :  { %2369 = vmatpush1.bf16.msra.mxu0 %v6636_v53  ;;  %2410 = vmatpush1.bf16.msra.mxu1 %v6637_v34 }
 0x464   :  { %2400 = vmatprep.mubr.bf16.mxu0 %v2285_v24  ;;  %2441 = vmatprep.mubr.bf16.mxu1 %v2285_v24  ;;  %v6854_v24 = vld [vmem:[#allocation145_spill] sm:$0xff] }
 0x465   :  { %2370 = vmatprep.subr.bf16.mxu0 %v6638_v59  ;;  %2411 = vmatprep.subr.bf16.mxu1 %v6639_v35 }
 0x467   :  { %2371 = vmatpush1.bf16.msra.mxu0 %v6640_v20  ;;  %2412 = vmatpush1.bf16.msra.mxu1 %v6641_v12 }
 0x468   :  { %2372 = vmatprep.subr.bf16.mxu0 %v6642_v9  ;;  %2413 = vmatprep.subr.bf16.mxu1 %v6643_v63 }
 0x46b   :  { %2373 = vmatpush1.bf16.msra.mxu0 %v6644_v19  ;;  %2414 = vmatpush1.bf16.msra.mxu1 %v6645_v25 }
 0x46c   :  { %2374 = vmatprep.subr.bf16.mxu0 %v6646_v52  ;;  %2415 = vmatprep.subr.bf16.mxu1 %v6647_v58 }
 0x46f   :  { %2375 = vmatpush1.bf16.msra.mxu0 %v6648_v27  ;;  %2416 = vmatpush1.bf16.msra.mxu1 %v6649_v57 }
 0x470   :  { %2376 = vmatprep.subr.bf16.mxu0 %v6650_v50  ;;  %2417 = vmatprep.subr.bf16.mxu1 %v6651_v51 }
 0x473   :  { %2377 = vmatpush1.bf16.msra.mxu0 %v6652_v60  ;;  %2418 = vmatpush1.bf16.msra.mxu1 %v6653_v42 }
 0x474   :  { %2378 = vmatprep.subr.bf16.mxu0 %v6740_v30  ;;  %2419 = vmatprep.subr.bf16.mxu1 %v6741_v21 }
 0x477   :  { %2379 = vmatpush1.bf16.msra.mxu0 %v6742_v22  ;;  %2420 = vmatpush1.bf16.msra.mxu1 %v6743_v40 }
 0x478   :  { %2380 = vmatprep.subr.bf16.mxu0 %v6744_v23  ;;  %2421 = vmatprep.subr.bf16.mxu1 %v6745_v47 }
 0x47b   :  { %2381 = vmatpush1.bf16.msra.mxu0 %v6746_v33  ;;  %2422 = vmatpush1.bf16.msra.mxu1 %v6747_v15 }
 0x47c   :  { %2382 = vmatprep.subr.bf16.mxu0 %v6748_v37  ;;  %2423 = vmatprep.subr.bf16.mxu1 %v6749_v45 }
 0x47f   :  { %2383 = vmatpush1.bf16.msra.mxu0 %v6750_v16  ;;  %2424 = vmatpush1.bf16.msra.mxu1 %v6751_v48 }
 0x480   :  { %2384 = vmatprep.subr.bf16.mxu0 %v6752_v7  ;;  %2425 = vmatprep.subr.bf16.mxu1 %v6753_v32 }
 0x483   :  { %2385 = vmatpush1.bf16.msra.mxu0 %v6754_v36  ;;  %2426 = vmatpush1.bf16.msra.mxu1 %v6755_v31 }
 0x484   :  { %2386 = vmatprep.subr.bf16.mxu0 %v6756_v4  ;;  %2427 = vmatprep.subr.bf16.mxu1 %v6757_v38 }
 0x487   :  { %2387 = vmatpush1.bf16.msra.mxu0 %v6758_v56  ;;  %2428 = vmatpush1.bf16.msra.mxu1 %v6673_v2 }
 0x488   :  { %2388 = vmatprep.subr.bf16.mxu0 %v6674_v10  ;;  %2429 = vmatprep.subr.bf16.mxu1 %v6675_v26 }
 0x48b   :  { %2389 = vmatpush1.bf16.msra.mxu0 %v6759_v39  ;;  %2430 = vmatpush1.bf16.msra.mxu1 %v6835_v62 }
 0x48c   :  { %2390 = vmatprep.subr.bf16.mxu0 %v6836_v17  ;;  %2431 = vmatprep.subr.bf16.mxu1 %v6837_v14 }
 0x48f   :  { %2391 = vmatpush1.bf16.msra.mxu0 %v6838_v0  ;;  %2432 = vmatpush1.bf16.msra.mxu1 %v6839_v6 }
 0x490   :  { %2392 = vmatprep.subr.bf16.mxu0 %v6840_v5  ;;  %2433 = vmatprep.subr.bf16.mxu1 %v6841_v3  ;;  %v6924_v3 = vld [vmem:[#allocation158_spill] sm:$0xff]  ;;  %v6925_v5 = vld [vmem:[#allocation159_spill] sm:$0xff] }
 0x493   :  { %2393 = vmatpush1.bf16.msra.mxu0 %v6842_v46  ;;  %2434 = vmatpush1.bf16.msra.mxu1 %v6843_v41  ;;  %v6923_v41 = vld [vmem:[#allocation157_spill] sm:$0xff] }
 0x494   :  { %2394 = vmatprep.subr.bf16.mxu0 %v6844_v8  ;;  %2435 = vmatprep.subr.bf16.mxu1 %v6845_v28  ;;  %v6855_v8 = vld [vmem:[#allocation146_spill] sm:$0xff]  ;;  %v6856_v28 = vld [vmem:[#allocation19_spill] sm:$0xff] }
 0x497   :  { %2395 = vmatpush1.bf16.msra.mxu0 %v6846_v1  ;;  %2436 = vmatpush1.bf16.msra.mxu1 %v6847_v61  ;;  %v6857_v1 = vld [vmem:[#allocation20_spill] sm:$0xff] }
 0x498   :  { %2396 = vmatprep.subr.bf16.mxu0 %v6848_v44  ;;  %2437 = vmatprep.subr.bf16.mxu1 %v6849_v49  ;;  %v6858_v49 = vld [vmem:[#allocation21_spill] sm:$0xff]  ;;  %v6867_v44 = vld [vmem:[#allocation30_spill] sm:$0xff]  ;;  %v6922_v61 = vld [vmem:[#allocation156_spill] sm:$0xff] }
 0x49b   :  { %2397 = vmatpush1.bf16.msra.mxu0 %v6850_v13  ;;  %2438 = vmatpush1.bf16.msra.mxu1 %v6851_v18  ;;  %v6859_v13 = vld [vmem:[#allocation22_spill] sm:$0xff]  ;;  %v6860_v18 = vld [vmem:[#allocation23_spill] sm:$0xff] }
 0x49c   :  { %2398 = vmatprep.subr.bf16.mxu0 %v6852_v43  ;;  %2439 = vmatprep.subr.bf16.mxu1 %v6853_v29  ;;  %v6861_v43 = vld [vmem:[#allocation24_spill] sm:$0xff]  ;;  %v6862_v29 = vld [vmem:[#allocation25_spill] sm:$0xff] }
 0x49f   :  { %2399 = vmatpush1.bf16.msra.mxu0 %v6854_v24  ;;  %2440 = vmatpush1.bf16.msra.mxu1 %v6855_v8  ;;  %v6863_v24 = vld [vmem:[#allocation26_spill] sm:$0xff]  ;;  %v6864_v8 = vld [vmem:[#allocation27_spill] sm:$0xff] }
 0x4a0   :  { %2508 = vmatprep.subr.bf16.mxu0 %v6856_v28  ;;  %2549 = vmatprep.subr.bf16.mxu1 %v6857_v1  ;;  %v6865_v28 = vld [vmem:[#allocation28_spill] sm:$0xff]  ;;  %v6866_v1 = vld [vmem:[#allocation29_spill] sm:$0xff] }
 0x4a2   :  { %2401 = vmatmul.mubr.bf16.vlgmr.msra.gmra.mrb[60].mxu0 %v5431_v11  ;;  %2442 = vmatmul.mubr.bf16.vlgmr.msra.gmra.mrb[60].mxu1 %v5431_v11  ;;  %v6868_v11 = vld [vmem:[#allocation31_spill] sm:$0xff] }
 0x4a3   :  { %2509 = vmatpush1.bf16.msra.mxu0 %v6858_v49  ;;  %2550 = vmatpush1.bf16.msra.mxu1 %v6859_v13  ;;  %v6869_v49 = vld [vmem:[#allocation32_spill] sm:$0xff]  ;;  %v6870_v13 = vld [vmem:[#allocation33_spill] sm:$0xff] }
 0x4a4   :  { %2510 = vmatprep.subr.bf16.mxu0 %v6860_v18  ;;  %2551 = vmatprep.subr.bf16.mxu1 %v6861_v43  ;;  %v6871_v18 = vld [vmem:[#allocation34_spill] sm:$0xff]  ;;  %v6872_v43 = vld [vmem:[#allocation35_spill] sm:$0xff] }
 0x4a7   :  { %2511 = vmatpush1.bf16.msra.mxu0 %v6862_v29  ;;  %2552 = vmatpush1.bf16.msra.mxu1 %v6863_v24  ;;  %v6873_v29 = vld [vmem:[#allocation36_spill] sm:$0xff]  ;;  %v6874_v24 = vld [vmem:[#allocation37_spill] sm:$0xff] }
 0x4a8   :  { %2512 = vmatprep.subr.bf16.mxu0 %v6864_v8  ;;  %2553 = vmatprep.subr.bf16.mxu1 %v6865_v28  ;;  %v6875_v8 = vld [vmem:[#allocation38_spill] sm:$0xff]  ;;  %v6876_v28 = vld [vmem:[#allocation39_spill] sm:$0xff] }
 0x4ab   :  { %2513 = vmatpush1.bf16.msra.mxu0 %v6866_v1  ;;  %2554 = vmatpush1.bf16.msra.mxu1 %v6867_v44  ;;  %v6877_v1 = vld [vmem:[#allocation40_spill] sm:$0xff]  ;;  %v6878_v44 = vld [vmem:[#allocation41_spill] sm:$0xff] }
 0x4ac   :  { %2514 = vmatprep.subr.bf16.mxu0 %v6868_v11  ;;  %2555 = vmatprep.subr.bf16.mxu1 %v6869_v49  ;;  %v6879_v11 = vld [vmem:[#allocation42_spill] sm:$0xff]  ;;  %v6880_v49 = vld [vmem:[#allocation43_spill] sm:$0xff] }
 0x4af   :  { %2515 = vmatpush1.bf16.msra.mxu0 %v6870_v13  ;;  %2556 = vmatpush1.bf16.msra.mxu1 %v6871_v18  ;;  %v6881_v13 = vld [vmem:[#allocation44_spill] sm:$0xff]  ;;  %v6882_v18 = vld [vmem:[#allocation45_spill] sm:$0xff] }
 0x4b0   :  { %2516 = vmatprep.subr.bf16.mxu0 %v6872_v43  ;;  %2557 = vmatprep.subr.bf16.mxu1 %v6873_v29  ;;  %v6883_v43 = vld [vmem:[#allocation46_spill] sm:$0xff]  ;;  %v6884_v29 = vld [vmem:[#allocation47_spill] sm:$0xff] }
 0x4b3   :  { %2517 = vmatpush1.bf16.msra.mxu0 %v6874_v24  ;;  %2558 = vmatpush1.bf16.msra.mxu1 %v6875_v8  ;;  %v6885_v24 = vld [vmem:[#allocation48_spill] sm:$0xff]  ;;  %v6886_v8 = vld [vmem:[#allocation49_spill] sm:$0xff] }
 0x4b4   :  { %2518 = vmatprep.subr.bf16.mxu0 %v6876_v28  ;;  %2559 = vmatprep.subr.bf16.mxu1 %v6877_v1  ;;  %v6887_v28 = vld [vmem:[#allocation50_spill] sm:$0xff]  ;;  %v6888_v1 = vld [vmem:[#allocation51_spill] sm:$0xff] }
 0x4b7   :  { %2519 = vmatpush1.bf16.msra.mxu0 %v6878_v44  ;;  %2560 = vmatpush1.bf16.msra.mxu1 %v6879_v11  ;;  %v6889_v44 = vld [vmem:[#allocation52_spill] sm:$0xff]  ;;  %v6890_v11 = vld [vmem:[#allocation53_spill] sm:$0xff] }
 0x4b8   :  { %2520 = vmatprep.subr.bf16.mxu0 %v6880_v49  ;;  %2561 = vmatprep.subr.bf16.mxu1 %v6881_v13  ;;  %v6891_v49 = vld [vmem:[#allocation54_spill] sm:$0xff]  ;;  %v6892_v13 = vld [vmem:[#allocation55_spill] sm:$0xff] }
 0x4bb   :  { %2521 = vmatpush1.bf16.msra.mxu0 %v6882_v18  ;;  %2562 = vmatpush1.bf16.msra.mxu1 %v6883_v43  ;;  %v6893_v18 = vld [vmem:[#allocation56_spill] sm:$0xff]  ;;  %v6894_v43 = vld [vmem:[#allocation57_spill] sm:$0xff] }
 0x4bc   :  { %2522 = vmatprep.subr.bf16.mxu0 %v6884_v29  ;;  %2563 = vmatprep.subr.bf16.mxu1 %v6885_v24  ;;  %v6895_v29 = vld [vmem:[#allocation58_spill] sm:$0xff]  ;;  %v6896_v24 = vld [vmem:[#allocation59_spill] sm:$0xff] }
 0x4bf   :  { %2523 = vmatpush1.bf16.msra.mxu0 %v6886_v8  ;;  %2564 = vmatpush1.bf16.msra.mxu1 %v6887_v28  ;;  %v6897_v8 = vld [vmem:[#allocation60_spill] sm:$0xff]  ;;  %v6898_v28 = vld [vmem:[#allocation61_spill] sm:$0xff] }
 0x4c0   :  { %2524 = vmatprep.subr.bf16.mxu0 %v6888_v1  ;;  %2565 = vmatprep.subr.bf16.mxu1 %v6889_v44  ;;  %v6899_v1 = vld [vmem:[#allocation62_spill] sm:$0xff]  ;;  %v6900_v44 = vld [vmem:[#allocation63_spill] sm:$0xff] }
 0x4c3   :  { %2525 = vmatpush1.bf16.msra.mxu0 %v6890_v11  ;;  %2566 = vmatpush1.bf16.msra.mxu1 %v6891_v49  ;;  %v6901_v11 = vld [vmem:[#allocation64_spill] sm:$0xff]  ;;  %v6902_v49 = vld [vmem:[#allocation65_spill] sm:$0xff] }
 0x4c4   :  { %2526 = vmatprep.subr.bf16.mxu0 %v6892_v13  ;;  %2567 = vmatprep.subr.bf16.mxu1 %v6893_v18  ;;  %v6903_v13 = vld [vmem:[#allocation66_spill] sm:$0xff]  ;;  %v6904_v18 = vld [vmem:[#allocation67_spill] sm:$0xff] }
 0x4c7   :  { %2527 = vmatpush1.bf16.msra.mxu0 %v6894_v43  ;;  %2568 = vmatpush1.bf16.msra.mxu1 %v6895_v29  ;;  %v6905_v43 = vld [vmem:[#allocation68_spill] sm:$0xff]  ;;  %v6906_v29 = vld [vmem:[#allocation69_spill] sm:$0xff] }
 0x4c8   :  { %2528 = vmatprep.subr.bf16.mxu0 %v6896_v24  ;;  %2569 = vmatprep.subr.bf16.mxu1 %v6897_v8  ;;  %v6907_v24 = vld [vmem:[#allocation70_spill] sm:$0xff]  ;;  %v6908_v8 = vld [vmem:[#allocation71_spill] sm:$0xff] }
 0x4cb   :  { %2529 = vmatpush1.bf16.msra.mxu0 %v6898_v28  ;;  %2570 = vmatpush1.bf16.msra.mxu1 %v6899_v1  ;;  %v6909_v28 = vld [vmem:[#allocation72_spill] sm:$0xff]  ;;  %v6910_v1 = vld [vmem:[#allocation73_spill] sm:$0xff] }
 0x4cc   :  { %2530 = vmatprep.subr.bf16.mxu0 %v6900_v44  ;;  %2571 = vmatprep.subr.bf16.mxu1 %v6901_v11  ;;  %v6911_v44 = vld [vmem:[#allocation74_spill] sm:$0xff]  ;;  %v6912_v11 = vld [vmem:[#allocation75_spill] sm:$0xff] }
 0x4cf   :  { %2531 = vmatpush1.bf16.msra.mxu0 %v6902_v49  ;;  %2572 = vmatpush1.bf16.msra.mxu1 %v6903_v13  ;;  %v6913_v49 = vld [vmem:[#allocation76_spill] sm:$0xff]  ;;  %v6914_v13 = vld [vmem:[#allocation77_spill] sm:$0xff] }
 0x4d0   :  { %2532 = vmatprep.subr.bf16.mxu0 %v6904_v18  ;;  %2573 = vmatprep.subr.bf16.mxu1 %v6905_v43  ;;  %v6915_v18 = vld [vmem:[#allocation78_spill] sm:$0xff]  ;;  %v6916_v43 = vld [vmem:[#allocation79_spill] sm:$0xff] }
 0x4d3   :  { %2533 = vmatpush1.bf16.msra.mxu0 %v6906_v29  ;;  %2574 = vmatpush1.bf16.msra.mxu1 %v6907_v24  ;;  %v6917_v29 = vld [vmem:[#allocation80_spill] sm:$0xff]  ;;  %v6918_v24 = vld [vmem:[#allocation81_spill] sm:$0xff] }
 0x4d4   :  { %2534 = vmatprep.subr.bf16.mxu0 %v6908_v8  ;;  %2575 = vmatprep.subr.bf16.mxu1 %v6909_v28  ;;  %v6919_v8 = vld [vmem:[#allocation82_spill] sm:$0xff]  ;;  %v6920_v28 = vld [vmem:[#allocation83_spill] sm:$0xff] }
 0x4d7   :  { %2535 = vmatpush1.bf16.msra.mxu0 %v6910_v1  ;;  %2576 = vmatpush1.bf16.msra.mxu1 %v6911_v44  ;;  %v6921_v1 = vld [vmem:[#allocation84_spill] sm:$0xff] }
 0x4d8   :  { %2536 = vmatprep.subr.bf16.mxu0 %v6912_v11  ;;  %2577 = vmatprep.subr.bf16.mxu1 %v6913_v49 }
 0x4db   :  { %2537 = vmatpush1.bf16.msra.mxu0 %v6914_v13  ;;  %2578 = vmatpush1.bf16.msra.mxu1 %v6915_v18 }
 0x4dc   :  { %2538 = vmatprep.subr.bf16.mxu0 %v6916_v43  ;;  %2579 = vmatprep.subr.bf16.mxu1 %v6917_v29 }
 0x4df   :  { %2539 = vmatpush1.bf16.msra.mxu0 %v6918_v24  ;;  %2580 = vmatpush1.bf16.msra.mxu1 %v6919_v8 }
 0x4e0   :  { %2590 = vmatprep.subr.bf16.mxu0 %v6920_v28  ;;  %2631 = vmatprep.subr.bf16.mxu1 %v6921_v1 }
 0x535   :  { %v2320_v44 = vpop.f32.mrb[56].mxu0  ;;  %v2361_v11 = vpop.f32.mrb[56].mxu1 }
 0x536   :  { %v2450_v49 = vadd.f32 %v2320_v44, %v6922_v61  ;;  %v2452_v13 = vadd.f32 %v2361_v11, %v6923_v41  ;;  %v2322_v46 = vpop.f32.mrb[57].mxu0  ;;  %v2363_v18 = vpop.f32.mrb[57].mxu1 }
 0x537   :  { %v2451_v43 = vadd.f32 %v2322_v46, %v6924_v3  ;;  %v2453_v29 = vadd.f32 %v2363_v18, %v6925_v5  ;;  %v2324_v6 = vpop.f32.mrb[58].mxu0  ;;  %v2365_v24 = vpop.f32.mrb[58].mxu1 }
 0x538   :  { %v2325_v0 = vpop.f32.mrb[59].mxu0  ;;  %v2366_v8 = vpop.f32.mrb[59].mxu1  ;;  %v3828_v14 = vmul.f32 -1.442695, %v2450_v49  ;;  %v3830_v28 = vmul.f32 -1.442695, %v2452_v13 }
 0x539   :  { %v3829_v17 = vmul.f32 -1.442695, %v2451_v43  ;;  %v3831_v1 = vmul.f32 -1.442695, %v2453_v29  ;;  %v6926_v8 = vld [vmem:[#allocation184_spill] sm:$0xff]  ;;  %v6927_v13 = vld [vmem:[#allocation185_spill] sm:$0xff] }
 0x53a   :  { %4048 = vpow2.f32 %v3828_v14  ;;  %v6929_v43 = vld [vmem:[#allocation187_spill] sm:$0xff] }
 0x53b   :  { %4050 = vpow2.f32 %v3830_v28 }
 0x53c   :  { %4052 = vpow2.f32 %v3829_v17 }
 0x53d   :  { %4054 = vpow2.f32 %v3831_v1  ;;  %v6928_v1 = vld [vmem:[#allocation186_spill] sm:$0xff] }
 0x544   :  { %v4049_v61 = vpop.eup %4048 }
 0x545   :  { %v4051_v41 = vpop.eup %4050  ;;  %v2470_v62 = vadd.f32 1.0, %v4049_v61 }
 0x546   :  { %v4053_v44 = vpop.eup %4052  ;;  %v2472_v3 = vadd.f32 1.0, %v4051_v41 }
 0x547   :  { %v4055_v11 = vpop.eup %4054  ;;  %v2471_v46 = vadd.f32 1.0, %v4053_v44  ;;  %4056 = vrcp.f32 %v2470_v62 }
 0x548   :  { %v2473_v5 = vadd.f32 1.0, %v4055_v11  ;;  %4058 = vrcp.f32 %v2472_v3 }
 0x549   :  { %4060 = vrcp.f32 %v2471_v46 }
 0x54a   :  { %4062 = vrcp.f32 %v2473_v5 }
 0x551   :  { %v4057_v3 = vpop.eup %4056 }
 0x552   :  { %v4059_v46 = vpop.eup %4058 }
 0x575   :  { %v2402_v0 = vpop.f32.mrb[60].mxu0  ;;  %v2443_v6 = vpop.f32.mrb[60].mxu1 }
 0x576   :  { %v2454_v49 = vadd.f32 %v2402_v0, %v6926_v8  ;;  %v2456_v14 = vadd.f32 %v2443_v6, %v6927_v13  ;;  %v2404_v28 = vpop.f32.mrb[61].mxu0  ;;  %v2445_v17 = vpop.f32.mrb[61].mxu1  ;;  %v2496_v13 = vmul.f32 %v4059_v46, %v5425_v55  ;;  %v6930_v46 = vld [vmem:[#allocation126_spill] sm:$0xff] }
 0x577   :  { %v2455_v18 = vadd.f32 %v2404_v28, %v6928_v1  ;;  %v2457_v29 = vadd.f32 %v2445_v17, %v6929_v43  ;;  %v2406_v24 = vpop.f32.mrb[62].mxu0  ;;  %v2447_v61 = vpop.f32.mrb[62].mxu1 }
 0x578   :  { %4064 = vtanh.f32 %v2454_v49  ;;  %v3832_v41 = vmul.f32 -1.442695, %v2456_v14  ;;  %v2407_v62 = vpop.f32.mrb[63].mxu0  ;;  %v2448_v44 = vpop.f32.mrb[63].mxu1 }
 0x579   :  { %4066 = vtanh.f32 %v2455_v18  ;;  %v3833_v11 = vmul.f32 -1.442695, %v2457_v29  ;;  %v4061_v0 = vpop.eup %4060 }
 0x57a   :  { %4068 = vpow2.f32 %v3832_v41  ;;  %v4063_v6 = vpop.eup %4062 }
 0x57b   :  { %4070 = vpow2.f32 %v3833_v11  ;;  %v2497_v1 = vmul.f32 %v4063_v6, %v5427_v54  ;;  %v6932_v6 = vld [vmem:[#allocation128_spill] sm:$0xff] }
 0x582   :  { %v4065_v8 = vpop.eup %4064 }
 0x583   :  { %v4067_v5 = vpop.eup %4066  ;;  %v2498_v28 = vmul.f32 %v4065_v8, %v4057_v3  ;;  %v6933_v8 = vld [vmem:[#allocation129_spill] sm:$0xff] }
 0x584   :  { %v4069_v17 = vpop.eup %4068  ;;  %v2499_v49 = vmul.f32 %v4067_v5, %v4061_v0  ;;  %v6931_v0 = vld [vmem:[#allocation127_spill] sm:$0xff]  ;;  %v6934_v5 = vld [vmem:[#allocation130_spill] sm:$0xff] }
 0x585   :  { %v4071_v14 = vpop.eup %4070  ;;  %v5575_v43 = vadd.f32 %v2498_v28, %v2496_v13  ;;  %v2490_v18 = vadd.f32 1.0, %v4069_v17  ;;  %v6935_v13 = vld [vmem:[#allocation131_spill] sm:$0xff]  ;;  %v6936_v28 = vld [vmem:[#allocation132_spill] sm:$0xff]  ;;  %v6937_v17 = vld [vmem:[#allocation133_spill] sm:$0xff] }
 0x586   :  { %v5577_v29 = vadd.f32 %v2499_v49, %v2497_v1  ;;  %v2491_v24 = vadd.f32 1.0, %v4071_v14  ;;  %v6938_v1 = vld [vmem:[#allocation134_spill] sm:$0xff]  ;;  %v6939_v49 = vld [vmem:[#allocation135_spill] sm:$0xff]  ;;  %v6940_v14 = vld [vmem:[#allocation136_spill] sm:$0xff] }
 0x587   :  { %4072 = vtanh.f32 %v5575_v43 }
 0x588   :  { %4074 = vrcp.f32 %v2490_v18  ;;  %v6941_v18 = vld [vmem:[#allocation137_spill] sm:$0xff] }
 0x589   :  { %4076 = vtanh.f32 %v5577_v29 }
 0x58a   :  { %4078 = vrcp.f32 %v2491_v24  ;;  %v6942_v24 = vld [vmem:[#allocation138_spill] sm:$0xff] }
 0x591   :  { %v4073_v61 = vpop.eup %4072 }
 0x592   :  { %v4075_v55 = vpop.eup %4074 }
 0x593   :  { %v4077_v41 = vpop.eup %4076  ;;  %v2504_v44 = vmul.f32 %v4075_v55, %v4073_v61  ;;  %v6943_v61 = vld [vmem:[#allocation139_spill] sm:$0xff]  ;;  %v6944_v55 = vld [vmem:[#allocation140_spill] sm:$0xff] }
 0x594   :  { %v4079_v62 = vpop.eup %4078 }
 0x595   :  { %v2505_v54 = vmul.f32 %v4079_v62, %v4077_v41  ;;  %v5581_v3 = vpack.c.bf16 %v2504_v44, %v2504_v44  ;;  %v6945_v41 = vld [vmem:[#allocation141_spill] sm:$0xff]  ;;  %v6946_v62 = vld [vmem:[#allocation142_spill] sm:$0xff]  ;;  %v6947_v44 = vld [vmem:[#allocation143_spill] sm:$0xff] }
 0x597   :  { %v2507_v11 = vpack.c.bf16 %v2505_v54, %v2505_v54  ;;  %v6948_v54 = vld [vmem:[#allocation144_spill] sm:$0xff] }
 0x599   :  { %2540 = vmatprep.mubr.bf16.mxu0 %v2507_v11  ;;  %2581 = vmatprep.mubr.bf16.mxu1 %v2507_v11 }
 0x59a   :  { %2541 = vmatmul.mubr.bf16.vlgmr.msra.gmra.mrb[64].mxu0 %v5581_v3  ;;  %2582 = vmatmul.mubr.bf16.vlgmr.msra.gmra.mrb[64].mxu1 %v5581_v3 }
 0x59b   :  { %2591 = vmatpush1.bf16.msra.mxu0 %v6636_v53  ;;  %2632 = vmatpush1.bf16.msra.mxu1 %v6637_v34 }
 0x59c   :  { %2622 = vmatprep.mubr.bf16.mxu0 %v2507_v11  ;;  %2663 = vmatprep.mubr.bf16.mxu1 %v2507_v11  ;;  %v6949_v11 = vld [vmem:[#allocation145_spill] sm:$0xff] }
 0x59d   :  { %2592 = vmatprep.subr.bf16.mxu0 %v6638_v59  ;;  %2633 = vmatprep.subr.bf16.mxu1 %v6639_v35 }
 0x59f   :  { %2593 = vmatpush1.bf16.msra.mxu0 %v6640_v20  ;;  %2634 = vmatpush1.bf16.msra.mxu1 %v6641_v12 }
 0x5a0   :  { %2594 = vmatprep.subr.bf16.mxu0 %v6642_v9  ;;  %2635 = vmatprep.subr.bf16.mxu1 %v6643_v63 }
 0x5a3   :  { %2595 = vmatpush1.bf16.msra.mxu0 %v6644_v19  ;;  %2636 = vmatpush1.bf16.msra.mxu1 %v6645_v25 }
 0x5a4   :  { %2596 = vmatprep.subr.bf16.mxu0 %v6646_v52  ;;  %2637 = vmatprep.subr.bf16.mxu1 %v6647_v58 }
 0x5a7   :  { %2597 = vmatpush1.bf16.msra.mxu0 %v6648_v27  ;;  %2638 = vmatpush1.bf16.msra.mxu1 %v6649_v57 }
 0x5a8   :  { %2598 = vmatprep.subr.bf16.mxu0 %v6650_v50  ;;  %2639 = vmatprep.subr.bf16.mxu1 %v6651_v51 }
 0x5ab   :  { %2599 = vmatpush1.bf16.msra.mxu0 %v6652_v60  ;;  %2640 = vmatpush1.bf16.msra.mxu1 %v6653_v42 }
 0x5ac   :  { %2600 = vmatprep.subr.bf16.mxu0 %v6740_v30  ;;  %2641 = vmatprep.subr.bf16.mxu1 %v6741_v21 }
 0x5af   :  { %2601 = vmatpush1.bf16.msra.mxu0 %v6742_v22  ;;  %2642 = vmatpush1.bf16.msra.mxu1 %v6743_v40 }
 0x5b0   :  { %2602 = vmatprep.subr.bf16.mxu0 %v6744_v23  ;;  %2643 = vmatprep.subr.bf16.mxu1 %v6745_v47 }
 0x5b3   :  { %2603 = vmatpush1.bf16.msra.mxu0 %v6746_v33  ;;  %2644 = vmatpush1.bf16.msra.mxu1 %v6747_v15 }
 0x5b4   :  { %2604 = vmatprep.subr.bf16.mxu0 %v6748_v37  ;;  %2645 = vmatprep.subr.bf16.mxu1 %v6749_v45 }
 0x5b7   :  { %2605 = vmatpush1.bf16.msra.mxu0 %v6750_v16  ;;  %2646 = vmatpush1.bf16.msra.mxu1 %v6751_v48 }
 0x5b8   :  { %2606 = vmatprep.subr.bf16.mxu0 %v6752_v7  ;;  %2647 = vmatprep.subr.bf16.mxu1 %v6753_v32 }
 0x5bb   :  { %2607 = vmatpush1.bf16.msra.mxu0 %v6754_v36  ;;  %2648 = vmatpush1.bf16.msra.mxu1 %v6755_v31 }
 0x5bc   :  { %2608 = vmatprep.subr.bf16.mxu0 %v6756_v4  ;;  %2649 = vmatprep.subr.bf16.mxu1 %v6757_v38 }
 0x5bf   :  { %2609 = vmatpush1.bf16.msra.mxu0 %v6758_v56  ;;  %2650 = vmatpush1.bf16.msra.mxu1 %v6673_v2 }
 0x5c0   :  { %2610 = vmatprep.subr.bf16.mxu0 %v6674_v10  ;;  %2651 = vmatprep.subr.bf16.mxu1 %v6675_v26 }
 0x5c3   :  { %2611 = vmatpush1.bf16.msra.mxu0 %v6759_v39  ;;  %2652 = vmatpush1.bf16.msra.mxu1 %v6930_v46 }
 0x5c4   :  { %2612 = vmatprep.subr.bf16.mxu0 %v6931_v0  ;;  %2653 = vmatprep.subr.bf16.mxu1 %v6932_v6 }
 0x5c7   :  { %2613 = vmatpush1.bf16.msra.mxu0 %v6933_v8  ;;  %2654 = vmatpush1.bf16.msra.mxu1 %v6934_v5 }
 0x5c8   :  { %2614 = vmatprep.subr.bf16.mxu0 %v6935_v13  ;;  %2655 = vmatprep.subr.bf16.mxu1 %v6936_v28  ;;  %v7019_v28 = vld [vmem:[#allocation162_spill] sm:$0xff]  ;;  %v7020_v13 = vld [vmem:[#allocation163_spill] sm:$0xff] }
 0x5cb   :  { %2615 = vmatpush1.bf16.msra.mxu0 %v6937_v17  ;;  %2656 = vmatpush1.bf16.msra.mxu1 %v6938_v1  ;;  %v7018_v1 = vld [vmem:[#allocation161_spill] sm:$0xff] }
 0x5cc   :  { %2616 = vmatprep.subr.bf16.mxu0 %v6939_v49  ;;  %2657 = vmatprep.subr.bf16.mxu1 %v6940_v14  ;;  %v6950_v49 = vld [vmem:[#allocation146_spill] sm:$0xff]  ;;  %v6951_v14 = vld [vmem:[#allocation19_spill] sm:$0xff] }
 0x5cf   :  { %2617 = vmatpush1.bf16.msra.mxu0 %v6941_v18  ;;  %2658 = vmatpush1.bf16.msra.mxu1 %v6942_v24  ;;  %v6952_v18 = vld [vmem:[#allocation20_spill] sm:$0xff] }
 0x5d0   :  { %2618 = vmatprep.subr.bf16.mxu0 %v6943_v61  ;;  %2659 = vmatprep.subr.bf16.mxu1 %v6944_v55  ;;  %v6953_v55 = vld [vmem:[#allocation21_spill] sm:$0xff]  ;;  %v6962_v61 = vld [vmem:[#allocation30_spill] sm:$0xff]  ;;  %v7017_v24 = vld [vmem:[#allocation160_spill] sm:$0xff] }
 0x5d3   :  { %2619 = vmatpush1.bf16.msra.mxu0 %v6945_v41  ;;  %2660 = vmatpush1.bf16.msra.mxu1 %v6946_v62  ;;  %v6954_v41 = vld [vmem:[#allocation22_spill] sm:$0xff]  ;;  %v6955_v62 = vld [vmem:[#allocation23_spill] sm:$0xff] }
 0x5d4   :  { %2620 = vmatprep.subr.bf16.mxu0 %v6947_v44  ;;  %2661 = vmatprep.subr.bf16.mxu1 %v6948_v54  ;;  %v6956_v44 = vld [vmem:[#allocation24_spill] sm:$0xff]  ;;  %v6957_v54 = vld [vmem:[#allocation25_spill] sm:$0xff] }
 0x5d7   :  { %2621 = vmatpush1.bf16.msra.mxu0 %v6949_v11  ;;  %2662 = vmatpush1.bf16.msra.mxu1 %v6950_v49  ;;  %v6958_v11 = vld [vmem:[#allocation26_spill] sm:$0xff]  ;;  %v6959_v49 = vld [vmem:[#allocation27_spill] sm:$0xff] }
 0x5d8   :  { %2730 = vmatprep.subr.bf16.mxu0 %v6951_v14  ;;  %2771 = vmatprep.subr.bf16.mxu1 %v6952_v18  ;;  %v6960_v14 = vld [vmem:[#allocation28_spill] sm:$0xff]  ;;  %v6961_v18 = vld [vmem:[#allocation29_spill] sm:$0xff] }
 0x5da   :  { %2623 = vmatmul.mubr.bf16.vlgmr.msra.gmra.mrb[68].mxu0 %v5581_v3  ;;  %2664 = vmatmul.mubr.bf16.vlgmr.msra.gmra.mrb[68].mxu1 %v5581_v3  ;;  %v6963_v3 = vld [vmem:[#allocation31_spill] sm:$0xff] }
 0x5db   :  { %2731 = vmatpush1.bf16.msra.mxu0 %v6953_v55  ;;  %2772 = vmatpush1.bf16.msra.mxu1 %v6954_v41  ;;  %v6964_v55 = vld [vmem:[#allocation32_spill] sm:$0xff]  ;;  %v6965_v41 = vld [vmem:[#allocation33_spill] sm:$0xff] }
 0x5dc   :  { %2732 = vmatprep.subr.bf16.mxu0 %v6955_v62  ;;  %2773 = vmatprep.subr.bf16.mxu1 %v6956_v44  ;;  %v6966_v62 = vld [vmem:[#allocation34_spill] sm:$0xff]  ;;  %v6967_v44 = vld [vmem:[#allocation35_spill] sm:$0xff] }
 0x5df   :  { %2733 = vmatpush1.bf16.msra.mxu0 %v6957_v54  ;;  %2774 = vmatpush1.bf16.msra.mxu1 %v6958_v11  ;;  %v6968_v54 = vld [vmem:[#allocation36_spill] sm:$0xff]  ;;  %v6969_v11 = vld [vmem:[#allocation37_spill] sm:$0xff] }
 0x5e0   :  { %2734 = vmatprep.subr.bf16.mxu0 %v6959_v49  ;;  %2775 = vmatprep.subr.bf16.mxu1 %v6960_v14  ;;  %v6970_v49 = vld [vmem:[#allocation38_spill] sm:$0xff]  ;;  %v6971_v14 = vld [vmem:[#allocation39_spill] sm:$0xff] }
 0x5e3   :  { %2735 = vmatpush1.bf16.msra.mxu0 %v6961_v18  ;;  %2776 = vmatpush1.bf16.msra.mxu1 %v6962_v61  ;;  %v6972_v18 = vld [vmem:[#allocation40_spill] sm:$0xff]  ;;  %v6973_v61 = vld [vmem:[#allocation41_spill] sm:$0xff] }
 0x5e4   :  { %2736 = vmatprep.subr.bf16.mxu0 %v6963_v3  ;;  %2777 = vmatprep.subr.bf16.mxu1 %v6964_v55  ;;  %v6974_v3 = vld [vmem:[#allocation42_spill] sm:$0xff]  ;;  %v6975_v55 = vld [vmem:[#allocation43_spill] sm:$0xff] }
 0x5e7   :  { %2737 = vmatpush1.bf16.msra.mxu0 %v6965_v41  ;;  %2778 = vmatpush1.bf16.msra.mxu1 %v6966_v62  ;;  %v6976_v41 = vld [vmem:[#allocation44_spill] sm:$0xff]  ;;  %v6977_v62 = vld [vmem:[#allocation45_spill] sm:$0xff] }
 0x5e8   :  { %2738 = vmatprep.subr.bf16.mxu0 %v6967_v44  ;;  %2779 = vmatprep.subr.bf16.mxu1 %v6968_v54  ;;  %v6978_v44 = vld [vmem:[#allocation46_spill] sm:$0xff]  ;;  %v6979_v54 = vld [vmem:[#allocation47_spill] sm:$0xff] }
 0x5eb   :  { %2739 = vmatpush1.bf16.msra.mxu0 %v6969_v11  ;;  %2780 = vmatpush1.bf16.msra.mxu1 %v6970_v49  ;;  %v6980_v11 = vld [vmem:[#allocation48_spill] sm:$0xff]  ;;  %v6981_v49 = vld [vmem:[#allocation49_spill] sm:$0xff] }
 0x5ec   :  { %2740 = vmatprep.subr.bf16.mxu0 %v6971_v14  ;;  %2781 = vmatprep.subr.bf16.mxu1 %v6972_v18  ;;  %v6982_v14 = vld [vmem:[#allocation50_spill] sm:$0xff]  ;;  %v6983_v18 = vld [vmem:[#allocation51_spill] sm:$0xff] }
 0x5ef   :  { %2741 = vmatpush1.bf16.msra.mxu0 %v6973_v61  ;;  %2782 = vmatpush1.bf16.msra.mxu1 %v6974_v3  ;;  %v6984_v61 = vld [vmem:[#allocation52_spill] sm:$0xff]  ;;  %v6985_v3 = vld [vmem:[#allocation53_spill] sm:$0xff] }
 0x5f0   :  { %2742 = vmatprep.subr.bf16.mxu0 %v6975_v55  ;;  %2783 = vmatprep.subr.bf16.mxu1 %v6976_v41  ;;  %v6986_v55 = vld [vmem:[#allocation54_spill] sm:$0xff]  ;;  %v6987_v41 = vld [vmem:[#allocation55_spill] sm:$0xff] }
 0x5f3   :  { %2743 = vmatpush1.bf16.msra.mxu0 %v6977_v62  ;;  %2784 = vmatpush1.bf16.msra.mxu1 %v6978_v44  ;;  %v6988_v62 = vld [vmem:[#allocation56_spill] sm:$0xff]  ;;  %v6989_v44 = vld [vmem:[#allocation57_spill] sm:$0xff] }
 0x5f4   :  { %2744 = vmatprep.subr.bf16.mxu0 %v6979_v54  ;;  %2785 = vmatprep.subr.bf16.mxu1 %v6980_v11  ;;  %v6990_v54 = vld [vmem:[#allocation58_spill] sm:$0xff]  ;;  %v6991_v11 = vld [vmem:[#allocation59_spill] sm:$0xff] }
 0x5f7   :  { %2745 = vmatpush1.bf16.msra.mxu0 %v6981_v49  ;;  %2786 = vmatpush1.bf16.msra.mxu1 %v6982_v14  ;;  %v6992_v49 = vld [vmem:[#allocation60_spill] sm:$0xff]  ;;  %v6993_v14 = vld [vmem:[#allocation61_spill] sm:$0xff] }
 0x5f8   :  { %2746 = vmatprep.subr.bf16.mxu0 %v6983_v18  ;;  %2787 = vmatprep.subr.bf16.mxu1 %v6984_v61  ;;  %v6994_v18 = vld [vmem:[#allocation62_spill] sm:$0xff]  ;;  %v6995_v61 = vld [vmem:[#allocation63_spill] sm:$0xff] }
 0x5fb   :  { %2747 = vmatpush1.bf16.msra.mxu0 %v6985_v3  ;;  %2788 = vmatpush1.bf16.msra.mxu1 %v6986_v55  ;;  %v6996_v3 = vld [vmem:[#allocation64_spill] sm:$0xff]  ;;  %v6997_v55 = vld [vmem:[#allocation65_spill] sm:$0xff] }
 0x5fc   :  { %2748 = vmatprep.subr.bf16.mxu0 %v6987_v41  ;;  %2789 = vmatprep.subr.bf16.mxu1 %v6988_v62  ;;  %v6998_v41 = vld [vmem:[#allocation66_spill] sm:$0xff]  ;;  %v6999_v62 = vld [vmem:[#allocation67_spill] sm:$0xff] }
 0x5ff   :  { %2749 = vmatpush1.bf16.msra.mxu0 %v6989_v44  ;;  %2790 = vmatpush1.bf16.msra.mxu1 %v6990_v54  ;;  %v7000_v44 = vld [vmem:[#allocation68_spill] sm:$0xff]  ;;  %v7001_v54 = vld [vmem:[#allocation69_spill] sm:$0xff] }
 0x600   :  { %2750 = vmatprep.subr.bf16.mxu0 %v6991_v11  ;;  %2791 = vmatprep.subr.bf16.mxu1 %v6992_v49  ;;  %v7002_v11 = vld [vmem:[#allocation70_spill] sm:$0xff]  ;;  %v7003_v49 = vld [vmem:[#allocation71_spill] sm:$0xff] }
 0x603   :  { %2751 = vmatpush1.bf16.msra.mxu0 %v6993_v14  ;;  %2792 = vmatpush1.bf16.msra.mxu1 %v6994_v18  ;;  %v7004_v14 = vld [vmem:[#allocation72_spill] sm:$0xff]  ;;  %v7005_v18 = vld [vmem:[#allocation73_spill] sm:$0xff] }
 0x604   :  { %2752 = vmatprep.subr.bf16.mxu0 %v6995_v61  ;;  %2793 = vmatprep.subr.bf16.mxu1 %v6996_v3  ;;  %v7006_v61 = vld [vmem:[#allocation74_spill] sm:$0xff]  ;;  %v7007_v3 = vld [vmem:[#allocation75_spill] sm:$0xff] }
 0x607   :  { %2753 = vmatpush1.bf16.msra.mxu0 %v6997_v55  ;;  %2794 = vmatpush1.bf16.msra.mxu1 %v6998_v41  ;;  %v7008_v55 = vld [vmem:[#allocation76_spill] sm:$0xff]  ;;  %v7009_v41 = vld [vmem:[#allocation77_spill] sm:$0xff] }
 0x608   :  { %2754 = vmatprep.subr.bf16.mxu0 %v6999_v62  ;;  %2795 = vmatprep.subr.bf16.mxu1 %v7000_v44  ;;  %v7010_v62 = vld [vmem:[#allocation78_spill] sm:$0xff]  ;;  %v7011_v44 = vld [vmem:[#allocation79_spill] sm:$0xff] }
 0x60b   :  { %2755 = vmatpush1.bf16.msra.mxu0 %v7001_v54  ;;  %2796 = vmatpush1.bf16.msra.mxu1 %v7002_v11  ;;  %v7012_v54 = vld [vmem:[#allocation80_spill] sm:$0xff]  ;;  %v7013_v11 = vld [vmem:[#allocation81_spill] sm:$0xff] }
 0x60c   :  { %2756 = vmatprep.subr.bf16.mxu0 %v7003_v49  ;;  %2797 = vmatprep.subr.bf16.mxu1 %v7004_v14  ;;  %v7014_v49 = vld [vmem:[#allocation82_spill] sm:$0xff]  ;;  %v7015_v14 = vld [vmem:[#allocation83_spill] sm:$0xff] }
 0x60f   :  { %2757 = vmatpush1.bf16.msra.mxu0 %v7005_v18  ;;  %2798 = vmatpush1.bf16.msra.mxu1 %v7006_v61  ;;  %v7016_v18 = vld [vmem:[#allocation84_spill] sm:$0xff] }
 0x610   :  { %2758 = vmatprep.subr.bf16.mxu0 %v7007_v3  ;;  %2799 = vmatprep.subr.bf16.mxu1 %v7008_v55 }
 0x613   :  { %2759 = vmatpush1.bf16.msra.mxu0 %v7009_v41  ;;  %2800 = vmatpush1.bf16.msra.mxu1 %v7010_v62 }
 0x614   :  { %2760 = vmatprep.subr.bf16.mxu0 %v7011_v44  ;;  %2801 = vmatprep.subr.bf16.mxu1 %v7012_v54 }
 0x617   :  { %2761 = vmatpush1.bf16.msra.mxu0 %v7013_v11  ;;  %2802 = vmatpush1.bf16.msra.mxu1 %v7014_v49 }
 0x618   :  { %2812 = vmatprep.subr.bf16.mxu0 %v7015_v14  ;;  %2853 = vmatprep.subr.bf16.mxu1 %v7016_v18 }
 0x66d   :  { %v2542_v61 = vpop.f32.mrb[64].mxu0  ;;  %v2583_v3 = vpop.f32.mrb[64].mxu1 }
 0x66e   :  { %v2672_v55 = vadd.f32 %v2542_v61, %v7017_v24  ;;  %v2674_v41 = vadd.f32 %v2583_v3, %v7018_v1  ;;  %v2544_v17 = vpop.f32.mrb[65].mxu0  ;;  %v2585_v62 = vpop.f32.mrb[65].mxu1 }
 0x66f   :  { %v2673_v44 = vadd.f32 %v2544_v17, %v7019_v28  ;;  %v2675_v54 = vadd.f32 %v2585_v62, %v7020_v13  ;;  %v2546_v5 = vpop.f32.mrb[66].mxu0  ;;  %v2587_v11 = vpop.f32.mrb[66].mxu1 }
 0x670   :  { %v2547_v8 = vpop.f32.mrb[67].mxu0  ;;  %v2588_v49 = vpop.f32.mrb[67].mxu1  ;;  %v3834_v6 = vmul.f32 -1.442695, %v2672_v55  ;;  %v3836_v14 = vmul.f32 -1.442695, %v2674_v41 }
 0x671   :  { %v3835_v0 = vmul.f32 -1.442695, %v2673_v44  ;;  %v3837_v18 = vmul.f32 -1.442695, %v2675_v54  ;;  %v7021_v49 = vld [vmem:[#allocation188_spill] sm:$0xff]  ;;  %v7022_v41 = vld [vmem:[#allocation189_spill] sm:$0xff] }
 0x672   :  { %4080 = vpow2.f32 %v3834_v6  ;;  %v7024_v44 = vld [vmem:[#allocation191_spill] sm:$0xff] }
 0x673   :  { %4082 = vpow2.f32 %v3836_v14 }
 0x674   :  { %4084 = vpow2.f32 %v3835_v0 }
 0x675   :  { %4086 = vpow2.f32 %v3837_v18  ;;  %v7023_v18 = vld [vmem:[#allocation190_spill] sm:$0xff] }
 0x67c   :  { %v4081_v24 = vpop.eup %4080 }
 0x67d   :  { %v4083_v1 = vpop.eup %4082  ;;  %v2692_v46 = vadd.f32 1.0, %v4081_v24 }
 0x67e   :  { %v4085_v61 = vpop.eup %4084  ;;  %v2694_v28 = vadd.f32 1.0, %v4083_v1 }
 0x67f   :  { %v4087_v3 = vpop.eup %4086  ;;  %v2693_v17 = vadd.f32 1.0, %v4085_v61  ;;  %4088 = vrcp.f32 %v2692_v46 }
 0x680   :  { %v2695_v13 = vadd.f32 1.0, %v4087_v3  ;;  %4090 = vrcp.f32 %v2694_v28 }
 0x681   :  { %4092 = vrcp.f32 %v2693_v17 }
 0x682   :  { %4094 = vrcp.f32 %v2695_v13 }
 0x689   :  { %v4089_v28 = vpop.eup %4088 }
 0x68a   :  { %v4091_v17 = vpop.eup %4090 }
 0x6ad   :  { %v2624_v8 = vpop.f32.mrb[68].mxu0  ;;  %v2665_v5 = vpop.f32.mrb[68].mxu1 }
 0x6ae   :  { %v2676_v55 = vadd.f32 %v2624_v8, %v7021_v49  ;;  %v2678_v6 = vadd.f32 %v2665_v5, %v7022_v41  ;;  %v2626_v14 = vpop.f32.mrb[69].mxu0  ;;  %v2667_v0 = vpop.f32.mrb[69].mxu1  ;;  %v2718_v41 = vmul.f32 %v4091_v17, %v5575_v43  ;;  %v7025_v17 = vld [vmem:[#allocation126_spill] sm:$0xff] }
 0x6af   :  { %v2677_v62 = vadd.f32 %v2626_v14, %v7023_v18  ;;  %v2679_v54 = vadd.f32 %v2667_v0, %v7024_v44  ;;  %v2628_v11 = vpop.f32.mrb[70].mxu0  ;;  %v2669_v24 = vpop.f32.mrb[70].mxu1 }
 0x6b0   :  { %4096 = vtanh.f32 %v2676_v55  ;;  %v3838_v1 = vmul.f32 -1.442695, %v2678_v6  ;;  %v2629_v46 = vpop.f32.mrb[71].mxu0  ;;  %v2670_v61 = vpop.f32.mrb[71].mxu1 }
 0x6b1   :  { %4098 = vtanh.f32 %v2677_v62  ;;  %v3839_v3 = vmul.f32 -1.442695, %v2679_v54  ;;  %v4093_v8 = vpop.eup %4092 }
 0x6b2   :  { %4100 = vpow2.f32 %v3838_v1  ;;  %v4095_v5 = vpop.eup %4094 }
 0x6b3   :  { %4102 = vpow2.f32 %v3839_v3  ;;  %v2719_v18 = vmul.f32 %v4095_v5, %v5577_v29  ;;  %v7027_v5 = vld [vmem:[#allocation128_spill] sm:$0xff] }
 0x6ba   :  { %v4097_v49 = vpop.eup %4096 }
 0x6bb   :  { %v4099_v13 = vpop.eup %4098  ;;  %v2720_v14 = vmul.f32 %v4097_v49, %v4089_v28  ;;  %v7028_v49 = vld [vmem:[#allocation129_spill] sm:$0xff] }
 0x6bc   :  { %v4101_v0 = vpop.eup %4100  ;;  %v2721_v55 = vmul.f32 %v4099_v13, %v4093_v8  ;;  %v7026_v8 = vld [vmem:[#allocation127_spill] sm:$0xff]  ;;  %v7029_v13 = vld [vmem:[#allocation130_spill] sm:$0xff] }
 0x6bd   :  { %v4103_v6 = vpop.eup %4102  ;;  %v5725_v44 = vadd.f32 %v2720_v14, %v2718_v41  ;;  %v2712_v62 = vadd.f32 1.0, %v4101_v0  ;;  %v7030_v41 = vld [vmem:[#allocation131_spill] sm:$0xff]  ;;  %v7031_v14 = vld [vmem:[#allocation132_spill] sm:$0xff]  ;;  %v7032_v0 = vld [vmem:[#allocation133_spill] sm:$0xff] }
 0x6be   :  { %v5727_v54 = vadd.f32 %v2721_v55, %v2719_v18  ;;  %v2713_v11 = vadd.f32 1.0, %v4103_v6  ;;  %v7033_v18 = vld [vmem:[#allocation134_spill] sm:$0xff]  ;;  %v7034_v55 = vld [vmem:[#allocation135_spill] sm:$0xff]  ;;  %v7035_v6 = vld [vmem:[#allocation136_spill] sm:$0xff] }
 0x6bf   :  { %4104 = vtanh.f32 %v5725_v44 }
 0x6c0   :  { %4106 = vrcp.f32 %v2712_v62  ;;  %v7036_v62 = vld [vmem:[#allocation137_spill] sm:$0xff] }
 0x6c1   :  { %4108 = vtanh.f32 %v5727_v54 }
 0x6c2   :  { %4110 = vrcp.f32 %v2713_v11  ;;  %v7037_v11 = vld [vmem:[#allocation138_spill] sm:$0xff] }
 0x6c9   :  { %v4105_v24 = vpop.eup %4104 }
 0x6ca   :  { %v4107_v43 = vpop.eup %4106 }
 0x6cb   :  { %v4109_v1 = vpop.eup %4108  ;;  %v2726_v61 = vmul.f32 %v4107_v43, %v4105_v24  ;;  %v7038_v24 = vld [vmem:[#allocation139_spill] sm:$0xff]  ;;  %v7039_v43 = vld [vmem:[#allocation140_spill] sm:$0xff] }
 0x6cc   :  { %v4111_v46 = vpop.eup %4110 }
 0x6cd   :  { %v2727_v29 = vmul.f32 %v4111_v46, %v4109_v1  ;;  %v5731_v28 = vpack.c.bf16 %v2726_v61, %v2726_v61  ;;  %v7040_v1 = vld [vmem:[#allocation141_spill] sm:$0xff]  ;;  %v7041_v46 = vld [vmem:[#allocation142_spill] sm:$0xff]  ;;  %v7042_v61 = vld [vmem:[#allocation143_spill] sm:$0xff] }
 0x6cf   :  { %v2729_v3 = vpack.c.bf16 %v2727_v29, %v2727_v29  ;;  %v7043_v29 = vld [vmem:[#allocation144_spill] sm:$0xff] }
 0x6d1   :  { %2762 = vmatprep.mubr.bf16.mxu0 %v2729_v3  ;;  %2803 = vmatprep.mubr.bf16.mxu1 %v2729_v3 }
 0x6d2   :  { %2763 = vmatmul.mubr.bf16.vlgmr.msra.gmra.mrb[72].mxu0 %v5731_v28  ;;  %2804 = vmatmul.mubr.bf16.vlgmr.msra.gmra.mrb[72].mxu1 %v5731_v28 }
 0x6d3   :  { %2813 = vmatpush1.bf16.msra.mxu0 %v6636_v53  ;;  %2854 = vmatpush1.bf16.msra.mxu1 %v6637_v34 }
 0x6d4   :  { %2844 = vmatprep.mubr.bf16.mxu0 %v2729_v3  ;;  %2885 = vmatprep.mubr.bf16.mxu1 %v2729_v3  ;;  %v7044_v3 = vld [vmem:[#allocation145_spill] sm:$0xff] }
 0x6d5   :  { %2814 = vmatprep.subr.bf16.mxu0 %v6638_v59  ;;  %2855 = vmatprep.subr.bf16.mxu1 %v6639_v35 }
 0x6d7   :  { %2815 = vmatpush1.bf16.msra.mxu0 %v6640_v20  ;;  %2856 = vmatpush1.bf16.msra.mxu1 %v6641_v12 }
 0x6d8   :  { %2816 = vmatprep.subr.bf16.mxu0 %v6642_v9  ;;  %2857 = vmatprep.subr.bf16.mxu1 %v6643_v63 }
 0x6db   :  { %2817 = vmatpush1.bf16.msra.mxu0 %v6644_v19  ;;  %2858 = vmatpush1.bf16.msra.mxu1 %v6645_v25 }
 0x6dc   :  { %2818 = vmatprep.subr.bf16.mxu0 %v6646_v52  ;;  %2859 = vmatprep.subr.bf16.mxu1 %v6647_v58 }
 0x6df   :  { %2819 = vmatpush1.bf16.msra.mxu0 %v6648_v27  ;;  %2860 = vmatpush1.bf16.msra.mxu1 %v6649_v57 }
 0x6e0   :  { %2820 = vmatprep.subr.bf16.mxu0 %v6650_v50  ;;  %2861 = vmatprep.subr.bf16.mxu1 %v6651_v51 }
 0x6e3   :  { %2821 = vmatpush1.bf16.msra.mxu0 %v6652_v60  ;;  %2862 = vmatpush1.bf16.msra.mxu1 %v6653_v42 }
 0x6e4   :  { %2822 = vmatprep.subr.bf16.mxu0 %v6740_v30  ;;  %2863 = vmatprep.subr.bf16.mxu1 %v6741_v21 }
 0x6e7   :  { %2823 = vmatpush1.bf16.msra.mxu0 %v6742_v22  ;;  %2864 = vmatpush1.bf16.msra.mxu1 %v6743_v40 }
 0x6e8   :  { %2824 = vmatprep.subr.bf16.mxu0 %v6744_v23  ;;  %2865 = vmatprep.subr.bf16.mxu1 %v6745_v47 }
 0x6eb   :  { %2825 = vmatpush1.bf16.msra.mxu0 %v6746_v33  ;;  %2866 = vmatpush1.bf16.msra.mxu1 %v6747_v15 }
 0x6ec   :  { %2826 = vmatprep.subr.bf16.mxu0 %v6748_v37  ;;  %2867 = vmatprep.subr.bf16.mxu1 %v6749_v45 }
 0x6ef   :  { %2827 = vmatpush1.bf16.msra.mxu0 %v6750_v16  ;;  %2868 = vmatpush1.bf16.msra.mxu1 %v6751_v48 }
 0x6f0   :  { %2828 = vmatprep.subr.bf16.mxu0 %v6752_v7  ;;  %2869 = vmatprep.subr.bf16.mxu1 %v6753_v32 }
 0x6f3   :  { %2829 = vmatpush1.bf16.msra.mxu0 %v6754_v36  ;;  %2870 = vmatpush1.bf16.msra.mxu1 %v6755_v31 }
 0x6f4   :  { %2830 = vmatprep.subr.bf16.mxu0 %v6756_v4  ;;  %2871 = vmatprep.subr.bf16.mxu1 %v6757_v38 }
 0x6f7   :  { %2831 = vmatpush1.bf16.msra.mxu0 %v6758_v56  ;;  %2872 = vmatpush1.bf16.msra.mxu1 %v6673_v2 }
 0x6f8   :  { %2832 = vmatprep.subr.bf16.mxu0 %v6674_v10  ;;  %2873 = vmatprep.subr.bf16.mxu1 %v6675_v26 }
 0x6fb   :  { %2833 = vmatpush1.bf16.msra.mxu0 %v6759_v39  ;;  %2874 = vmatpush1.bf16.msra.mxu1 %v7025_v17 }
 0x6fc   :  { %2834 = vmatprep.subr.bf16.mxu0 %v7026_v8  ;;  %2875 = vmatprep.subr.bf16.mxu1 %v7027_v5 }
 0x6ff   :  { %2835 = vmatpush1.bf16.msra.mxu0 %v7028_v49  ;;  %2876 = vmatpush1.bf16.msra.mxu1 %v7029_v13 }
 0x700   :  { %2836 = vmatprep.subr.bf16.mxu0 %v7030_v41  ;;  %2877 = vmatprep.subr.bf16.mxu1 %v7031_v14  ;;  %v7114_v14 = vld [vmem:[#allocation166_spill] sm:$0xff]  ;;  %v7115_v41 = vld [vmem:[#allocation167_spill] sm:$0xff] }
 0x703   :  { %2837 = vmatpush1.bf16.msra.mxu0 %v7032_v0  ;;  %2878 = vmatpush1.bf16.msra.mxu1 %v7033_v18  ;;  %v7113_v18 = vld [vmem:[#allocation165_spill] sm:$0xff] }
 0x704   :  { %2838 = vmatprep.subr.bf16.mxu0 %v7034_v55  ;;  %2879 = vmatprep.subr.bf16.mxu1 %v7035_v6  ;;  %v7045_v55 = vld [vmem:[#allocation146_spill] sm:$0xff]  ;;  %v7046_v6 = vld [vmem:[#allocation19_spill] sm:$0xff] }
 0x707   :  { %2839 = vmatpush1.bf16.msra.mxu0 %v7036_v62  ;;  %2880 = vmatpush1.bf16.msra.mxu1 %v7037_v11  ;;  %v7047_v62 = vld [vmem:[#allocation20_spill] sm:$0xff] }
 0x708   :  { %2840 = vmatprep.subr.bf16.mxu0 %v7038_v24  ;;  %2881 = vmatprep.subr.bf16.mxu1 %v7039_v43  ;;  %v7048_v43 = vld [vmem:[#allocation21_spill] sm:$0xff]  ;;  %v7057_v24 = vld [vmem:[#allocation30_spill] sm:$0xff]  ;;  %v7112_v11 = vld [vmem:[#allocation164_spill] sm:$0xff] }
 0x70b   :  { %2841 = vmatpush1.bf16.msra.mxu0 %v7040_v1  ;;  %2882 = vmatpush1.bf16.msra.mxu1 %v7041_v46  ;;  %v7049_v1 = vld [vmem:[#allocation22_spill] sm:$0xff]  ;;  %v7050_v46 = vld [vmem:[#allocation23_spill] sm:$0xff] }
 0x70c   :  { %2842 = vmatprep.subr.bf16.mxu0 %v7042_v61  ;;  %2883 = vmatprep.subr.bf16.mxu1 %v7043_v29  ;;  %v7051_v61 = vld [vmem:[#allocation24_spill] sm:$0xff]  ;;  %v7052_v29 = vld [vmem:[#allocation25_spill] sm:$0xff] }
 0x70f   :  { %2843 = vmatpush1.bf16.msra.mxu0 %v7044_v3  ;;  %2884 = vmatpush1.bf16.msra.mxu1 %v7045_v55  ;;  %v7053_v3 = vld [vmem:[#allocation26_spill] sm:$0xff]  ;;  %v7054_v55 = vld [vmem:[#allocation27_spill] sm:$0xff] }
 0x710   :  { %2952 = vmatprep.subr.bf16.mxu0 %v7046_v6  ;;  %2993 = vmatprep.subr.bf16.mxu1 %v7047_v62  ;;  %v7055_v6 = vld [vmem:[#allocation28_spill] sm:$0xff]  ;;  %v7056_v62 = vld [vmem:[#allocation29_spill] sm:$0xff] }
 0x712   :  { %2845 = vmatmul.mubr.bf16.vlgmr.msra.gmra.mrb[76].mxu0 %v5731_v28  ;;  %2886 = vmatmul.mubr.bf16.vlgmr.msra.gmra.mrb[76].mxu1 %v5731_v28  ;;  %v7058_v28 = vld [vmem:[#allocation31_spill] sm:$0xff] }
 0x713   :  { %2953 = vmatpush1.bf16.msra.mxu0 %v7048_v43  ;;  %2994 = vmatpush1.bf16.msra.mxu1 %v7049_v1  ;;  %v7059_v43 = vld [vmem:[#allocation32_spill] sm:$0xff]  ;;  %v7060_v1 = vld [vmem:[#allocation33_spill] sm:$0xff] }
 0x714   :  { %2954 = vmatprep.subr.bf16.mxu0 %v7050_v46  ;;  %2995 = vmatprep.subr.bf16.mxu1 %v7051_v61  ;;  %v7061_v46 = vld [vmem:[#allocation34_spill] sm:$0xff]  ;;  %v7062_v61 = vld [vmem:[#allocation35_spill] sm:$0xff] }
 0x717   :  { %2955 = vmatpush1.bf16.msra.mxu0 %v7052_v29  ;;  %2996 = vmatpush1.bf16.msra.mxu1 %v7053_v3  ;;  %v7063_v29 = vld [vmem:[#allocation36_spill] sm:$0xff]  ;;  %v7064_v3 = vld [vmem:[#allocation37_spill] sm:$0xff] }
 0x718   :  { %2956 = vmatprep.subr.bf16.mxu0 %v7054_v55  ;;  %2997 = vmatprep.subr.bf16.mxu1 %v7055_v6  ;;  %v7065_v55 = vld [vmem:[#allocation38_spill] sm:$0xff]  ;;  %v7066_v6 = vld [vmem:[#allocation39_spill] sm:$0xff] }
 0x71b   :  { %2957 = vmatpush1.bf16.msra.mxu0 %v7056_v62  ;;  %2998 = vmatpush1.bf16.msra.mxu1 %v7057_v24  ;;  %v7067_v62 = vld [vmem:[#allocation40_spill] sm:$0xff]  ;;  %v7068_v24 = vld [vmem:[#allocation41_spill] sm:$0xff] }
 0x71c   :  { %2958 = vmatprep.subr.bf16.mxu0 %v7058_v28  ;;  %2999 = vmatprep.subr.bf16.mxu1 %v7059_v43  ;;  %v7069_v28 = vld [vmem:[#allocation42_spill] sm:$0xff]  ;;  %v7070_v43 = vld [vmem:[#allocation43_spill] sm:$0xff] }
 0x71f   :  { %2959 = vmatpush1.bf16.msra.mxu0 %v7060_v1  ;;  %3000 = vmatpush1.bf16.msra.mxu1 %v7061_v46  ;;  %v7071_v1 = vld [vmem:[#allocation44_spill] sm:$0xff]  ;;  %v7072_v46 = vld [vmem:[#allocation45_spill] sm:$0xff] }
 0x720   :  { %2960 = vmatprep.subr.bf16.mxu0 %v7062_v61  ;;  %3001 = vmatprep.subr.bf16.mxu1 %v7063_v29  ;;  %v7073_v61 = vld [vmem:[#allocation46_spill] sm:$0xff]  ;;  %v7074_v29 = vld [vmem:[#allocation47_spill] sm:$0xff] }
 0x723   :  { %2961 = vmatpush1.bf16.msra.mxu0 %v7064_v3  ;;  %3002 = vmatpush1.bf16.msra.mxu1 %v7065_v55  ;;  %v7075_v3 = vld [vmem:[#allocation48_spill] sm:$0xff]  ;;  %v7076_v55 = vld [vmem:[#allocation49_spill] sm:$0xff] }
 0x724   :  { %2962 = vmatprep.subr.bf16.mxu0 %v7066_v6  ;;  %3003 = vmatprep.subr.bf16.mxu1 %v7067_v62  ;;  %v7077_v6 = vld [vmem:[#allocation50_spill] sm:$0xff]  ;;  %v7078_v62 = vld [vmem:[#allocation51_spill] sm:$0xff] }
 0x727   :  { %2963 = vmatpush1.bf16.msra.mxu0 %v7068_v24  ;;  %3004 = vmatpush1.bf16.msra.mxu1 %v7069_v28  ;;  %v7079_v24 = vld [vmem:[#allocation52_spill] sm:$0xff]  ;;  %v7080_v28 = vld [vmem:[#allocation53_spill] sm:$0xff] }
 0x728   :  { %2964 = vmatprep.subr.bf16.mxu0 %v7070_v43  ;;  %3005 = vmatprep.subr.bf16.mxu1 %v7071_v1  ;;  %v7081_v43 = vld [vmem:[#allocation54_spill] sm:$0xff]  ;;  %v7082_v1 = vld [vmem:[#allocation55_spill] sm:$0xff] }
 0x72b   :  { %2965 = vmatpush1.bf16.msra.mxu0 %v7072_v46  ;;  %3006 = vmatpush1.bf16.msra.mxu1 %v7073_v61  ;;  %v7083_v46 = vld [vmem:[#allocation56_spill] sm:$0xff]  ;;  %v7084_v61 = vld [vmem:[#allocation57_spill] sm:$0xff] }
 0x72c   :  { %2966 = vmatprep.subr.bf16.mxu0 %v7074_v29  ;;  %3007 = vmatprep.subr.bf16.mxu1 %v7075_v3  ;;  %v7085_v29 = vld [vmem:[#allocation58_spill] sm:$0xff]  ;;  %v7086_v3 = vld [vmem:[#allocation59_spill] sm:$0xff] }
 0x72f   :  { %2967 = vmatpush1.bf16.msra.mxu0 %v7076_v55  ;;  %3008 = vmatpush1.bf16.msra.mxu1 %v7077_v6  ;;  %v7087_v55 = vld [vmem:[#allocation60_spill] sm:$0xff]  ;;  %v7088_v6 = vld [vmem:[#allocation61_spill] sm:$0xff] }
 0x730   :  { %2968 = vmatprep.subr.bf16.mxu0 %v7078_v62  ;;  %3009 = vmatprep.subr.bf16.mxu1 %v7079_v24  ;;  %v7089_v62 = vld [vmem:[#allocation62_spill] sm:$0xff]  ;;  %v7090_v24 = vld [vmem:[#allocation63_spill] sm:$0xff] }
 0x733   :  { %2969 = vmatpush1.bf16.msra.mxu0 %v7080_v28  ;;  %3010 = vmatpush1.bf16.msra.mxu1 %v7081_v43  ;;  %v7091_v28 = vld [vmem:[#allocation64_spill] sm:$0xff]  ;;  %v7092_v43 = vld [vmem:[#allocation65_spill] sm:$0xff] }
 0x734   :  { %2970 = vmatprep.subr.bf16.mxu0 %v7082_v1  ;;  %3011 = vmatprep.subr.bf16.mxu1 %v7083_v46  ;;  %v7093_v1 = vld [vmem:[#allocation66_spill] sm:$0xff]  ;;  %v7094_v46 = vld [vmem:[#allocation67_spill] sm:$0xff] }
 0x737   :  { %2971 = vmatpush1.bf16.msra.mxu0 %v7084_v61  ;;  %3012 = vmatpush1.bf16.msra.mxu1 %v7085_v29  ;;  %v7095_v61 = vld [vmem:[#allocation68_spill] sm:$0xff]  ;;  %v7096_v29 = vld [vmem:[#allocation69_spill] sm:$0xff] }
 0x738   :  { %2972 = vmatprep.subr.bf16.mxu0 %v7086_v3  ;;  %3013 = vmatprep.subr.bf16.mxu1 %v7087_v55  ;;  %v7097_v3 = vld [vmem:[#allocation70_spill] sm:$0xff]  ;;  %v7098_v55 = vld [vmem:[#allocation71_spill] sm:$0xff] }
 0x73b   :  { %2973 = vmatpush1.bf16.msra.mxu0 %v7088_v6  ;;  %3014 = vmatpush1.bf16.msra.mxu1 %v7089_v62  ;;  %v7099_v6 = vld [vmem:[#allocation72_spill] sm:$0xff]  ;;  %v7100_v62 = vld [vmem:[#allocation73_spill] sm:$0xff] }
 0x73c   :  { %2974 = vmatprep.subr.bf16.mxu0 %v7090_v24  ;;  %3015 = vmatprep.subr.bf16.mxu1 %v7091_v28  ;;  %v7101_v24 = vld [vmem:[#allocation74_spill] sm:$0xff]  ;;  %v7102_v28 = vld [vmem:[#allocation75_spill] sm:$0xff] }
 0x73f   :  { %2975 = vmatpush1.bf16.msra.mxu0 %v7092_v43  ;;  %3016 = vmatpush1.bf16.msra.mxu1 %v7093_v1  ;;  %v7103_v43 = vld [vmem:[#allocation76_spill] sm:$0xff]  ;;  %v7104_v1 = vld [vmem:[#allocation77_spill] sm:$0xff] }
 0x740   :  { %2976 = vmatprep.subr.bf16.mxu0 %v7094_v46  ;;  %3017 = vmatprep.subr.bf16.mxu1 %v7095_v61  ;;  %v7105_v46 = vld [vmem:[#allocation78_spill] sm:$0xff]  ;;  %v7106_v61 = vld [vmem:[#allocation79_spill] sm:$0xff] }
 0x743   :  { %2977 = vmatpush1.bf16.msra.mxu0 %v7096_v29  ;;  %3018 = vmatpush1.bf16.msra.mxu1 %v7097_v3  ;;  %v7107_v29 = vld [vmem:[#allocation80_spill] sm:$0xff]  ;;  %v7108_v3 = vld [vmem:[#allocation81_spill] sm:$0xff] }
 0x744   :  { %2978 = vmatprep.subr.bf16.mxu0 %v7098_v55  ;;  %3019 = vmatprep.subr.bf16.mxu1 %v7099_v6  ;;  %v7109_v55 = vld [vmem:[#allocation82_spill] sm:$0xff]  ;;  %v7110_v6 = vld [vmem:[#allocation83_spill] sm:$0xff] }
 0x747   :  { %2979 = vmatpush1.bf16.msra.mxu0 %v7100_v62  ;;  %3020 = vmatpush1.bf16.msra.mxu1 %v7101_v24  ;;  %v7111_v62 = vld [vmem:[#allocation84_spill] sm:$0xff] }
 0x748   :  { %2980 = vmatprep.subr.bf16.mxu0 %v7102_v28  ;;  %3021 = vmatprep.subr.bf16.mxu1 %v7103_v43 }
 0x74b   :  { %2981 = vmatpush1.bf16.msra.mxu0 %v7104_v1  ;;  %3022 = vmatpush1.bf16.msra.mxu1 %v7105_v46 }
 0x74c   :  { %2982 = vmatprep.subr.bf16.mxu0 %v7106_v61  ;;  %3023 = vmatprep.subr.bf16.mxu1 %v7107_v29 }
 0x74f   :  { %2983 = vmatpush1.bf16.msra.mxu0 %v7108_v3  ;;  %3024 = vmatpush1.bf16.msra.mxu1 %v7109_v55 }
 0x750   :  { %3034 = vmatprep.subr.bf16.mxu0 %v7110_v6  ;;  %3075 = vmatprep.subr.bf16.mxu1 %v7111_v62 }
 0x7a5   :  { %v2764_v24 = vpop.f32.mrb[72].mxu0  ;;  %v2805_v28 = vpop.f32.mrb[72].mxu1 }
 0x7a6   :  { %v2894_v43 = vadd.f32 %v2764_v24, %v7112_v11  ;;  %v2896_v1 = vadd.f32 %v2805_v28, %v7113_v18  ;;  %v2766_v0 = vpop.f32.mrb[73].mxu0  ;;  %v2807_v46 = vpop.f32.mrb[73].mxu1 }
 0x7a7   :  { %v2895_v61 = vadd.f32 %v2766_v0, %v7114_v14  ;;  %v2897_v29 = vadd.f32 %v2807_v46, %v7115_v41  ;;  %v2768_v13 = vpop.f32.mrb[74].mxu0  ;;  %v2809_v3 = vpop.f32.mrb[74].mxu1 }
 0x7a8   :  { %v2769_v49 = vpop.f32.mrb[75].mxu0  ;;  %v2810_v55 = vpop.f32.mrb[75].mxu1  ;;  %v3840_v5 = vmul.f32 -1.442695, %v2894_v43  ;;  %v3842_v6 = vmul.f32 -1.442695, %v2896_v1 }
 0x7a9   :  { %v3841_v8 = vmul.f32 -1.442695, %v2895_v61  ;;  %v3843_v62 = vmul.f32 -1.442695, %v2897_v29  ;;  %v7116_v55 = vld [vmem:[#allocation192_spill] sm:$0xff]  ;;  %v7117_v1 = vld [vmem:[#allocation193_spill] sm:$0xff] }
 0x7aa   :  { %4112 = vpow2.f32 %v3840_v5  ;;  %v7119_v61 = vld [vmem:[#allocation195_spill] sm:$0xff] }
 0x7ab   :  { %4114 = vpow2.f32 %v3842_v6 }
 0x7ac   :  { %4116 = vpow2.f32 %v3841_v8 }
 0x7ad   :  { %4118 = vpow2.f32 %v3843_v62  ;;  %v7118_v62 = vld [vmem:[#allocation194_spill] sm:$0xff] }
 0x7b4   :  { %v4113_v11 = vpop.eup %4112 }
 0x7b5   :  { %v4115_v18 = vpop.eup %4114  ;;  %v2914_v17 = vadd.f32 1.0, %v4113_v11 }
 0x7b6   :  { %v4117_v24 = vpop.eup %4116  ;;  %v2916_v14 = vadd.f32 1.0, %v4115_v18 }
 0x7b7   :  { %v4119_v28 = vpop.eup %4118  ;;  %v2915_v0 = vadd.f32 1.0, %v4117_v24  ;;  %4120 = vrcp.f32 %v2914_v17 }
 0x7b8   :  { %v2917_v41 = vadd.f32 1.0, %v4119_v28  ;;  %4122 = vrcp.f32 %v2916_v14 }
 0x7b9   :  { %4124 = vrcp.f32 %v2915_v0 }
 0x7ba   :  { %4126 = vrcp.f32 %v2917_v41 }
 0x7c1   :  { %v4121_v14 = vpop.eup %4120 }
 0x7c2   :  { %v4123_v0 = vpop.eup %4122 }
 0x7e5   :  { %v2846_v49 = vpop.f32.mrb[76].mxu0  ;;  %v2887_v13 = vpop.f32.mrb[76].mxu1 }
 0x7e6   :  { %v2898_v43 = vadd.f32 %v2846_v49, %v7116_v55  ;;  %v2900_v5 = vadd.f32 %v2887_v13, %v7117_v1  ;;  %v2848_v6 = vpop.f32.mrb[77].mxu0  ;;  %v2889_v8 = vpop.f32.mrb[77].mxu1  ;;  %v2940_v1 = vmul.f32 %v4123_v0, %v5725_v44  ;;  %v7120_v0 = vld [vmem:[#allocation126_spill] sm:$0xff] }
 0x7e7   :  { %v2899_v46 = vadd.f32 %v2848_v6, %v7118_v62  ;;  %v2901_v29 = vadd.f32 %v2889_v8, %v7119_v61  ;;  %v2850_v3 = vpop.f32.mrb[78].mxu0  ;;  %v2891_v11 = vpop.f32.mrb[78].mxu1 }
 0x7e8   :  { %4128 = vtanh.f32 %v2898_v43  ;;  %v3844_v18 = vmul.f32 -1.442695, %v2900_v5  ;;  %v2851_v17 = vpop.f32.mrb[79].mxu0  ;;  %v2892_v24 = vpop.f32.mrb[79].mxu1 }
 0x7e9   :  { %4130 = vtanh.f32 %v2899_v46  ;;  %v3845_v28 = vmul.f32 -1.442695, %v2901_v29  ;;  %v4125_v49 = vpop.eup %4124 }
 0x7ea   :  { %4132 = vpow2.f32 %v3844_v18  ;;  %v4127_v13 = vpop.eup %4126 }
 0x7eb   :  { %4134 = vpow2.f32 %v3845_v28  ;;  %v2941_v62 = vmul.f32 %v4127_v13, %v5727_v54  ;;  %v7122_v13 = vld [vmem:[#allocation128_spill] sm:$0xff] }
 0x7f2   :  { %v4129_v55 = vpop.eup %4128 }
 0x7f3   :  { %v4131_v41 = vpop.eup %4130  ;;  %v2942_v6 = vmul.f32 %v4129_v55, %v4121_v14  ;;  %v7123_v55 = vld [vmem:[#allocation129_spill] sm:$0xff] }
 0x7f4   :  { %v4133_v8 = vpop.eup %4132  ;;  %v2943_v43 = vmul.f32 %v4131_v41, %v4125_v49  ;;  %v7121_v49 = vld [vmem:[#allocation127_spill] sm:$0xff]  ;;  %v7124_v41 = vld [vmem:[#allocation130_spill] sm:$0xff] }
 0x7f5   :  { %v4135_v5 = vpop.eup %4134  ;;  %v5875_v61 = vadd.f32 %v2942_v6, %v2940_v1  ;;  %v2934_v46 = vadd.f32 1.0, %v4133_v8  ;;  %v7125_v1 = vld [vmem:[#allocation131_spill] sm:$0xff]  ;;  %v7126_v6 = vld [vmem:[#allocation132_spill] sm:$0xff]  ;;  %v7127_v8 = vld [vmem:[#allocation133_spill] sm:$0xff] }
 0x7f6   :  { %v5877_v29 = vadd.f32 %v2943_v43, %v2941_v62  ;;  %v2935_v3 = vadd.f32 1.0, %v4135_v5  ;;  %v7128_v62 = vld [vmem:[#allocation134_spill] sm:$0xff]  ;;  %v7129_v43 = vld [vmem:[#allocation135_spill] sm:$0xff]  ;;  %v7130_v5 = vld [vmem:[#allocation136_spill] sm:$0xff] }
 0x7f7   :  { %4136 = vtanh.f32 %v5875_v61 }
 0x7f8   :  { %4138 = vrcp.f32 %v2934_v46  ;;  %v7131_v46 = vld [vmem:[#allocation137_spill] sm:$0xff] }
 0x7f9   :  { %4140 = vtanh.f32 %v5877_v29 }
 0x7fa   :  { %4142 = vrcp.f32 %v2935_v3  ;;  %v7132_v3 = vld [vmem:[#allocation138_spill] sm:$0xff] }
 0x801   :  { %v4137_v11 = vpop.eup %4136 }
 0x802   :  { %v4139_v44 = vpop.eup %4138 }
 0x803   :  { %v4141_v18 = vpop.eup %4140  ;;  %v2948_v24 = vmul.f32 %v4139_v44, %v4137_v11  ;;  %v7133_v11 = vld [vmem:[#allocation139_spill] sm:$0xff]  ;;  %v7134_v44 = vld [vmem:[#allocation140_spill] sm:$0xff] }
 0x804   :  { %v4143_v17 = vpop.eup %4142 }
 0x805   :  { %v2949_v54 = vmul.f32 %v4143_v17, %v4141_v18  ;;  %v5881_v14 = vpack.c.bf16 %v2948_v24, %v2948_v24  ;;  %v7135_v18 = vld [vmem:[#allocation141_spill] sm:$0xff]  ;;  %v7136_v17 = vld [vmem:[#allocation142_spill] sm:$0xff]  ;;  %v7137_v24 = vld [vmem:[#allocation143_spill] sm:$0xff] }
 0x807   :  { %v2951_v28 = vpack.c.bf16 %v2949_v54, %v2949_v54  ;;  %v7138_v54 = vld [vmem:[#allocation144_spill] sm:$0xff] }
 0x809   :  { %2984 = vmatprep.mubr.bf16.mxu0 %v2951_v28  ;;  %3025 = vmatprep.mubr.bf16.mxu1 %v2951_v28 }
 0x80a   :  { %2985 = vmatmul.mubr.bf16.vlgmr.msra.gmra.mrb[80].mxu0 %v5881_v14  ;;  %3026 = vmatmul.mubr.bf16.vlgmr.msra.gmra.mrb[80].mxu1 %v5881_v14 }
 0x80b   :  { %3035 = vmatpush1.bf16.msra.mxu0 %v6636_v53  ;;  %3076 = vmatpush1.bf16.msra.mxu1 %v6637_v34 }
 0x80c   :  { %3066 = vmatprep.mubr.bf16.mxu0 %v2951_v28  ;;  %3107 = vmatprep.mubr.bf16.mxu1 %v2951_v28  ;;  %v7139_v28 = vld [vmem:[#allocation145_spill] sm:$0xff] }
 0x80d   :  { %3036 = vmatprep.subr.bf16.mxu0 %v6638_v59  ;;  %3077 = vmatprep.subr.bf16.mxu1 %v6639_v35 }
 0x80f   :  { %3037 = vmatpush1.bf16.msra.mxu0 %v6640_v20  ;;  %3078 = vmatpush1.bf16.msra.mxu1 %v6641_v12 }
 0x810   :  { %3038 = vmatprep.subr.bf16.mxu0 %v6642_v9  ;;  %3079 = vmatprep.subr.bf16.mxu1 %v6643_v63 }
 0x813   :  { %3039 = vmatpush1.bf16.msra.mxu0 %v6644_v19  ;;  %3080 = vmatpush1.bf16.msra.mxu1 %v6645_v25 }
 0x814   :  { %3040 = vmatprep.subr.bf16.mxu0 %v6646_v52  ;;  %3081 = vmatprep.subr.bf16.mxu1 %v6647_v58 }
 0x817   :  { %3041 = vmatpush1.bf16.msra.mxu0 %v6648_v27  ;;  %3082 = vmatpush1.bf16.msra.mxu1 %v6649_v57 }
 0x818   :  { %3042 = vmatprep.subr.bf16.mxu0 %v6650_v50  ;;  %3083 = vmatprep.subr.bf16.mxu1 %v6651_v51 }
 0x81b   :  { %3043 = vmatpush1.bf16.msra.mxu0 %v6652_v60  ;;  %3084 = vmatpush1.bf16.msra.mxu1 %v6653_v42 }
 0x81c   :  { %3044 = vmatprep.subr.bf16.mxu0 %v6740_v30  ;;  %3085 = vmatprep.subr.bf16.mxu1 %v6741_v21 }
 0x81f   :  { %3045 = vmatpush1.bf16.msra.mxu0 %v6742_v22  ;;  %3086 = vmatpush1.bf16.msra.mxu1 %v6743_v40 }
 0x820   :  { %3046 = vmatprep.subr.bf16.mxu0 %v6744_v23  ;;  %3087 = vmatprep.subr.bf16.mxu1 %v6745_v47 }
 0x823   :  { %3047 = vmatpush1.bf16.msra.mxu0 %v6746_v33  ;;  %3088 = vmatpush1.bf16.msra.mxu1 %v6747_v15 }
 0x824   :  { %3048 = vmatprep.subr.bf16.mxu0 %v6748_v37  ;;  %3089 = vmatprep.subr.bf16.mxu1 %v6749_v45 }
 0x827   :  { %3049 = vmatpush1.bf16.msra.mxu0 %v6750_v16  ;;  %3090 = vmatpush1.bf16.msra.mxu1 %v6751_v48 }
 0x828   :  { %3050 = vmatprep.subr.bf16.mxu0 %v6752_v7  ;;  %3091 = vmatprep.subr.bf16.mxu1 %v6753_v32 }
 0x82b   :  { %3051 = vmatpush1.bf16.msra.mxu0 %v6754_v36  ;;  %3092 = vmatpush1.bf16.msra.mxu1 %v6755_v31 }
 0x82c   :  { %3052 = vmatprep.subr.bf16.mxu0 %v6756_v4  ;;  %3093 = vmatprep.subr.bf16.mxu1 %v6757_v38 }
 0x82f   :  { %3053 = vmatpush1.bf16.msra.mxu0 %v6758_v56  ;;  %3094 = vmatpush1.bf16.msra.mxu1 %v6673_v2 }
 0x830   :  { %3054 = vmatprep.subr.bf16.mxu0 %v6674_v10  ;;  %3095 = vmatprep.subr.bf16.mxu1 %v6675_v26 }
 0x833   :  { %3055 = vmatpush1.bf16.msra.mxu0 %v6759_v39  ;;  %3096 = vmatpush1.bf16.msra.mxu1 %v7120_v0 }
 0x834   :  { %3056 = vmatprep.subr.bf16.mxu0 %v7121_v49  ;;  %3097 = vmatprep.subr.bf16.mxu1 %v7122_v13 }
 0x837   :  { %3057 = vmatpush1.bf16.msra.mxu0 %v7123_v55  ;;  %3098 = vmatpush1.bf16.msra.mxu1 %v7124_v41 }
 0x838   :  { %3058 = vmatprep.subr.bf16.mxu0 %v7125_v1  ;;  %3099 = vmatprep.subr.bf16.mxu1 %v7126_v6  ;;  %v7209_v6 = vld [vmem:[#allocation170_spill] sm:$0xff]  ;;  %v7210_v1 = vld [vmem:[#allocation171_spill] sm:$0xff] }
 0x83b   :  { %3059 = vmatpush1.bf16.msra.mxu0 %v7127_v8  ;;  %3100 = vmatpush1.bf16.msra.mxu1 %v7128_v62  ;;  %v7208_v62 = vld [vmem:[#allocation169_spill] sm:$0xff] }
 0x83c   :  { %3060 = vmatprep.subr.bf16.mxu0 %v7129_v43  ;;  %3101 = vmatprep.subr.bf16.mxu1 %v7130_v5  ;;  %v7140_v43 = vld [vmem:[#allocation146_spill] sm:$0xff]  ;;  %v7141_v5 = vld [vmem:[#allocation19_spill] sm:$0xff] }
 0x83f   :  { %3061 = vmatpush1.bf16.msra.mxu0 %v7131_v46  ;;  %3102 = vmatpush1.bf16.msra.mxu1 %v7132_v3  ;;  %v7142_v46 = vld [vmem:[#allocation20_spill] sm:$0xff] }
 0x840   :  { %3062 = vmatprep.subr.bf16.mxu0 %v7133_v11  ;;  %3103 = vmatprep.subr.bf16.mxu1 %v7134_v44  ;;  %v7143_v44 = vld [vmem:[#allocation21_spill] sm:$0xff]  ;;  %v7152_v11 = vld [vmem:[#allocation30_spill] sm:$0xff]  ;;  %v7207_v3 = vld [vmem:[#allocation168_spill] sm:$0xff] }
 0x843   :  { %3063 = vmatpush1.bf16.msra.mxu0 %v7135_v18  ;;  %3104 = vmatpush1.bf16.msra.mxu1 %v7136_v17  ;;  %v7144_v18 = vld [vmem:[#allocation22_spill] sm:$0xff]  ;;  %v7145_v17 = vld [vmem:[#allocation23_spill] sm:$0xff] }
 0x844   :  { %3064 = vmatprep.subr.bf16.mxu0 %v7137_v24  ;;  %3105 = vmatprep.subr.bf16.mxu1 %v7138_v54  ;;  %v7146_v24 = vld [vmem:[#allocation24_spill] sm:$0xff]  ;;  %v7147_v54 = vld [vmem:[#allocation25_spill] sm:$0xff] }
 0x847   :  { %3065 = vmatpush1.bf16.msra.mxu0 %v7139_v28  ;;  %3106 = vmatpush1.bf16.msra.mxu1 %v7140_v43  ;;  %v7148_v28 = vld [vmem:[#allocation26_spill] sm:$0xff]  ;;  %v7149_v43 = vld [vmem:[#allocation27_spill] sm:$0xff] }
 0x848   :  { %3174 = vmatprep.subr.bf16.mxu0 %v7141_v5  ;;  %3215 = vmatprep.subr.bf16.mxu1 %v7142_v46  ;;  %v7150_v5 = vld [vmem:[#allocation28_spill] sm:$0xff]  ;;  %v7151_v46 = vld [vmem:[#allocation29_spill] sm:$0xff] }
 0x84a   :  { %3067 = vmatmul.mubr.bf16.vlgmr.msra.gmra.mrb[84].mxu0 %v5881_v14  ;;  %3108 = vmatmul.mubr.bf16.vlgmr.msra.gmra.mrb[84].mxu1 %v5881_v14  ;;  %v7153_v14 = vld [vmem:[#allocation31_spill] sm:$0xff] }
 0x84b   :  { %3175 = vmatpush1.bf16.msra.mxu0 %v7143_v44  ;;  %3216 = vmatpush1.bf16.msra.mxu1 %v7144_v18  ;;  %v7154_v44 = vld [vmem:[#allocation32_spill] sm:$0xff]  ;;  %v7155_v18 = vld [vmem:[#allocation33_spill] sm:$0xff] }
 0x84c   :  { %3176 = vmatprep.subr.bf16.mxu0 %v7145_v17  ;;  %3217 = vmatprep.subr.bf16.mxu1 %v7146_v24  ;;  %v7156_v17 = vld [vmem:[#allocation34_spill] sm:$0xff]  ;;  %v7157_v24 = vld [vmem:[#allocation35_spill] sm:$0xff] }
 0x84f   :  { %3177 = vmatpush1.bf16.msra.mxu0 %v7147_v54  ;;  %3218 = vmatpush1.bf16.msra.mxu1 %v7148_v28  ;;  %v7158_v54 = vld [vmem:[#allocation36_spill] sm:$0xff]  ;;  %v7159_v28 = vld [vmem:[#allocation37_spill] sm:$0xff] }
 0x850   :  { %3178 = vmatprep.subr.bf16.mxu0 %v7149_v43  ;;  %3219 = vmatprep.subr.bf16.mxu1 %v7150_v5  ;;  %v7160_v43 = vld [vmem:[#allocation38_spill] sm:$0xff]  ;;  %v7161_v5 = vld [vmem:[#allocation39_spill] sm:$0xff] }
 0x853   :  { %3179 = vmatpush1.bf16.msra.mxu0 %v7151_v46  ;;  %3220 = vmatpush1.bf16.msra.mxu1 %v7152_v11  ;;  %v7162_v46 = vld [vmem:[#allocation40_spill] sm:$0xff]  ;;  %v7163_v11 = vld [vmem:[#allocation41_spill] sm:$0xff] }
 0x854   :  { %3180 = vmatprep.subr.bf16.mxu0 %v7153_v14  ;;  %3221 = vmatprep.subr.bf16.mxu1 %v7154_v44  ;;  %v7164_v14 = vld [vmem:[#allocation42_spill] sm:$0xff]  ;;  %v7165_v44 = vld [vmem:[#allocation43_spill] sm:$0xff] }
 0x857   :  { %3181 = vmatpush1.bf16.msra.mxu0 %v7155_v18  ;;  %3222 = vmatpush1.bf16.msra.mxu1 %v7156_v17  ;;  %v7166_v18 = vld [vmem:[#allocation44_spill] sm:$0xff]  ;;  %v7167_v17 = vld [vmem:[#allocation45_spill] sm:$0xff] }
 0x858   :  { %3182 = vmatprep.subr.bf16.mxu0 %v7157_v24  ;;  %3223 = vmatprep.subr.bf16.mxu1 %v7158_v54  ;;  %v7168_v24 = vld [vmem:[#allocation46_spill] sm:$0xff]  ;;  %v7169_v54 = vld [vmem:[#allocation47_spill] sm:$0xff] }
 0x85b   :  { %3183 = vmatpush1.bf16.msra.mxu0 %v7159_v28  ;;  %3224 = vmatpush1.bf16.msra.mxu1 %v7160_v43  ;;  %v7170_v28 = vld [vmem:[#allocation48_spill] sm:$0xff]  ;;  %v7171_v43 = vld [vmem:[#allocation49_spill] sm:$0xff] }
 0x85c   :  { %3184 = vmatprep.subr.bf16.mxu0 %v7161_v5  ;;  %3225 = vmatprep.subr.bf16.mxu1 %v7162_v46  ;;  %v7172_v5 = vld [vmem:[#allocation50_spill] sm:$0xff]  ;;  %v7173_v46 = vld [vmem:[#allocation51_spill] sm:$0xff] }
 0x85f   :  { %3185 = vmatpush1.bf16.msra.mxu0 %v7163_v11  ;;  %3226 = vmatpush1.bf16.msra.mxu1 %v7164_v14  ;;  %v7174_v11 = vld [vmem:[#allocation52_spill] sm:$0xff]  ;;  %v7175_v14 = vld [vmem:[#allocation53_spill] sm:$0xff] }
 0x860   :  { %3186 = vmatprep.subr.bf16.mxu0 %v7165_v44  ;;  %3227 = vmatprep.subr.bf16.mxu1 %v7166_v18  ;;  %v7176_v44 = vld [vmem:[#allocation54_spill] sm:$0xff]  ;;  %v7177_v18 = vld [vmem:[#allocation55_spill] sm:$0xff] }
 0x863   :  { %3187 = vmatpush1.bf16.msra.mxu0 %v7167_v17  ;;  %3228 = vmatpush1.bf16.msra.mxu1 %v7168_v24  ;;  %v7178_v17 = vld [vmem:[#allocation56_spill] sm:$0xff]  ;;  %v7179_v24 = vld [vmem:[#allocation57_spill] sm:$0xff] }
 0x864   :  { %3188 = vmatprep.subr.bf16.mxu0 %v7169_v54  ;;  %3229 = vmatprep.subr.bf16.mxu1 %v7170_v28  ;;  %v7180_v54 = vld [vmem:[#allocation58_spill] sm:$0xff]  ;;  %v7181_v28 = vld [vmem:[#allocation59_spill] sm:$0xff] }
 0x867   :  { %3189 = vmatpush1.bf16.msra.mxu0 %v7171_v43  ;;  %3230 = vmatpush1.bf16.msra.mxu1 %v7172_v5  ;;  %v7182_v43 = vld [vmem:[#allocation60_spill] sm:$0xff]  ;;  %v7183_v5 = vld [vmem:[#allocation61_spill] sm:$0xff] }
 0x868   :  { %3190 = vmatprep.subr.bf16.mxu0 %v7173_v46  ;;  %3231 = vmatprep.subr.bf16.mxu1 %v7174_v11  ;;  %v7184_v46 = vld [vmem:[#allocation62_spill] sm:$0xff]  ;;  %v7185_v11 = vld [vmem:[#allocation63_spill] sm:$0xff] }
 0x86b   :  { %3191 = vmatpush1.bf16.msra.mxu0 %v7175_v14  ;;  %3232 = vmatpush1.bf16.msra.mxu1 %v7176_v44  ;;  %v7186_v14 = vld [vmem:[#allocation64_spill] sm:$0xff]  ;;  %v7187_v44 = vld [vmem:[#allocation65_spill] sm:$0xff] }
 0x86c   :  { %3192 = vmatprep.subr.bf16.mxu0 %v7177_v18  ;;  %3233 = vmatprep.subr.bf16.mxu1 %v7178_v17  ;;  %v7188_v18 = vld [vmem:[#allocation66_spill] sm:$0xff]  ;;  %v7189_v17 = vld [vmem:[#allocation67_spill] sm:$0xff] }
 0x86f   :  { %3193 = vmatpush1.bf16.msra.mxu0 %v7179_v24  ;;  %3234 = vmatpush1.bf16.msra.mxu1 %v7180_v54  ;;  %v7190_v24 = vld [vmem:[#allocation68_spill] sm:$0xff]  ;;  %v7191_v54 = vld [vmem:[#allocation69_spill] sm:$0xff] }
 0x870   :  { %3194 = vmatprep.subr.bf16.mxu0 %v7181_v28  ;;  %3235 = vmatprep.subr.bf16.mxu1 %v7182_v43  ;;  %v7192_v28 = vld [vmem:[#allocation70_spill] sm:$0xff]  ;;  %v7193_v43 = vld [vmem:[#allocation71_spill] sm:$0xff] }
 0x873   :  { %3195 = vmatpush1.bf16.msra.mxu0 %v7183_v5  ;;  %3236 = vmatpush1.bf16.msra.mxu1 %v7184_v46  ;;  %v7194_v5 = vld [vmem:[#allocation72_spill] sm:$0xff]  ;;  %v7195_v46 = vld [vmem:[#allocation73_spill] sm:$0xff] }
 0x874   :  { %3196 = vmatprep.subr.bf16.mxu0 %v7185_v11  ;;  %3237 = vmatprep.subr.bf16.mxu1 %v7186_v14  ;;  %v7196_v11 = vld [vmem:[#allocation74_spill] sm:$0xff]  ;;  %v7197_v14 = vld [vmem:[#allocation75_spill] sm:$0xff] }
 0x877   :  { %3197 = vmatpush1.bf16.msra.mxu0 %v7187_v44  ;;  %3238 = vmatpush1.bf16.msra.mxu1 %v7188_v18  ;;  %v7198_v44 = vld [vmem:[#allocation76_spill] sm:$0xff]  ;;  %v7199_v18 = vld [vmem:[#allocation77_spill] sm:$0xff] }
 0x878   :  { %3198 = vmatprep.subr.bf16.mxu0 %v7189_v17  ;;  %3239 = vmatprep.subr.bf16.mxu1 %v7190_v24  ;;  %v7200_v17 = vld [vmem:[#allocation78_spill] sm:$0xff]  ;;  %v7201_v24 = vld [vmem:[#allocation79_spill] sm:$0xff] }
 0x87b   :  { %3199 = vmatpush1.bf16.msra.mxu0 %v7191_v54  ;;  %3240 = vmatpush1.bf16.msra.mxu1 %v7192_v28  ;;  %v7202_v54 = vld [vmem:[#allocation80_spill] sm:$0xff]  ;;  %v7203_v28 = vld [vmem:[#allocation81_spill] sm:$0xff] }
 0x87c   :  { %3200 = vmatprep.subr.bf16.mxu0 %v7193_v43  ;;  %3241 = vmatprep.subr.bf16.mxu1 %v7194_v5  ;;  %v7204_v43 = vld [vmem:[#allocation82_spill] sm:$0xff]  ;;  %v7205_v5 = vld [vmem:[#allocation83_spill] sm:$0xff] }
 0x87f   :  { %3201 = vmatpush1.bf16.msra.mxu0 %v7195_v46  ;;  %3242 = vmatpush1.bf16.msra.mxu1 %v7196_v11  ;;  %v7206_v46 = vld [vmem:[#allocation84_spill] sm:$0xff] }
 0x880   :  { %3202 = vmatprep.subr.bf16.mxu0 %v7197_v14  ;;  %3243 = vmatprep.subr.bf16.mxu1 %v7198_v44 }
 0x883   :  { %3203 = vmatpush1.bf16.msra.mxu0 %v7199_v18  ;;  %3244 = vmatpush1.bf16.msra.mxu1 %v7200_v17 }
 0x884   :  { %3204 = vmatprep.subr.bf16.mxu0 %v7201_v24  ;;  %3245 = vmatprep.subr.bf16.mxu1 %v7202_v54 }
 0x887   :  { %3205 = vmatpush1.bf16.msra.mxu0 %v7203_v28  ;;  %3246 = vmatpush1.bf16.msra.mxu1 %v7204_v43 }
 0x888   :  { %3256 = vmatprep.subr.bf16.mxu0 %v7205_v5  ;;  %3297 = vmatprep.subr.bf16.mxu1 %v7206_v46 }
 0x8dd   :  { %v2986_v11 = vpop.f32.mrb[80].mxu0  ;;  %v3027_v14 = vpop.f32.mrb[80].mxu1 }
 0x8de   :  { %v3116_v44 = vadd.f32 %v2986_v11, %v7207_v3  ;;  %v3118_v18 = vadd.f32 %v3027_v14, %v7208_v62  ;;  %v2988_v8 = vpop.f32.mrb[81].mxu0  ;;  %v3029_v17 = vpop.f32.mrb[81].mxu1 }
 0x8df   :  { %v3117_v24 = vadd.f32 %v2988_v8, %v7209_v6  ;;  %v3119_v54 = vadd.f32 %v3029_v17, %v7210_v1  ;;  %v2990_v41 = vpop.f32.mrb[82].mxu0  ;;  %v3031_v28 = vpop.f32.mrb[82].mxu1  ;;  %v7212_v17 = vld [vmem:[#allocation197_spill] sm:$0xff] }
 0x8e0   :  { %v2991_v55 = vpop.f32.mrb[83].mxu0  ;;  %v3032_v43 = vpop.f32.mrb[83].mxu1  ;;  %v3846_v13 = vmul.f32 -1.442695, %v3116_v44  ;;  %v3848_v5 = vmul.f32 -1.442695, %v3118_v18 }
 0x8e1   :  { %v3847_v49 = vmul.f32 -1.442695, %v3117_v24  ;;  %v3849_v46 = vmul.f32 -1.442695, %v3119_v54  ;;  %v7211_v44 = vld [vmem:[#allocation196_spill] sm:$0xff]  ;;  %v7213_v54 = vld [vmem:[#allocation198_spill] sm:$0xff] }
 0x8e2   :  { %4144 = vpow2.f32 %v3846_v13  ;;  %v7214_v43 = vld [vmem:[#allocation199_spill] sm:$0xff] }
 0x8e3   :  { %4146 = vpow2.f32 %v3848_v5 }
 0x8e4   :  { %4148 = vpow2.f32 %v3847_v49 }
 0x8e5   :  { %4150 = vpow2.f32 %v3849_v46 }
 0x8ec   :  { %v4145_v3 = vpop.eup %4144 }
 0x8ed   :  { %v4147_v62 = vpop.eup %4146  ;;  %v3136_v0 = vadd.f32 1.0, %v4145_v3 }
 0x8ee   :  { %v4149_v11 = vpop.eup %4148  ;;  %v3138_v6 = vadd.f32 1.0, %v4147_v62 }
 0x8ef   :  { %v4151_v14 = vpop.eup %4150  ;;  %v3137_v8 = vadd.f32 1.0, %v4149_v11  ;;  %4152 = vrcp.f32 %v3136_v0 }
 0x8f0   :  { %v3139_v1 = vadd.f32 1.0, %v4151_v14  ;;  %4154 = vrcp.f32 %v3138_v6 }
 0x8f1   :  { %4156 = vrcp.f32 %v3137_v8 }
 0x8f2   :  { %4158 = vrcp.f32 %v3139_v1 }
 0x8f9   :  { %v4153_v6 = vpop.eup %4152 }
 0x8fa   :  { %v4155_v8 = vpop.eup %4154 }
 0x91d   :  { %v3068_v55 = vpop.f32.mrb[84].mxu0  ;;  %v3109_v41 = vpop.f32.mrb[84].mxu1 }
 0x91e   :  { %v3120_v18 = vadd.f32 %v3068_v55, %v7211_v44  ;;  %v3122_v13 = vadd.f32 %v3109_v41, %v7212_v17  ;;  %v3070_v24 = vpop.f32.mrb[85].mxu0  ;;  %v3111_v49 = vpop.f32.mrb[85].mxu1  ;;  %v3162_v17 = vmul.f32 %v4155_v8, %v5875_v61 }
 0x91f   :  { %v3121_v28 = vadd.f32 %v3070_v24, %v7213_v54  ;;  %v3123_v5 = vadd.f32 %v3111_v49, %v7214_v43  ;;  %v3072_v46 = vpop.f32.mrb[86].mxu0  ;;  %v3113_v3 = vpop.f32.mrb[86].mxu1 }
 0x920   :  { %4160 = vtanh.f32 %v3120_v18  ;;  %v3850_v62 = vmul.f32 -1.442695, %v3122_v13  ;;  %v3073_v0 = vpop.f32.mrb[87].mxu0  ;;  %v3114_v11 = vpop.f32.mrb[87].mxu1 }
 0x921   :  { %4162 = vtanh.f32 %v3121_v28  ;;  %v3851_v14 = vmul.f32 -1.442695, %v3123_v5  ;;  %v4157_v55 = vpop.eup %4156 }
 0x922   :  { %4164 = vpow2.f32 %v3850_v62  ;;  %v4159_v41 = vpop.eup %4158 }
 0x923   :  { %4166 = vpow2.f32 %v3851_v14  ;;  %v3163_v54 = vmul.f32 %v4159_v41, %v5877_v29 }
 0x92a   :  { %v4161_v44 = vpop.eup %4160 }
 0x92b   :  { %v4163_v1 = vpop.eup %4162  ;;  %v3164_v24 = vmul.f32 %v4161_v44, %v4153_v6 }
 0x92c   :  { %v4165_v49 = vpop.eup %4164  ;;  %v3165_v18 = vmul.f32 %v4163_v1, %v4157_v55 }
 0x92d   :  { %v4167_v13 = vpop.eup %4166  ;;  %v6025_v43 = vadd.f32 %v3164_v24, %v3162_v17  ;;  %v3156_v28 = vadd.f32 1.0, %v4165_v49 }
 0x92e   :  { %v6027_v5 = vadd.f32 %v3165_v18, %v3163_v54  ;;  %v3157_v46 = vadd.f32 1.0, %v4167_v13  ;;  %v7240_v13 = vld [vmem:[#allocation200_spill] sm:$0xff] }
 0x92f   :  { %4168 = vtanh.f32 %v6025_v43 }
 0x930   :  { %4170 = vrcp.f32 %v3156_v28 }
 0x931   :  { %4172 = vtanh.f32 %v6027_v5 }
 0x932   :  { %4174 = vrcp.f32 %v3157_v46  ;;  %v7241_v46 = vld [vmem:[#allocation201_spill] sm:$0xff] }
 0x939   :  { %v4169_v3 = vpop.eup %4168 }
 0x93a   :  { %v4171_v61 = vpop.eup %4170 }
 0x93b   :  { %v4173_v62 = vpop.eup %4172  ;;  %v3170_v11 = vmul.f32 %v4171_v61, %v4169_v3 }
 0x93c   :  { %v4175_v0 = vpop.eup %4174 }
 0x93d   :  { %v3171_v29 = vmul.f32 %v4175_v0, %v4173_v62  ;;  %v6031_v6 = vpack.c.bf16 %v3170_v11, %v3170_v11  ;;  %v7242_v0 = vld [vmem:[#allocation202_spill] sm:$0xff] }
 0x93f   :  { %v3173_v14 = vpack.c.bf16 %v3171_v29, %v3171_v29  ;;  %v7243_v29 = vld [vmem:[#allocation203_spill] sm:$0xff] }
 0x941   :  { %3206 = vmatprep.mubr.bf16.mxu0 %v3173_v14  ;;  %3247 = vmatprep.mubr.bf16.mxu1 %v3173_v14 }
 0x942   :  { %3207 = vmatmul.mubr.bf16.vlgmr.msra.gmra.mrb[88].mxu0 %v6031_v6  ;;  %3248 = vmatmul.mubr.bf16.vlgmr.msra.gmra.mrb[88].mxu1 %v6031_v6 }
 0x943   :  { %3257 = vmatpush1.bf16.msra.mxu0 %v6636_v53  ;;  %3298 = vmatpush1.bf16.msra.mxu1 %v6637_v34  ;;  %v7215_v53 = vld [vmem:[#allocation126_spill] sm:$0xff]  ;;  %v7216_v34 = vld [vmem:[#allocation127_spill] sm:$0xff] }
 0x944   :  { %3288 = vmatprep.mubr.bf16.mxu0 %v3173_v14  ;;  %3329 = vmatprep.mubr.bf16.mxu1 %v3173_v14 }
 0x945   :  { %3258 = vmatprep.subr.bf16.mxu0 %v6638_v59  ;;  %3299 = vmatprep.subr.bf16.mxu1 %v6639_v35  ;;  %v7217_v59 = vld [vmem:[#allocation128_spill] sm:$0xff]  ;;  %v7218_v35 = vld [vmem:[#allocation129_spill] sm:$0xff] }
 0x947   :  { %3259 = vmatpush1.bf16.msra.mxu0 %v6640_v20  ;;  %3300 = vmatpush1.bf16.msra.mxu1 %v6641_v12  ;;  %v7219_v20 = vld [vmem:[#allocation130_spill] sm:$0xff]  ;;  %v7220_v12 = vld [vmem:[#allocation131_spill] sm:$0xff] }
 0x948   :  { %3260 = vmatprep.subr.bf16.mxu0 %v6642_v9  ;;  %3301 = vmatprep.subr.bf16.mxu1 %v6643_v63  ;;  %v7221_v9 = vld [vmem:[#allocation132_spill] sm:$0xff]  ;;  %v7222_v63 = vld [vmem:[#allocation133_spill] sm:$0xff] }
 0x94b   :  { %3261 = vmatpush1.bf16.msra.mxu0 %v6644_v19  ;;  %3302 = vmatpush1.bf16.msra.mxu1 %v6645_v25  ;;  %v7223_v19 = vld [vmem:[#allocation134_spill] sm:$0xff]  ;;  %v7224_v25 = vld [vmem:[#allocation135_spill] sm:$0xff] }
 0x94c   :  { %3262 = vmatprep.subr.bf16.mxu0 %v6646_v52  ;;  %3303 = vmatprep.subr.bf16.mxu1 %v6647_v58  ;;  %v7225_v52 = vld [vmem:[#allocation136_spill] sm:$0xff]  ;;  %v7226_v58 = vld [vmem:[#allocation137_spill] sm:$0xff] }
 0x94f   :  { %3263 = vmatpush1.bf16.msra.mxu0 %v6648_v27  ;;  %3304 = vmatpush1.bf16.msra.mxu1 %v6649_v57  ;;  %v7227_v27 = vld [vmem:[#allocation138_spill] sm:$0xff]  ;;  %v7228_v57 = vld [vmem:[#allocation139_spill] sm:$0xff] }
 0x950   :  { %3264 = vmatprep.subr.bf16.mxu0 %v6650_v50  ;;  %3305 = vmatprep.subr.bf16.mxu1 %v6651_v51  ;;  %v7229_v50 = vld [vmem:[#allocation140_spill] sm:$0xff]  ;;  %v7230_v51 = vld [vmem:[#allocation141_spill] sm:$0xff] }
 0x953   :  { %3265 = vmatpush1.bf16.msra.mxu0 %v6652_v60  ;;  %3306 = vmatpush1.bf16.msra.mxu1 %v6653_v42  ;;  %v7231_v60 = vld [vmem:[#allocation142_spill] sm:$0xff]  ;;  %v7232_v42 = vld [vmem:[#allocation143_spill] sm:$0xff] }
 0x954   :  { %3266 = vmatprep.subr.bf16.mxu0 %v6740_v30  ;;  %3307 = vmatprep.subr.bf16.mxu1 %v6741_v21 }
 0x957   :  { %3267 = vmatpush1.bf16.msra.mxu0 %v6742_v22  ;;  %3308 = vmatpush1.bf16.msra.mxu1 %v6743_v40  ;;  %v7236_v22 = vld [vmem:[#allocation172_spill] sm:$0xff] }
 0x958   :  { %3268 = vmatprep.subr.bf16.mxu0 %v6744_v23  ;;  %3309 = vmatprep.subr.bf16.mxu1 %v6745_v47  ;;  %v7237_v23 = vld [vmem:[#allocation173_spill] sm:$0xff] }
 0x95b   :  { %3269 = vmatpush1.bf16.msra.mxu0 %v6746_v33  ;;  %3310 = vmatpush1.bf16.msra.mxu1 %v6747_v15 }
 0x95c   :  { %3270 = vmatprep.subr.bf16.mxu0 %v6748_v37  ;;  %3311 = vmatprep.subr.bf16.mxu1 %v6749_v45  ;;  %v7238_v37 = vld [vmem:[#allocation174_spill] sm:$0xff] }
 0x95f   :  { %3271 = vmatpush1.bf16.msra.mxu0 %v6750_v16  ;;  %3312 = vmatpush1.bf16.msra.mxu1 %v6751_v48  ;;  %v7239_v16 = vld [vmem:[#allocation175_spill] sm:$0xff] }
 0x960   :  { %3272 = vmatprep.subr.bf16.mxu0 %v6752_v7  ;;  %3313 = vmatprep.subr.bf16.mxu1 %v6753_v32 }
 0x963   :  { %3273 = vmatpush1.bf16.msra.mxu0 %v6754_v36  ;;  %3314 = vmatpush1.bf16.msra.mxu1 %v6755_v31 }
 0x964   :  { %3274 = vmatprep.subr.bf16.mxu0 %v6756_v4  ;;  %3315 = vmatprep.subr.bf16.mxu1 %v6757_v38 }
 0x967   :  { %3275 = vmatpush1.bf16.msra.mxu0 %v6758_v56  ;;  %3316 = vmatpush1.bf16.msra.mxu1 %v6673_v2  ;;  %v7233_v2 = vld [vmem:[#allocation144_spill] sm:$0xff] }
 0x968   :  { %3276 = vmatprep.subr.bf16.mxu0 %v6674_v10  ;;  %3317 = vmatprep.subr.bf16.mxu1 %v6675_v26  ;;  %v7234_v10 = vld [vmem:[#allocation145_spill] sm:$0xff]  ;;  %v7235_v26 = vld [vmem:[#allocation146_spill] sm:$0xff] }
 0x96b   :  { %3277 = vmatpush1.bf16.msra.mxu0 %v6759_v39  ;;  %3318 = vmatpush1.bf16.msra.mxu1 %v7215_v53 }
 0x96c   :  { %3278 = vmatprep.subr.bf16.mxu0 %v7216_v34  ;;  %3319 = vmatprep.subr.bf16.mxu1 %v7217_v59 }
 0x96f   :  { %3279 = vmatpush1.bf16.msra.mxu0 %v7218_v35  ;;  %3320 = vmatpush1.bf16.msra.mxu1 %v7219_v20 }
 0x970   :  { %3280 = vmatprep.subr.bf16.mxu0 %v7220_v12  ;;  %3321 = vmatprep.subr.bf16.mxu1 %v7221_v9 }
 0x973   :  { %3281 = vmatpush1.bf16.msra.mxu0 %v7222_v63  ;;  %3322 = vmatpush1.bf16.msra.mxu1 %v7223_v19 }
 0x974   :  { %3282 = vmatprep.subr.bf16.mxu0 %v7224_v25  ;;  %3323 = vmatprep.subr.bf16.mxu1 %v7225_v52 }
 0x977   :  { %3283 = vmatpush1.bf16.msra.mxu0 %v7226_v58  ;;  %3324 = vmatpush1.bf16.msra.mxu1 %v7227_v27 }
 0x978   :  { %3284 = vmatprep.subr.bf16.mxu0 %v7228_v57  ;;  %3325 = vmatprep.subr.bf16.mxu1 %v7229_v50 }
 0x97b   :  { %3285 = vmatpush1.bf16.msra.mxu0 %v7230_v51  ;;  %3326 = vmatpush1.bf16.msra.mxu1 %v7231_v60 }
 0x97c   :  { %3286 = vmatprep.subr.bf16.mxu0 %v7232_v42  ;;  %3327 = vmatprep.subr.bf16.mxu1 %v7233_v2 }
 0x97f   :  { %3287 = vmatpush1.bf16.msra.mxu0 %v7234_v10  ;;  %3328 = vmatpush1.bf16.msra.mxu1 %v7235_v26 }
 0x982   :  { %3289 = vmatmul.mubr.bf16.vlgmr.msra.gmra.mrb[92].mxu0 %v6031_v6  ;;  %3330 = vmatmul.mubr.bf16.vlgmr.msra.gmra.mrb[92].mxu1 %v6031_v6 }
 0xa15   :  { %v3208_v30 = vpop.f32.mrb[88].mxu0  ;;  %v3249_v21 = vpop.f32.mrb[88].mxu1 }
 0xa16   :  { %v3338_v40 = vadd.f32 %v3208_v30, %v7236_v22  ;;  %v3340_v47 = vadd.f32 %v3249_v21, %v7237_v23  ;;  %v3210_v33 = vpop.f32.mrb[89].mxu0  ;;  %v3251_v15 = vpop.f32.mrb[89].mxu1 }
 0xa17   :  { %v3339_v45 = vadd.f32 %v3210_v33, %v7238_v37  ;;  %v3341_v48 = vadd.f32 %v3251_v15, %v7239_v16  ;;  %v3212_v7 = vpop.f32.mrb[90].mxu0  ;;  %v3253_v32 = vpop.f32.mrb[90].mxu1 }
 0xa18   :  { %v3213_v36 = vpop.f32.mrb[91].mxu0  ;;  %v3254_v31 = vpop.f32.mrb[91].mxu1  ;;  %v3852_v4 = vmul.f32 -1.442695, %v3338_v40  ;;  %v3854_v38 = vmul.f32 -1.442695, %v3340_v47 }
 0xa19   :  { %v3853_v56 = vmul.f32 -1.442695, %v3339_v45  ;;  %v3855_v39 = vmul.f32 -1.442695, %v3341_v48 }
 0xa1a   :  { %4176 = vpow2.f32 %v3852_v4 }
 0xa1b   :  { %4178 = vpow2.f32 %v3854_v38 }
 0xa1c   :  { %4180 = vpow2.f32 %v3853_v56 }
 0xa1d   :  { %4182 = vpow2.f32 %v3855_v39 }
 0xa24   :  { %v4177_v8 = vpop.eup %4176 }
 0xa25   :  { %v4179_v55 = vpop.eup %4178  ;;  %v3358_v1 = vadd.f32 1.0, %v4177_v8 }
 0xa26   :  { %v4181_v41 = vpop.eup %4180  ;;  %v3360_v17 = vadd.f32 1.0, %v4179_v55 }
 0xa27   :  { %v4183_v44 = vpop.eup %4182  ;;  %v3359_v24 = vadd.f32 1.0, %v4181_v41  ;;  %4184 = vrcp.f32 %v3358_v1 }
 0xa28   :  { %v3361_v49 = vadd.f32 1.0, %v4183_v44  ;;  %4186 = vrcp.f32 %v3360_v17 }
 0xa29   :  { %4188 = vrcp.f32 %v3359_v24 }
 0xa2a   :  { %4190 = vrcp.f32 %v3361_v49 }
 0xa31   :  { %v4185_v12 = vpop.eup %4184 }
 0xa32   :  { %v4187_v9 = vpop.eup %4186 }
 0xa33   :  { %v4189_v63 = vpop.eup %4188  ;;  %v3384_v58 = vmul.f32 %v4187_v9, %v6025_v43 }
 0xa34   :  { %v4191_v19 = vpop.eup %4190 }
 0xa35   :  { %v3385_v50 = vmul.f32 %v4191_v19, %v6027_v5 }
 0xa55   :  { %v3290_v54 = vpop.f32.mrb[92].mxu0  ;;  %v3331_v18 = vpop.f32.mrb[92].mxu1 }
 0xa56   :  { %v3342_v28 = vadd.f32 %v3290_v54, %v7240_v13  ;;  %v3344_v3 = vadd.f32 %v3331_v18, %v7241_v46  ;;  %v3292_v61 = vpop.f32.mrb[93].mxu0  ;;  %v3333_v62 = vpop.f32.mrb[93].mxu1 }
 0xa57   :  { %v3343_v11 = vadd.f32 %v3292_v61, %v7242_v0  ;;  %v3345_v14 = vadd.f32 %v3333_v62, %v7243_v29  ;;  %v3294_v6 = vpop.f32.mrb[94].mxu0  ;;  %v3335_v53 = vpop.f32.mrb[94].mxu1 }
 0xa58   :  { %4192 = vtanh.f32 %v3342_v28  ;;  %v3856_v34 = vmul.f32 -1.442695, %v3344_v3  ;;  %v3295_v59 = vpop.f32.mrb[95].mxu0  ;;  %v3336_v35 = vpop.f32.mrb[95].mxu1 }
 0xa59   :  { %4194 = vtanh.f32 %v3343_v11  ;;  %v3857_v20 = vmul.f32 -1.442695, %v3345_v14 }
 0xa5a   :  { %4196 = vpow2.f32 %v3856_v34 }
 0xa5b   :  { %4198 = vpow2.f32 %v3857_v20 }
 0xa62   :  { %v4193_v25 = vpop.eup %4192 }
 0xa63   :  { %v4195_v52 = vpop.eup %4194  ;;  %v3386_v27 = vmul.f32 %v4193_v25, %v4185_v12 }
 0xa64   :  { %v4197_v57 = vpop.eup %4196  ;;  %v3387_v51 = vmul.f32 %v4195_v52, %v4189_v63 }
 0xa65   :  { %v4199_v60 = vpop.eup %4198  ;;  %v3388_v42 = vadd.f32 %v3386_v27, %v3384_v58  ;;  %v3378_v2 = vadd.f32 1.0, %v4197_v57 }
 0xa66   :  { %v3389_v10 = vadd.f32 %v3387_v51, %v3385_v50  ;;  %v3379_v26 = vadd.f32 1.0, %v4199_v60 }
 0xa67   :  { %4200 = vtanh.f32 %v3388_v42 }
 0xa68   :  { %4202 = vrcp.f32 %v3378_v2 }
 0xa69   :  { %4204 = vtanh.f32 %v3389_v10 }
 0xa6a   :  { %4206 = vrcp.f32 %v3379_v26 }
 0xa71   :  { %v4201_v30 = vpop.eup %4200 }
 0xa72   :  { %v4203_v21 = vpop.eup %4202 }
 0xa73   :  { %v4205_v22 = vpop.eup %4204  ;;  %v3392_v40 = vmul.f32 %v4203_v21, %v4201_v30 }
 0xa74   :  { %v4207_v23 = vpop.eup %4206 }
 0xa75   :  { %v3393_v43 = vmul.f32 %v4207_v23, %v4205_v22 }
 0xa76   :  { %4278 = dma.done.wait [#allocation4], 4096 }
 0xa77   :  { %4279 = vsyncadd [#allocation4], 4294963200 }
 0xa78   :  { %4280 = dma.done.wait [#allocation4 + $0x1], 128 }
 0xa79   :  { %4281 = vsyncadd [#allocation4 + $0x1], 4294967168  ;;  %v3435_v5 = vpack.c.bf16 %v3393_v43, %v3393_v43  ;;  %v4288_v47 = vmov 0.0   ;;  %v3410_v33 = vld [vmem:[#allocation2 + $0x40] sm:$0xff]  ;;  %v3411_v37 = vld [vmem:[#allocation2 + $0x48] sm:$0xff]  ;;  %v3434_v24 = vpack.c.bf16 %v3392_v40, %v3392_v40  ;;  %vm4289_vm0 = vmmov 0  }
 0xa7a   :  { %3900 = vmatprep.subr.bf16.mxu1 %v4288_v47  ;;  %v3402_v15 = vld [vmem:[#allocation2] sm:$0xff]  ;;  %3860 = vmatprep.subr.bf16.mxu0 %v3410_v33  ;;  %v3403_v45 = vld [vmem:[#allocation2 + $0x8] sm:$0xff]  ;;  %v3412_v16 = vld [vmem:[#allocation2 + $0x50] sm:$0xff] }
 0xa7b   :  { %3472 = vmatprep.mubr.bf16.mxu0 %v3435_v5  ;;  %3861 = vmatpush3.bf16.msra.mxu0 %v3402_v15  ;;  %v3418_v48 = vld [vmem:[#allocation2 + $0x80] sm:$0xff]  ;;  %v3404_v7 = vld [vmem:[#allocation2 + $0x10] sm:$0xff]  ;;  %v3419_v32 = vld [vmem:[#allocation2 + $0x88] sm:$0xff] }
 0xa7c   :  { %3862 = vmatprep.subr.bf16.mxu0 %v3411_v37  ;;  %3901 = vmatpush3.bf16.msra.mxu1 %v3418_v48  ;;  %v3413_v36 = vld [vmem:[#allocation2 + $0x58] sm:$0xff]  ;;  %v3420_v4 = vld [vmem:[#allocation2 + $0x90] sm:$0xff]  ;;  %v3414_v38 = vld [vmem:[#allocation2 + $0x60] sm:$0xff] }
 0xa7d   :  { %3902 = vmatprep.subr.bf16.mxu1 %v4288_v47  ;;  %v3405_v31 = vld [vmem:[#allocation2 + $0x18] sm:$0xff]  ;;  %v3406_v56 = vld [vmem:[#allocation2 + $0x20] sm:$0xff]  ;;  %v3415_v8 = vld [vmem:[#allocation2 + $0x68] sm:$0xff]  ;;  %3916 = vmatprep.mubr.msk.bf16.mxu1 %vm4289_vm0, %v4288_v47 }
 0xa7e   :  { %v3421_v39 = vld [vmem:[#allocation2 + $0x98] sm:$0xff]  ;;  %v3407_v55 = vld [vmem:[#allocation2 + $0x28] sm:$0xff]  ;;  %v3416_v41 = vld [vmem:[#allocation2 + $0x70] sm:$0xff] }
 0xa7f   :  { %3863 = vmatpush3.bf16.msra.mxu0 %v3403_v45  ;;  %v3408_v44 = vld [vmem:[#allocation2 + $0x30] sm:$0xff]  ;;  %v3417_v1 = vld [vmem:[#allocation2 + $0x78] sm:$0xff]  ;;  %v3422_v49 = vld [vmem:[#allocation2 + $0xa0] sm:$0xff] }
 0xa80   :  { %3864 = vmatprep.subr.bf16.mxu0 %v3412_v16  ;;  %3903 = vmatpush3.bf16.msra.mxu1 %v3419_v32  ;;  %v3409_v17 = vld [vmem:[#allocation2 + $0x38] sm:$0xff]  ;;  %v3423_v54 = vld [vmem:[#allocation2 + $0xa8] sm:$0xff]  ;;  %v3424_v18 = vld [vmem:[#allocation2 + $0xb0] sm:$0xff] }
 0xa81   :  { %3904 = vmatprep.subr.bf16.mxu1 %v4288_v47  ;;  %v3425_v13 = vld [vmem:[#allocation2 + $0xb8] sm:$0xff]  ;;  %v3426_v28 = vld [vmem:[#allocation2 + $0xc0] sm:$0xff]  ;;  %v3427_v46 = vld [vmem:[#allocation2 + $0xc8] sm:$0xff] }
 0xa82   :  { %v3428_v3 = vld [vmem:[#allocation2 + $0xd0] sm:$0xff]  ;;  %v3429_v61 = vld [vmem:[#allocation2 + $0xd8] sm:$0xff]  ;;  %v3430_v62 = vld [vmem:[#allocation2 + $0xe0] sm:$0xff] }
 0xa83   :  { %3865 = vmatpush3.bf16.msra.mxu0 %v3404_v7  ;;  %v3431_v0 = vld [vmem:[#allocation2 + $0xe8] sm:$0xff]  ;;  %v7246_v6 = vld [vmem:[#allocation18_spill] sm:$0xff]  ;;  %v3432_v51 = vld [vmem:[#allocation2 + $0xf0] sm:$0xff] }
 0xa84   :  { %3866 = vmatprep.subr.bf16.mxu0 %v3413_v36  ;;  %3905 = vmatpush3.bf16.msra.mxu1 %v3420_v4  ;;  %v7244_v29 = vld [vmem:[#allocation147_spill] sm:$0xff]  ;;  %v3433_v60 = vld [vmem:[#allocation2 + $0xf8] sm:$0xff] }
 0xa85   :  { %3906 = vmatprep.subr.bf16.mxu1 %v4288_v47  ;;  %v7245_v14 = vsub.s32 0, %v7244_v29  ;;  %v7247_v9 = vsub.s32 1, %v7244_v29  ;;  %v7248_v25 = vsub.s32 2, %v7244_v29  ;;  %v7249_v42 = vsub.s32 3, %v7244_v29 }
 0xa86   :  { %v7250_v5 = vsub.s32 4, %v7244_v29 }
 0xa87   :  { %3867 = vmatpush3.bf16.msra.mxu0 %v3405_v31  ;;  %v3439_v53 = vrot.slane %v7246_v6, %v7245_v14  ;;  %v3486_v63 = vrot.slane %v7246_v6, %v7247_v9  ;;  %v3491_v52 = vrot.slane %v7246_v6, %v7248_v25  ;;  %v3497_v2 = vrot.slane %v7246_v6, %v7249_v42 }
 0xa88   :  { %3868 = vmatprep.subr.bf16.mxu0 %v3414_v38  ;;  %3907 = vmatpush3.bf16.msra.mxu1 %v3421_v39 }
 0xa89   :  { %3908 = vmatprep.subr.bf16.mxu1 %v4288_v47 }
 0xa8b   :  { %3869 = vmatpush3.bf16.msra.mxu0 %v3406_v56 }
 0xa8c   :  { %3870 = vmatprep.subr.bf16.mxu0 %v3415_v8  ;;  %3909 = vmatpush3.bf16.msra.mxu1 %v3422_v49 }
 0xa8d   :  { %3910 = vmatprep.subr.bf16.mxu1 %v4288_v47 }
 0xa8f   :  { %3871 = vmatpush3.bf16.msra.mxu0 %v3407_v55 }
 0xa90   :  { %3872 = vmatprep.subr.bf16.mxu0 %v3416_v41  ;;  %3911 = vmatpush3.bf16.msra.mxu1 %v3423_v54 }
 0xa91   :  { %3912 = vmatprep.subr.bf16.mxu1 %v4288_v47 }
 0xa93   :  { %3873 = vmatpush3.bf16.msra.mxu0 %v3408_v44 }
 0xa94   :  { %3874 = vmatprep.subr.bf16.mxu0 %v3417_v1  ;;  %3913 = vmatpush3.bf16.msra.mxu1 %v3424_v18 }
 0xa95   :  { %3914 = vmatprep.subr.bf16.mxu1 %v4288_v47 }
 0xa97   :  { %3875 = vmatpush3.bf16.msra.mxu0 %v3409_v17 }
 0xa98   :  { %3920 = vmatprep.subr.bf16.mxu0 %v4288_v47  ;;  %3915 = vmatpush3.bf16.msra.mxu1 %v3425_v13 }
 0xa9a   :  { %3473 = vmatmul.mubr.bf16.vlgmr.msra.gmra.mrb[96].mxu0 %v3434_v24 }
 0xa9b   :  { %3936 = vmatprep.mubr.msk.bf16.mxu0 %vm4289_vm0, %v4288_v47  ;;  %3921 = vmatpush3.bf16.msra.mxu0 %v3426_v28 }
 0xa9c   :  { %3922 = vmatprep.subr.bf16.mxu0 %v4288_v47 }
 0xa9f   :  { %3923 = vmatpush3.bf16.msra.mxu0 %v3427_v46 }
 0xaa0   :  { %3924 = vmatprep.subr.bf16.mxu0 %v4288_v47 }
 0xaa3   :  { %3925 = vmatpush3.bf16.msra.mxu0 %v3428_v3 }
 0xaa4   :  { %3926 = vmatprep.subr.bf16.mxu0 %v4288_v47 }
 0xaa7   :  { %3927 = vmatpush3.bf16.msra.mxu0 %v3429_v61 }
 0xaa8   :  { %3928 = vmatprep.subr.bf16.mxu0 %v4288_v47 }
 0xaab   :  { %3929 = vmatpush3.bf16.msra.mxu0 %v3430_v62 }
 0xaac   :  { %3930 = vmatprep.subr.bf16.mxu0 %v4288_v47 }
 0xaaf   :  { %3931 = vmatpush3.bf16.msra.mxu0 %v3431_v0 }
 0xab0   :  { %3932 = vmatprep.subr.bf16.mxu0 %v4288_v47 }
 0xab3   :  { %3933 = vmatpush3.bf16.msra.mxu0 %v3432_v51 }
 0xab4   :  { %3934 = vmatprep.subr.bf16.mxu0 %v4288_v47  ;;  %v3545_v47 = vrot.slane %v7246_v6, %v7250_v5 }
 0xab7   :  { %3935 = vmatpush3.bf16.msra.mxu0 %v3433_v60 }
 0xb6d   :  { %v3876_v11 = vpop.f32.mrb[96].mxu0 }
 0xb6e   :  { %v3877_v34 = vpop.f32.mrb[97].mxu0 }
 0xb6f   :  { %v3878_v59 = vadd.f32 %v3877_v34, %v3876_v11  ;;  %v3879_v35 = vpop.f32.mrb[98].mxu0 }
 0xb70   :  { %v3880_v20 = vpop.f32.mrb[99].mxu0 }
 0xb71   :  { %v3475_v12 = vadd.f32 %v3878_v59, %v3439_v53 }
 0xb73   :  { %vm3480_vm1 = vcmp.ge.f32.partialorder %v3475_v12, 0.0  ;;  %v3481_v19 = vmul.f32 0.01, %v3475_v12 }
 0xb75   :  { %v3482_v58 = vsel %vm3480_vm1, %v3475_v12, %v3481_v19 }
 0xb76   :  { %v3487_v27 = vmul.f32 %v3486_v63, %v3482_v58 }
 0xb78   :  { %v3492_v57 = vadd.f32 %v3491_v52, %v3487_v27 }
 0xb7a   :  { %v3493_v50 = vpack.c.bf16 %v3492_v57, %v3492_v57 }
 0xb7c   :  { %3917 = vmatmul.mubr.bf16.vlgmr.msra.gmra.mrb[96].mxu1 %v3493_v50 }
 0xc4f   :  { %v3532_v10 = vpop.f32.mrb[96].mxu1 }
 0xc50   :  { %v3533_v26 = vadd.f32 %v3532_v10, %v3497_v2  ;;  %v3918_v30 = vpop.f32.mrb[97].mxu1 }
 0xc51   :  { %v3535_v21 = vpop.f32.mrb[98].mxu1 }
 0xc52   :  { %vm3538_vm2 = vcmp.ge.f32.partialorder %v3533_v26, 0.0  ;;  %v3539_v22 = vmul.f32 0.01, %v3533_v26  ;;  %v3919_v40 = vpop.f32.mrb[99].mxu1 }
 0xc54   :  { %v3540_v23 = vsel %vm3538_vm2, %v3533_v26, %v3539_v22 }
 0xc55   :  { %v3541_v43 = vpack.c.bf16 %v3540_v23, %v3540_v23 }
 0xc57   :  { %3937 = vmatmul.mubr.bf16.vlgmr.msra.gmra.mrb[100].mxu0 %v3541_v43 }
 0xd2a   :  { %v3580_v33 = vpop.f32.mrb[100].mxu0 }
 0xd2b   :  { %v3581_v15 = vadd.f32 %v3580_v33, %v3545_v47  ;;  %v3938_v37 = vpop.f32.mrb[101].mxu0 }
 0xd2c   :  { %v3583_v45 = vpop.f32.mrb[102].mxu0 }
 0xd2d   :  { %3586 = vst [vmem:[%s6151_s6] sm:$0xff] %v3581_v15  ;;  %v3939_v16 = vpop.f32.mrb[103].mxu0 }
 0xd2e   :  { %3591 = vsyncpa [#allocation6], 1 }
 0xd2f   :  { %3592 = vsyncpa [#allocation8], 1 }
 0xd30   :  { %3593 = vsyncmov [#allocation4] }
 0xd33   :  { %s3594_s19 = vpop.sfrf %3593 }
 0xd34   :  { %p3858_p10 = scmp.ne.s32.totalorder %s3594_s19, 0 }
 0xd36   :  { %3598 = shalt.err (%p3858_p10)  }
 0xd37   :  { %3600 = vsyncmov [#allocation4 + $0x1] }
 0xd3a   :  { %s3601_s20 = vpop.sfrf %3600 }
 0xd3b   :  { %p3859_p11 = scmp.ne.s32.totalorder %s3601_s20, 0 }
 0xd3d   :  { %3605 = shalt.err (%p3859_p11)  }

</bundles_post_ra>
